<compile_context>
chip_gen: v7x
topology: tpu7x:2x2x1
jax: 0.10.0
libtpu: 0.0.40
codegen_flags: <defaults>
</compile_context>

<pallas_src>
import jax
import jax.numpy as jnp
from jax.experimental import pallas as pl
from jax.experimental.pallas import tpu as pltpu

SELU_ALPHA = 1.6732632423543772
SELU_SCALE = 1.0507009873554805


def _selu(x):
    # Standard SELU (pure-JAX reference only); exp only on the non-positive branch.
    return SELU_SCALE * (jnp.maximum(x, 0.0)
                         + SELU_ALPHA * (jnp.exp(jnp.minimum(x, 0.0)) - 1.0))


def _g(x):
    # Scale-free activation used inside the kernel once SELU_SCALE and the
    # constant -SCALE*ALPHA offset are folded into the next layer's weights/bias:
    #   selu(a) = SCALE * g(a) - SCALE*ALPHA
    return jnp.maximum(x, 0.0) + SELU_ALPHA * jnp.exp(jnp.minimum(x, 0.0))


def _round_up(n, m):
    return ((n + m - 1) // m) * m


def ipinn_mlp_kernel(x_ref, t_ref,
                     w1x_ref, w1t_ref, b1_ref,
                     w2_ref, b2_ref,
                     w3_ref, b3_ref,
                     w4_ref, b4_ref,
                     w5_ref, b5_ref,
                     o_ref):
    # x_ref/t_ref: (TM, 1) f32; w1x/w1t/b1: (1, H); w2..w4: (H, H); b2..b4: (1, H)
    # w5_ref: (1, H) (row form of the folded (H, 1) output weight); b5: (1, 1)
    # o_ref: (TM, 1)

    # Layer 1: K=2 contraction -> two VPU broadcast multiply-adds (no MXU, no concat).
    h = _g(x_ref[...] * w1x_ref[...] + t_ref[...] * w1t_ref[...] + b1_ref[...])

    # Layers 2-4: MXU matmuls (optionally bf16 inputs, f32 accumulation).
    # Bias add + activation stay in f32 (portable to v5e, which lacks bf16 VPU/EUP).
    h = _g(jnp.dot(h.astype(w2_ref.dtype), w2_ref[...],
                   preferred_element_type=jnp.float32) + b2_ref[...])
    h = _g(jnp.dot(h.astype(w3_ref.dtype), w3_ref[...],
                   preferred_element_type=jnp.float32) + b3_ref[...])
    h = _g(jnp.dot(h.astype(w4_ref.dtype), w4_ref[...],
                   preferred_element_type=jnp.float32) + b4_ref[...])

    # Layer 5: N=1 output -> VPU multiply + cross-lane (XLU) reduce, not MXU.
    out = jnp.sum(h * w5_ref[...], axis=-1, keepdims=True) + b5_ref[...]
    o_ref[...] = out.astype(o_ref.dtype)


def _fold_selu_scale(w, b):
    # selu(a) @ W + b  ==  g(a) @ (SCALE*W) + (b - SCALE*ALPHA * sum_k W[k, :])
    w_f = jnp.asarray(w, jnp.float32)
    b_f = jnp.asarray(b, jnp.float32)
    b_new = b_f - SELU_SCALE * SELU_ALPHA * jnp.sum(w_f, axis=0, keepdims=True)
    return SELU_SCALE * w_f, b_new


def _const_spec(shape):
    nd = len(shape)
    idx = lambda i, _nd=nd: (0,) * _nd
    # Grid-constant blocks are never re-fetched -> a single pipeline buffer
    # suffices (halves resident weight VMEM).  Fall back gracefully if the
    # installed jax does not expose pipeline_mode / Buffered.
    if hasattr(pl, "Buffered"):
        try:
            return pl.BlockSpec(shape, idx, pipeline_mode=pl.Buffered(1))
        except TypeError:
            pass
    return pl.BlockSpec(shape, idx)


def simple_ipinn_forward(x, t, params, *, tile_m=None, use_bf16=True):
    """x, t: [N, 1] float32.  Returns [N, 1] float32."""
    N = x.shape[0]
    (w1, b1), (w2, b2), (w3, b3), (w4, b4), (w5, b5) = params
    H = w1.shape[1]
    assert w1.shape == (2, H), f"w1 must be (2, H), got {w1.shape}"
    assert w5.shape == (H, 1), f"w5 must be (H, 1), got {w5.shape}"

    # Layer-1 weight rows for the VPU outer product (raw x,t input -> no fold).
    w1x = w1[0:1, :]                 # (1, H)
    w1t = w1[1:2, :]                 # (1, H)

    # Fold the preceding SELU's scale / constant offset into layers 2..5.
    w2f, b2f = _fold_selu_scale(w2, b2)
    w3f, b3f = _fold_selu_scale(w3, b3)
    w4f, b4f = _fold_selu_scale(w4, b4)
    w5f, b5f = _fold_selu_scale(w5, b5)
    w5_row = w5f.reshape(1, H)       # (1, H)

    if use_bf16:
        w2f = w2f.astype(jnp.bfloat16)
        w3f = w3f.astype(jnp.bfloat16)
        w4f = w4f.astype(jnp.bfloat16)

    # Tile selection: large tiles amortize the ~0.35 us per-grid-step overhead,
    # but cap so the grid keeps >= 2 "parallel" steps (both v7x TCs get work).
    if tile_m is None:
        tile_m = 2048
    n8 = _round_up(N, 8)
    two_step_cap = max(8, _round_up(n8 // 2, 8)) if n8 >= 16 else 8
    tile_m = max(8, min(_round_up(tile_m, 8), two_step_cap, n8))

    # Pad the batch so it divides evenly into tiles.
    n_pad = _round_up(N, tile_m)
    if n_pad != N:
        x = jnp.pad(x, ((0, n_pad - N), (0, 0)))
        t = jnp.pad(t, ((0, n_pad - N), (0, 0)))

    grid = (n_pad // tile_m,)

    in_specs = [
        pl.BlockSpec((tile_m, 1), lambda i: (i, 0)),      # x, tiled over rows
        pl.BlockSpec((tile_m, 1), lambda i: (i, 0)),      # t, tiled over rows
        _const_spec((1, H)), _const_spec((1, H)), _const_spec((1, H)),   # layer 1
        _const_spec((H, H)), _const_spec((1, H)),                        # layer 2
        _const_spec((H, H)), _const_spec((1, H)),                        # layer 3
        _const_spec((H, H)), _const_spec((1, H)),                        # layer 4
        _const_spec((1, H)), _const_spec((1, 1)),                        # layer 5
    ]
    out_spec = pl.BlockSpec((tile_m, 1), lambda i: (i, 0))

    out = pl.pallas_call(
        ipinn_mlp_kernel,
        out_shape=jax.ShapeDtypeStruct((n_pad, 1), jnp.float32),
        grid_spec=pltpu.PrefetchScalarGridSpec(
            num_scalar_prefetch=0,
            grid=grid,
            in_specs=in_specs,
            out_specs=out_spec,
        ),
        compiler_params=pltpu.CompilerParams(
            dimension_semantics=("parallel",),
            # Explicit budget: covers v5e's 16 MiB scoped default and stays
            # inside v7x's 64 MiB physical VMEM.
            vmem_limit_bytes=32 * 1024 * 1024,
        ),
    )(x, t, w1x, w1t, b1, w2f, b2f, w3f, b3f, w4f, b4f, w5_row, b5f)

    return out[:N]


def init_params(key, hidden_dim):
    """Deterministic synthetic init. Weights stored as [in, out] (pre-transposed)."""
    dims = [(2, hidden_dim), (hidden_dim, hidden_dim), (hidden_dim, hidden_dim),
            (hidden_dim, hidden_dim), (hidden_dim, 1)]
    params = []
    for (din, dout) in dims:
        key, kw, kb = jax.random.split(key, 3)
        scale = 1.0 / jnp.sqrt(jnp.float32(din))
        w = jax.random.uniform(kw, (din, dout), jnp.float32, -scale, scale)
        b = jax.random.uniform(kb, (1, dout), jnp.float32, -scale, scale)
        params.append((w, b))
    return params


def reference_forward(x, t, params):
    """Pure-JAX f32 reference (standard SELU, unfolded weights)."""
    h = jnp.concatenate([x, t], axis=1)
    for i, (w, b) in enumerate(params):
        h = h @ w + b
        if i < len(params) - 1:
            h = _selu(h)
    return h


if __name__ == "__main__":
    hidden_dim = 256   # module default; fills the 256x256 bf16 MXU on v6e/v7x
    batch = 512        # -> tile_m capped to 256, grid=(2,): both v7x TCs get work

    key = jax.random.PRNGKey(0)
    kx, kt, kp = jax.random.split(key, 3)
    x = jax.random.uniform(kx, (batch, 1), jnp.float32)
    t = jax.random.uniform(kt, (batch, 1), jnp.float32)
    params = init_params(kp, hidden_dim)

    ref = reference_forward(x, t, params)

    # Full-f32 path: tight check vs the pure-JAX reference.
    out_f32 = jax.block_until_ready(
        simple_ipinn_forward(x, t, params, use_bf16=False))
    assert out_f32.shape == (batch, 1)
    assert jnp.allclose(out_f32, ref, atol=1e-4, rtol=1e-4), "f32 mismatch"

    # bf16-matmul / f32-accumulate fast path: looser tolerance.
    out_bf16 = jax.block_until_ready(
        simple_ipinn_forward(x, t, params, use_bf16=True))
    assert out_bf16.shape == (batch, 1)
    assert jnp.allclose(out_bf16, ref, atol=5e-2, rtol=5e-2), "bf16 mismatch"

    # Non-multiple batch exercises the padding path (auto tile_m cap -> grid=(2,)).
    out_odd = jax.block_until_ready(
        simple_ipinn_forward(x[:250], t[:250], params, use_bf16=False))
    assert out_odd.shape == (250, 1)
    assert jnp.allclose(out_odd, ref[:250], atol=1e-4, rtol=1e-4), "pad mismatch"

    # TODO(synk): get_solution (autograd du/dx) is a backward-mode construct;
    # only the forward pass is implemented as a Pallas kernel here.
    print("KERNEL_OK")
</pallas_src>

<mosaic_0001>
module attributes {stable_mosaic.version = 11 : i64} {
  func.func @ipinn_mlp_kernel(%arg0: i32, %arg1: memref<256x1xf32, #tpu.memory_space<vmem>>, %arg2: memref<256x1xf32, #tpu.memory_space<vmem>>, %arg3: memref<1x256xf32, #tpu.memory_space<vmem>>, %arg4: memref<1x256xf32, #tpu.memory_space<vmem>>, %arg5: memref<1x256xf32, #tpu.memory_space<vmem>>, %arg6: memref<256x256xf32, #tpu.memory_space<vmem>>, %arg7: memref<1x256xf32, #tpu.memory_space<vmem>>, %arg8: memref<256x256xf32, #tpu.memory_space<vmem>>, %arg9: memref<1x256xf32, #tpu.memory_space<vmem>>, %arg10: memref<256x256xf32, #tpu.memory_space<vmem>>, %arg11: memref<1x256xf32, #tpu.memory_space<vmem>>, %arg12: memref<1x256xf32, #tpu.memory_space<vmem>>, %arg13: memref<1x1xf32, #tpu.memory_space<vmem>>, %arg14: memref<256x1xf32, #tpu.memory_space<vmem>>) attributes {dimension_semantics = [#tpu.dimension_semantics<parallel>], iteration_bounds = array<i64: 2>, scalar_prefetch = 0 : i64, scratch_operands = 0 : i64, tpu.core_type = #tpu.core_type<tc>, window_params = [{transform_indices = @transform_0, window_bounds = array<i64: 256, 1>}, {transform_indices = @transform_1, window_bounds = array<i64: 256, 1>}, {pipeline_mode = #tpu.pipeline_mode<synchronous>, transform_indices = @transform_2, window_bounds = array<i64: 1, 256>}, {pipeline_mode = #tpu.pipeline_mode<synchronous>, transform_indices = @transform_3, window_bounds = array<i64: 1, 256>}, {pipeline_mode = #tpu.pipeline_mode<synchronous>, transform_indices = @transform_4, window_bounds = array<i64: 1, 256>}, {pipeline_mode = #tpu.pipeline_mode<synchronous>, transform_indices = @transform_5, window_bounds = array<i64: 256, 256>}, {pipeline_mode = #tpu.pipeline_mode<synchronous>, transform_indices = @transform_6, window_bounds = array<i64: 1, 256>}, {pipeline_mode = #tpu.pipeline_mode<synchronous>, transform_indices = @transform_7, window_bounds = array<i64: 256, 256>}, {pipeline_mode = #tpu.pipeline_mode<synchronous>, transform_indices = @transform_8, window_bounds = array<i64: 1, 256>}, {pipeline_mode = #tpu.pipeline_mode<synchronous>, transform_indices = @transform_9, window_bounds = array<i64: 256, 256>}, {pipeline_mode = #tpu.pipeline_mode<synchronous>, transform_indices = @transform_10, window_bounds = array<i64: 1, 256>}, {pipeline_mode = #tpu.pipeline_mode<synchronous>, transform_indices = @transform_11, window_bounds = array<i64: 1, 256>}, {pipeline_mode = #tpu.pipeline_mode<synchronous>, transform_indices = @transform_12, window_bounds = array<i64: 1, 1>}, {transform_indices = @transform_13, window_bounds = array<i64: 256, 1>}]} {
    %c0 = arith.constant 0 : index
    %c0_0 = arith.constant 0 : index
    %0 = vector.load %arg1[%c0, %c0_0] : memref<256x1xf32, #tpu.memory_space<vmem>>, vector<256x1xf32>
    %c0_1 = arith.constant 0 : index
    %c0_2 = arith.constant 0 : index
    %1 = vector.load %arg3[%c0_1, %c0_2] : memref<1x256xf32, #tpu.memory_space<vmem>>, vector<1x256xf32>
    %2 = vector.broadcast %0 : vector<256x1xf32> to vector<256x256xf32>
    %3 = vector.broadcast %1 : vector<1x256xf32> to vector<256x256xf32>
    %4 = arith.mulf %2, %3 : vector<256x256xf32>
    %c0_3 = arith.constant 0 : index
    %c0_4 = arith.constant 0 : index
    %5 = vector.load %arg2[%c0_3, %c0_4] : memref<256x1xf32, #tpu.memory_space<vmem>>, vector<256x1xf32>
    %c0_5 = arith.constant 0 : index
    %c0_6 = arith.constant 0 : index
    %6 = vector.load %arg4[%c0_5, %c0_6] : memref<1x256xf32, #tpu.memory_space<vmem>>, vector<1x256xf32>
    %7 = vector.broadcast %5 : vector<256x1xf32> to vector<256x256xf32>
    %8 = vector.broadcast %6 : vector<1x256xf32> to vector<256x256xf32>
    %9 = arith.mulf %7, %8 : vector<256x256xf32>
    %10 = arith.addf %4, %9 : vector<256x256xf32>
    %c0_7 = arith.constant 0 : index
    %c0_8 = arith.constant 0 : index
    %11 = vector.load %arg5[%c0_7, %c0_8] : memref<1x256xf32, #tpu.memory_space<vmem>>, vector<1x256xf32>
    %12 = vector.broadcast %11 : vector<1x256xf32> to vector<256x256xf32>
    %13 = arith.addf %10, %12 : vector<256x256xf32>
    %cst = arith.constant 0.000000e+00 : f32
    %14 = vector.broadcast %cst : f32 to vector<256x256xf32>
    %15 = arith.maximumf %13, %14 : vector<256x256xf32>
    %cst_9 = arith.constant 0.000000e+00 : f32
    %16 = vector.broadcast %cst_9 : f32 to vector<256x256xf32>
    %17 = arith.minimumf %13, %16 : vector<256x256xf32>
    %18 = math.exp %17 : vector<256x256xf32>
    %cst_10 = arith.constant 1.67326319 : f32
    %19 = vector.broadcast %cst_10 : f32 to vector<256x256xf32>
    %20 = arith.mulf %19, %18 : vector<256x256xf32>
    %21 = arith.addf %15, %20 : vector<256x256xf32>
    %c0_11 = arith.constant 0 : index
    %c0_12 = arith.constant 0 : index
    %22 = vector.load %arg6[%c0_11, %c0_12] : memref<256x256xf32, #tpu.memory_space<vmem>>, vector<256x256xf32>
    %cst_13 = arith.constant dense<0.000000e+00> : vector<256x256xf32>
    %23 = tpu.matmul %21, %22, %cst_13 {dimension_numbers = #tpu.dot_dimension_numbers<[1], [0], [0], [1], [0, 0, 1, 1], [], []>} : vector<256x256xf32>, vector<256x256xf32>, vector<256x256xf32> -> vector<256x256xf32>
    %c0_14 = arith.constant 0 : index
    %c0_15 = arith.constant 0 : index
    %24 = vector.load %arg7[%c0_14, %c0_15] : memref<1x256xf32, #tpu.memory_space<vmem>>, vector<1x256xf32>
    %25 = vector.broadcast %24 : vector<1x256xf32> to vector<256x256xf32>
    %26 = arith.addf %23, %25 : vector<256x256xf32>
    %cst_16 = arith.constant 0.000000e+00 : f32
    %27 = vector.broadcast %cst_16 : f32 to vector<256x256xf32>
    %28 = arith.maximumf %26, %27 : vector<256x256xf32>
    %cst_17 = arith.constant 0.000000e+00 : f32
    %29 = vector.broadcast %cst_17 : f32 to vector<256x256xf32>
    %30 = arith.minimumf %26, %29 : vector<256x256xf32>
    %31 = math.exp %30 : vector<256x256xf32>
    %cst_18 = arith.constant 1.67326319 : f32
    %32 = vector.broadcast %cst_18 : f32 to vector<256x256xf32>
    %33 = arith.mulf %32, %31 : vector<256x256xf32>
    %34 = arith.addf %28, %33 : vector<256x256xf32>
    %c0_19 = arith.constant 0 : index
    %c0_20 = arith.constant 0 : index
    %35 = vector.load %arg8[%c0_19, %c0_20] : memref<256x256xf32, #tpu.memory_space<vmem>>, vector<256x256xf32>
    %cst_21 = arith.constant dense<0.000000e+00> : vector<256x256xf32>
    %36 = tpu.matmul %34, %35, %cst_21 {dimension_numbers = #tpu.dot_dimension_numbers<[1], [0], [0], [1], [0, 0, 1, 1], [], []>} : vector<256x256xf32>, vector<256x256xf32>, vector<256x256xf32> -> vector<256x256xf32>
    %c0_22 = arith.constant 0 : index
    %c0_23 = arith.constant 0 : index
    %37 = vector.load %arg9[%c0_22, %c0_23] : memref<1x256xf32, #tpu.memory_space<vmem>>, vector<1x256xf32>
    %38 = vector.broadcast %37 : vector<1x256xf32> to vector<256x256xf32>
    %39 = arith.addf %36, %38 : vector<256x256xf32>
    %cst_24 = arith.constant 0.000000e+00 : f32
    %40 = vector.broadcast %cst_24 : f32 to vector<256x256xf32>
    %41 = arith.maximumf %39, %40 : vector<256x256xf32>
    %cst_25 = arith.constant 0.000000e+00 : f32
    %42 = vector.broadcast %cst_25 : f32 to vector<256x256xf32>
    %43 = arith.minimumf %39, %42 : vector<256x256xf32>
    %44 = math.exp %43 : vector<256x256xf32>
    %cst_26 = arith.constant 1.67326319 : f32
    %45 = vector.broadcast %cst_26 : f32 to vector<256x256xf32>
    %46 = arith.mulf %45, %44 : vector<256x256xf32>
    %47 = arith.addf %41, %46 : vector<256x256xf32>
    %c0_27 = arith.constant 0 : index
    %c0_28 = arith.constant 0 : index
    %48 = vector.load %arg10[%c0_27, %c0_28] : memref<256x256xf32, #tpu.memory_space<vmem>>, vector<256x256xf32>
    %cst_29 = arith.constant dense<0.000000e+00> : vector<256x256xf32>
    %49 = tpu.matmul %47, %48, %cst_29 {dimension_numbers = #tpu.dot_dimension_numbers<[1], [0], [0], [1], [0, 0, 1, 1], [], []>} : vector<256x256xf32>, vector<256x256xf32>, vector<256x256xf32> -> vector<256x256xf32>
    %c0_30 = arith.constant 0 : index
    %c0_31 = arith.constant 0 : index
    %50 = vector.load %arg11[%c0_30, %c0_31] : memref<1x256xf32, #tpu.memory_space<vmem>>, vector<1x256xf32>
    %51 = vector.broadcast %50 : vector<1x256xf32> to vector<256x256xf32>
    %52 = arith.addf %49, %51 : vector<256x256xf32>
    %cst_32 = arith.constant 0.000000e+00 : f32
    %53 = vector.broadcast %cst_32 : f32 to vector<256x256xf32>
    %54 = arith.maximumf %52, %53 : vector<256x256xf32>
    %cst_33 = arith.constant 0.000000e+00 : f32
    %55 = vector.broadcast %cst_33 : f32 to vector<256x256xf32>
    %56 = arith.minimumf %52, %55 : vector<256x256xf32>
    %57 = math.exp %56 : vector<256x256xf32>
    %cst_34 = arith.constant 1.67326319 : f32
    %58 = vector.broadcast %cst_34 : f32 to vector<256x256xf32>
    %59 = arith.mulf %58, %57 : vector<256x256xf32>
    %60 = arith.addf %54, %59 : vector<256x256xf32>
    %c0_35 = arith.constant 0 : index
    %c0_36 = arith.constant 0 : index
    %61 = vector.load %arg12[%c0_35, %c0_36] : memref<1x256xf32, #tpu.memory_space<vmem>>, vector<1x256xf32>
    %62 = vector.broadcast %61 : vector<1x256xf32> to vector<256x256xf32>
    %63 = arith.mulf %60, %62 : vector<256x256xf32>
    %cst_37 = arith.constant dense<0.000000e+00> : vector<256xf32>
    %64 = vector.multi_reduction <add>, %63, %cst_37 [1] : vector<256x256xf32> to vector<256xf32>
    %65 = vector.shape_cast %64 : vector<256xf32> to vector<256x1xf32>
    %c0_38 = arith.constant 0 : index
    %c0_39 = arith.constant 0 : index
    %66 = vector.load %arg13[%c0_38, %c0_39] : memref<1x1xf32, #tpu.memory_space<vmem>>, vector<1x1xf32>
    %67 = vector.broadcast %66 : vector<1x1xf32> to vector<256x1xf32>
    %68 = arith.addf %65, %67 : vector<256x1xf32>
    %c0_40 = arith.constant 0 : index
    %c0_41 = arith.constant 0 : index
    %69 = vector.load %arg14[%c0_40, %c0_41] : memref<256x1xf32, #tpu.memory_space<vmem>>, vector<256x1xf32>
    tpu.vector_store %arg14[%c0_40, %c0_41], %68 {strides = array<i32>} : memref<256x1xf32, #tpu.memory_space<vmem>>, vector<256x1xf32>,
    return
  }
  func.func @transform_0(%arg0: i32) -> (i32, i32) {
    %c0_i32 = arith.constant 0 : i32
    %c0_i32_0 = arith.constant 0 : i32
    return %arg0, %c0_i32 : i32, i32
  }
  func.func @transform_1(%arg0: i32) -> (i32, i32) {
    %c0_i32 = arith.constant 0 : i32
    %c0_i32_0 = arith.constant 0 : i32
    return %arg0, %c0_i32 : i32, i32
  }
  func.func @transform_2(%arg0: i32) -> (i32, i32) {
    %c0_i32 = arith.constant 0 : i32
    %c0_i32_0 = arith.constant 0 : i32
    %c0_i32_1 = arith.constant 0 : i32
    return %c0_i32, %c0_i32_0 : i32, i32
  }
  func.func @transform_3(%arg0: i32) -> (i32, i32) {
    %c0_i32 = arith.constant 0 : i32
    %c0_i32_0 = arith.constant 0 : i32
    %c0_i32_1 = arith.constant 0 : i32
    return %c0_i32, %c0_i32_0 : i32, i32
  }
  func.func @transform_4(%arg0: i32) -> (i32, i32) {
    %c0_i32 = arith.constant 0 : i32
    %c0_i32_0 = arith.constant 0 : i32
    %c0_i32_1 = arith.constant 0 : i32
    return %c0_i32, %c0_i32_0 : i32, i32
  }
  func.func @transform_5(%arg0: i32) -> (i32, i32) {
    %c0_i32 = arith.constant 0 : i32
    %c0_i32_0 = arith.constant 0 : i32
    %c0_i32_1 = arith.constant 0 : i32
    return %c0_i32, %c0_i32_0 : i32, i32
  }
  func.func @transform_6(%arg0: i32) -> (i32, i32) {
    %c0_i32 = arith.constant 0 : i32
    %c0_i32_0 = arith.constant 0 : i32
    %c0_i32_1 = arith.constant 0 : i32
    return %c0_i32, %c0_i32_0 : i32, i32
  }
  func.func @transform_7(%arg0: i32) -> (i32, i32) {
    %c0_i32 = arith.constant 0 : i32
    %c0_i32_0 = arith.constant 0 : i32
    %c0_i32_1 = arith.constant 0 : i32
    return %c0_i32, %c0_i32_0 : i32, i32
  }
  func.func @transform_8(%arg0: i32) -> (i32, i32) {
    %c0_i32 = arith.constant 0 : i32
    %c0_i32_0 = arith.constant 0 : i32
    %c0_i32_1 = arith.constant 0 : i32
    return %c0_i32, %c0_i32_0 : i32, i32
  }
  func.func @transform_9(%arg0: i32) -> (i32, i32) {
    %c0_i32 = arith.constant 0 : i32
    %c0_i32_0 = arith.constant 0 : i32
    %c0_i32_1 = arith.constant 0 : i32
    return %c0_i32, %c0_i32_0 : i32, i32
  }
  func.func @transform_10(%arg0: i32) -> (i32, i32) {
    %c0_i32 = arith.constant 0 : i32
    %c0_i32_0 = arith.constant 0 : i32
    %c0_i32_1 = arith.constant 0 : i32
    return %c0_i32, %c0_i32_0 : i32, i32
  }
  func.func @transform_11(%arg0: i32) -> (i32, i32) {
    %c0_i32 = arith.constant 0 : i32
    %c0_i32_0 = arith.constant 0 : i32
    %c0_i32_1 = arith.constant 0 : i32
    return %c0_i32, %c0_i32_0 : i32, i32
  }
  func.func @transform_12(%arg0: i32) -> (i32, i32) {
    %c0_i32 = arith.constant 0 : i32
    %c0_i32_0 = arith.constant 0 : i32
    %c0_i32_1 = arith.constant 0 : i32
    return %c0_i32, %c0_i32_0 : i32, i32
  }
  func.func @transform_13(%arg0: i32) -> (i32, i32) {
    %c0_i32 = arith.constant 0 : i32
    %c0_i32_0 = arith.constant 0 : i32
    return %arg0, %c0_i32 : i32, i32
  }
}

</mosaic_0001>

<bundles_post_ra>
// kernel: tpu_custom_call.1
= control target key start
LH: loop header
LB: loop body
LE: loop exit
PB: predicated region body
PF: predicated region fallthrough
CT: control target
= control target key end

     0   :  { %s7112_s0 = inlined_call_operand.vmem [shape: f32[512,1], index: 0, kind: input, shape index: {}]   ;;  %s7113_s1 = inlined_call_operand.vmem [shape: f32[512,1], index: 1, kind: input, shape index: {}]   ;;  %s7114_s2 = inlined_call_operand.vmem [shape: f32[1,256], index: 2, kind: input, shape index: {}]   ;;  %s7115_s3 = inlined_call_operand.vmem [shape: f32[1,256], index: 3, kind: input, shape index: {}]   ;;  %s7116_s4 = inlined_call_operand.vmem [shape: f32[1,256], index: 4, kind: input, shape index: {}]   ;;  %s7117_s5 = inlined_call_operand.vmem [shape: f32[256,256], index: 5, kind: input, shape index: {}]   ;;  %s7118_s6 = inlined_call_operand.vmem [shape: f32[1,256], index: 6, kind: input, shape index: {}]   ;;  %s7119_s7 = inlined_call_operand.vmem [shape: f32[256,256], index: 7, kind: input, shape index: {}]   ;;  %s7120_s8 = inlined_call_operand.vmem [shape: f32[1,256], index: 8, kind: input, shape index: {}]   ;;  %s7121_s9 = inlined_call_operand.hbm [shape: f32[256,256], index: 9, kind: input, shape index: {}]   ;;  %s7122_s10 = inlined_call_operand.vmem [shape: f32[1,256], index: 10, kind: input, shape index: {}]   ;;  %s7123_s11 = inlined_call_operand.vmem [shape: f32[1,256], index: 11, kind: input, shape index: {}]   ;;  %s7124_s12 = inlined_call_operand.<no memory space> [shape: f32[1,1], index: 12, kind: input, shape index: {}]   ;;  %s7125_s13 = inlined_call_operand.vmem [shape: f32[512,1], index: 13, kind: output, shape index: {}]  }
   0x1   :  { %v18_v0 = vstv %s7124_s12 }
   0x2   :  { %19 = vst [vmem:[#allocation2] sm:$0x1] %v18_v0 }
   0x3   :  { %20 = vsyncpa [#allocation4], 0  ;;  %s4911_s27 = smov 0  }
   0x4 LB: > { %s4018_s28 = sadd.s32 4294967295, %s4832_s27   ;;  %p4020_p0 = scmp.ge.s32.totalorder %s4832_s27, 1  ;;  %s4832_s27 = sphi %s4911_s27, %s26_s27  }
   0x5   : > { %p340_p1 = scmp.lt.s32.totalorder %s4832_s27, 3  ;;  %s4834_s29 = smov [#allocation3]  }
   0x6   : > { %s373_s30 = sshll.u32 %s4834_s29, 4  ;;  %p4925_p3 = scmp.eq.s32.totalorder %s4018_s28, 0  ;;  %s374_s30 = int_to_ptr.vmem [resolvable:$true] %s373_s30 }
   0x7   : > { %p4919_p2 = pnand %p4020_p0, %p340_p1  ;;  %s4794_s18 = scalar_lea.hbm %s7121_s9, 8192 }
   0x8   : > { %s7130_s14 = scalar_select %p4925_p3, 1, 0 }
   0x9   : > { %s7129_s12 = scalar_select %p4919_p2, 1, 0 }
   0xa   : > { %p4262_p4 = pneg %p4919_p2  ;;  %p4795_p6 = scmp.ne.s32.totalorder %s7121_s9, %s4794_s18 }
   0xb   : > { %p4801_p10 = scmp.lt.u32.totalorder %s4794_s18, %s7121_s9 }
   0xc   : > { %p4933_p5 = pnand %p4925_p3, %p4262_p4 }
   0xe   : > { %p4796_p7 = pneg %p4933_p5 }
  0x10   : > { %p4797_p8 = pnand %p4796_p7, %p4795_p6 }
  0x12   : > { %p4798_p9 = pneg %p4797_p8 }
  0x14   : > { %p4803_p11 = pnand %p4801_p10, %p4798_p9 }
  0x16   : > { %4806 = shalt.err (!%p4803_p11)
}
  0x17   : > { %s4807_s23 = scalar_lea.vmem %s374_s30, 8192  ;;  %p4815_p1 = scmp.lt.s32.totalorder %s374_s30, %s374_s30 }
  0x18   : > { %p4808_p12 = scmp.ne.s32.totalorder %s374_s30, %s4807_s23  ;;  %p4816_p4 = scmp.lt.s32.totalorder %s4807_s23, %s4807_s23 }
  0x1a   : > { %p4810_p13 = pnand %p4808_p12, %p4796_p7  ;;  %p4817_p3 = por %p4816_p4, %p4815_p1 }
  0x1c   : > { %p4811_p0 = pneg %p4810_p13 }
  0x1e   : > { %p4818_p2 = pnand %p4817_p3, %p4811_p0 }
  0x20   : > { %4821 = shalt.err (!%p4818_p2)
}
  0x21   : > { %s4835_s24 = smov 256   ;;  %s4836_s25 = smov 16  }
  0x22   : > { %4265 = dma.hbm_to_vmem [thread:$0]  (!%p4933_p5), %s7121_s9, 8192, %s374_s30, [#allocation4], %s4835_s24, %s4835_s24, %s4836_s25  }
  0x23   : > { %p7132_p6 = scmp.ne.s32.totalorder %s7129_s12, 0 }
  0x24   : > { %p7133_p8 = scmp.ne.s32.totalorder (!%p7132_p6), %s7130_s14, 0 }
  0x25   : > { %416 = sbr.rel (%p7132_p6) target bundleno = 1217 (0x4c1), region = 72 }
  0x2c   : > { %4827 = dma.done.wait (%p7133_p8), [#allocation4], 8192  }
  0x2d   : > { %4829 = vsyncadd (%p7133_p8), [#allocation4], 4294959104  ;;  %s4025_s16 = sshll.u32 %s4018_s28, 5  ;;  %v4837_v1 = vmov 0   ;;  %v1544_v12 = vld [vmem:[%s7117_s5 + $0x8] sm:$0xff]  ;;  %v1546_v13 = vld [vmem:[%s7117_s5 + $0x18] sm:$0xff] }
  0x2e   : > { %4281 = vset.pattern.permute.xlu1 %v4837_v1  ;;  %4280 = vset.pattern.permute.xlu0 %v4837_v1  ;;  %p466_p2 = scmp.lt.s32.totalorder %s4025_s16, 63  ;;  %v1543_v14 = vld [vmem:[%s7117_s5] sm:$0xff]  ;;  %v4034_v17 = vpack.c.bf16 %v1546_v13, %v1544_v12  ;;  %v1545_v18 = vld [vmem:[%s7117_s5 + $0x10] sm:$0xff]  ;;  %v1548_v20 = vld [vmem:[%s7117_s5 + $0x28] sm:$0xff]  ;;  %vm3905_vm0 = vcmask 7168  }
  0x2f   : > { %v4036_v19 = vpack.c.bf16 %v1545_v18, %v1543_v14  ;;  %v1550_v21 = vld [vmem:[%s7117_s5 + $0x38] sm:$0xff]  ;;  %v1547_v22 = vld [vmem:[%s7117_s5 + $0x20] sm:$0xff]  ;;  %v1549_v24 = vld [vmem:[%s7117_s5 + $0x30] sm:$0xff] }
  0x30   : > { %s7135_s16 = smov (!%p466_p2, %s4025_s16), 63  ;;  %4035 = vmatprep.subr.bf16.mxu0 %v4034_v17  ;;  %v4038_v23 = vpack.c.bf16 %v1550_v21, %v1548_v20  ;;  %4226 = vmatprep.subr.bf16.mxu1 %v4034_v17  ;;  %v4040_v25 = vpack.c.bf16 %v1549_v24, %v1547_v22  ;;  %v1552_v26 = vld [vmem:[%s7117_s5 + $0x48] sm:$0xff]  ;;  %v1554_v27 = vld [vmem:[%s7117_s5 + $0x58] sm:$0xff]  ;;  %v1551_v28 = vld [vmem:[%s7117_s5 + $0x40] sm:$0xff] }
  0x31   : > { %s4961_s15 = sshll.u32 %s7135_s16, 3  ;;  %4037 = vmatpush1.bf16.msra.mxu0 %v4036_v19  ;;  %4242 = vmatpush1.bf16.msra.mxu1 %v4036_v19  ;;  %v1553_v29 = vld [vmem:[%s7117_s5 + $0x50] sm:$0xff]  ;;  %v4042_v32 = vpack.c.bf16 %v1554_v27, %v1552_v26  ;;  %v1556_v33 = vld [vmem:[%s7117_s5 + $0x68] sm:$0xff]  ;;  %v1558_v34 = vld [vmem:[%s7117_s5 + $0x78] sm:$0xff] }
  0x32   : > { %s4967_s17 = scalar_lea.vmem %s7112_s0, %s4961_s15  ;;  %s4973_s28 = scalar_lea.vmem %s7113_s1, %s4961_s15  ;;  %4039 = vmatprep.subr.bf16.mxu0 %v4038_v23  ;;  %4227 = vmatprep.subr.bf16.mxu1 %v4038_v23  ;;  %v4044_v35 = vpack.c.bf16 %v1553_v29, %v1551_v28  ;;  %v1555_v36 = vld [vmem:[%s7117_s5 + $0x60] sm:$0xff]  ;;  %v1557_v37 = vld [vmem:[%s7117_s5 + $0x70] sm:$0xff]  ;;  %v4046_v40 = vpack.c.bf16 %v1558_v34, %v1556_v33  ;;  %v1560_v41 = vld [vmem:[%s7117_s5 + $0x88] sm:$0xff] }
  0x33   : > { %v484_v2 = vld [vmem:[%s4967_s17 + $0x8] sm:$0xff]  ;;  %v483_v3 = vld [vmem:[%s4967_s17] sm:$0xff]  ;;  %v753_v6 = vld [vmem:[%s4973_s28 + $0x10] sm:$0xff]  ;;  %v4048_v43 = vpack.c.bf16 %v1557_v37, %v1555_v36  ;;  %s7005_s21 = scalar_lea.vmem %s7125_s13, %s4961_s15 }
  0x34   : > { %523 = vperm.xlu1 %4281, %v484_v2   ;;  %518 = vperm.xlu0 %4280, %v483_v3   ;;  %v752_v4 = vld [vmem:[%s4973_s28 + $0x8] sm:$0xff]  ;;  %v751_v5 = vld [vmem:[%s4973_s28] sm:$0xff]  ;;  %v485_v7 = vld [vmem:[%s4967_s17 + $0x10] sm:$0xff] }
  0x35   : > { %v754_v8 = vld [vmem:[%s4973_s28 + $0x18] sm:$0xff]  ;;  %v755_v10 = vld [vmem:[%s4973_s28 + $0x20] sm:$0xff]  ;;  %v756_v15 = vld [vmem:[%s4973_s28 + $0x28] sm:$0xff]  ;;  %4041 = vmatpush1.bf16.msra.mxu0 %v4040_v25  ;;  %4243 = vmatpush1.bf16.msra.mxu1 %v4040_v25 }
  0x36   : > { %v486_v9 = vld [vmem:[%s4967_s17 + $0x18] sm:$0xff]  ;;  %v487_v11 = vld [vmem:[%s4967_s17 + $0x20] sm:$0xff]  ;;  %v488_v16 = vld [vmem:[%s4967_s17 + $0x28] sm:$0xff]  ;;  %4043 = vmatprep.subr.bf16.mxu0 %v4042_v32  ;;  %4228 = vmatprep.subr.bf16.mxu1 %v4042_v32 }
  0x37   : > { %v757_v30 = vld [vmem:[%s4973_s28 + $0x30] sm:$0xff]  ;;  %v758_v38 = vld [vmem:[%s4973_s28 + $0x38] sm:$0xff]  ;;  %v1559_v44 = vld [vmem:[%s7117_s5 + $0x80] sm:$0xff] }
  0x38   : > { %791 = vperm.xlu1 %4281, %v752_v4   ;;  %786 = vperm.xlu0 %4280, %v751_v5   ;;  %v489_v31 = vld [vmem:[%s4967_s17 + $0x30] sm:$0xff]  ;;  %v490_v39 = vld [vmem:[%s4967_s17 + $0x38] sm:$0xff]  ;;  %v759_v46 = vld [vmem:[%s4973_s28 + $0x40] sm:$0xff] }
  0x39   : > { %v1562_v42 = vld [vmem:[%s7117_s5 + $0x98] sm:$0xff]  ;;  %4045 = vmatpush1.bf16.msra.mxu0 %v4044_v35  ;;  %4244 = vmatpush1.bf16.msra.mxu1 %v4044_v35  ;;  %v1561_v45 = vld [vmem:[%s7117_s5 + $0x90] sm:$0xff]  ;;  %v491_v47 = vld [vmem:[%s4967_s17 + $0x40] sm:$0xff] }
  0x3a   : > { %4047 = vmatprep.subr.bf16.mxu0 %v4046_v40  ;;  %v4050_v48 = vpack.c.bf16 %v1562_v42, %v1560_v41  ;;  %4229 = vmatprep.subr.bf16.mxu1 %v4046_v40  ;;  %v1564_v49 = vld [vmem:[%s7117_s5 + $0xa8] sm:$0xff]  ;;  %v1566_v50 = vld [vmem:[%s7117_s5 + $0xb8] sm:$0xff]  ;;  %v4052_v51 = vpack.c.bf16 %v1561_v45, %v1559_v44  ;;  %v1563_v52 = vld [vmem:[%s7117_s5 + $0xa0] sm:$0xff] }
  0x3b   : > { %v1565_v53 = vld [vmem:[%s7117_s5 + $0xb0] sm:$0xff]  ;;  %v760_v54 = vld [vmem:[%s4973_s28 + $0x48] sm:$0xff]  ;;  %v4054_v56 = vpack.c.bf16 %v1566_v50, %v1564_v49  ;;  %v1570_v58 = vld [vmem:[%s7117_s5 + $0xd8] sm:$0xff] }
  0x3c   : > { %796 = vperm.xlu1 %4281, %v753_v6   ;;  %528 = vperm.xlu0 %4280, %v485_v7   ;;  %v492_v55 = vld [vmem:[%s4967_s17 + $0x48] sm:$0xff]  ;;  %v4056_v59 = vpack.c.bf16 %v1565_v53, %v1563_v52  ;;  %v1567_v60 = vld [vmem:[%s7117_s5 + $0xc0] sm:$0xff]  ;;  %v1569_v61 = vld [vmem:[%s7117_s5 + $0xd0] sm:$0xff] }
  0x3d   : > { %4049 = vmatpush1.bf16.msra.mxu0 %v4048_v43  ;;  %4245 = vmatpush1.bf16.msra.mxu1 %v4048_v43  ;;  %v1568_v57 = vld [vmem:[%s7117_s5 + $0xc8] sm:$0xff]  ;;  %v761_v62 = vld [vmem:[%s4973_s28 + $0x50] sm:$0xff]  ;;  %v1574_v2 = vld [vmem:[%s7117_s5 + $0xf8] sm:$0xff]  ;;  %v4060_v3 = vpack.c.bf16 %v1569_v61, %v1567_v60 }
  0x3e   : > { %4051 = vmatprep.subr.bf16.mxu0 %v4050_v48  ;;  %4230 = vmatprep.subr.bf16.mxu1 %v4050_v48  ;;  %v493_v63 = vld [vmem:[%s4967_s17 + $0x50] sm:$0xff]  ;;  %v4058_v0 = vpack.c.bf16 %v1570_v58, %v1568_v57  ;;  %v1572_v1 = vld [vmem:[%s7117_s5 + $0xe8] sm:$0xff]  ;;  %v1571_v4 = vld [vmem:[%s7117_s5 + $0xe0] sm:$0xff] }
  0x3f   : > { %v1573_v5 = vld [vmem:[%s7117_s5 + $0xf0] sm:$0xff]  ;;  %v762_v6 = vld [vmem:[%s4973_s28 + $0x58] sm:$0xff]  ;;  %v1575_v12 = vld [vmem:[%s7117_s5 + $0x100] sm:$0xff] }
  0x40   : > { %801 = vperm.xlu1 %4281, %v754_v8   ;;  %533 = vperm.xlu0 %4280, %v486_v9   ;;  %v494_v7 = vld [vmem:[%s4967_s17 + $0x58] sm:$0xff]  ;;  %v4062_v8 = vpack.c.bf16 %v1574_v2, %v1572_v1  ;;  %v1576_v9 = vld [vmem:[%s7117_s5 + $0x108] sm:$0xff]  ;;  %v1577_v13 = vld [vmem:[%s7117_s5 + $0x110] sm:$0xff] }
  0x41   : > { %4053 = vmatpush1.bf16.msra.mxu0 %v4052_v51  ;;  %4246 = vmatpush1.bf16.msra.mxu1 %v4052_v51  ;;  %v763_v14 = vld [vmem:[%s4973_s28 + $0x60] sm:$0xff]  ;;  %v1580_v17 = vld [vmem:[%s7117_s5 + $0x128] sm:$0xff]  ;;  %v1582_v18 = vld [vmem:[%s7117_s5 + $0x138] sm:$0xff]  ;;  %v4068_v19 = vpack.c.bf16 %v1577_v13, %v1575_v12 }
  0x42   : > { %4055 = vmatprep.subr.bf16.mxu0 %v4054_v56  ;;  %4231 = vmatprep.subr.bf16.mxu1 %v4054_v56  ;;  %v1579_v20 = vld [vmem:[%s7117_s5 + $0x120] sm:$0xff]  ;;  %v1581_v21 = vld [vmem:[%s7117_s5 + $0x130] sm:$0xff]  ;;  %v764_v22 = vld [vmem:[%s4973_s28 + $0x68] sm:$0xff]  ;;  %v4070_v24 = vpack.c.bf16 %v1582_v18, %v1580_v17 }
  0x43   : > { %v496_v23 = vld [vmem:[%s4967_s17 + $0x68] sm:$0xff]  ;;  %v1586_v26 = vld [vmem:[%s7117_s5 + $0x158] sm:$0xff]  ;;  %v4072_v27 = vpack.c.bf16 %v1581_v21, %v1579_v20  ;;  %v1583_v28 = vld [vmem:[%s7117_s5 + $0x140] sm:$0xff] }
  0x44   : > { %806 = vperm.xlu1 %4281, %v755_v10   ;;  %538 = vperm.xlu0 %4280, %v487_v11   ;;  %v1578_v10 = vld [vmem:[%s7117_s5 + $0x118] sm:$0xff]  ;;  %v4064_v11 = vpack.c.bf16 %v1573_v5, %v1571_v4  ;;  %v1584_v25 = vld [vmem:[%s7117_s5 + $0x148] sm:$0xff]  ;;  %v1585_v29 = vld [vmem:[%s7117_s5 + $0x150] sm:$0xff] }
  0x45   : > { %4057 = vmatpush1.bf16.msra.mxu0 %v4056_v59  ;;  %4247 = vmatpush1.bf16.msra.mxu1 %v4056_v59  ;;  %v4074_v32 = vpack.c.bf16 %v1586_v26, %v1584_v25  ;;  %v1588_v33 = vld [vmem:[%s7117_s5 + $0x168] sm:$0xff]  ;;  %v1590_v34 = vld [vmem:[%s7117_s5 + $0x178] sm:$0xff]  ;;  %v4076_v35 = vpack.c.bf16 %v1585_v29, %v1583_v28  ;;  %v1587_v36 = vld [vmem:[%s7117_s5 + $0x160] sm:$0xff] }
  0x46   : > { %4059 = vmatprep.subr.bf16.mxu0 %v4058_v0  ;;  %4232 = vmatprep.subr.bf16.mxu1 %v4058_v0  ;;  %v1589_v37 = vld [vmem:[%s7117_s5 + $0x170] sm:$0xff]  ;;  %v4078_v40 = vpack.c.bf16 %v1590_v34, %v1588_v33  ;;  %v1592_v41 = vld [vmem:[%s7117_s5 + $0x188] sm:$0xff]  ;;  %v1594_v42 = vld [vmem:[%s7117_s5 + $0x198] sm:$0xff] }
  0x47   : > { %v4080_v43 = vpack.c.bf16 %v1589_v37, %v1587_v36  ;;  %v1591_v44 = vld [vmem:[%s7117_s5 + $0x180] sm:$0xff]  ;;  %v1593_v45 = vld [vmem:[%s7117_s5 + $0x190] sm:$0xff]  ;;  %v4082_v48 = vpack.c.bf16 %v1594_v42, %v1592_v41  ;;  %v1596_v49 = vld [vmem:[%s7117_s5 + $0x1a8] sm:$0xff] }
  0x48   : > { %811 = vperm.xlu1 %4281, %v756_v15   ;;  %543 = vperm.xlu0 %4280, %v488_v16   ;;  %v495_v15 = vld [vmem:[%s4967_s17 + $0x60] sm:$0xff]  ;;  %v4066_v16 = vpack.c.bf16 %v1578_v10, %v1576_v9  ;;  %v1598_v50 = vld [vmem:[%s7117_s5 + $0x1b8] sm:$0xff]  ;;  %v4084_v51 = vpack.c.bf16 %v1593_v45, %v1591_v44  ;;  %v1597_v53 = vld [vmem:[%s7117_s5 + $0x1b0] sm:$0xff] }
  0x49   : > { %4061 = vmatpush1.bf16.msra.mxu0 %v4060_v3  ;;  %4248 = vmatpush1.bf16.msra.mxu1 %v4060_v3  ;;  %v1595_v52 = vld [vmem:[%s7117_s5 + $0x1a0] sm:$0xff]  ;;  %v4086_v56 = vpack.c.bf16 %v1598_v50, %v1596_v49  ;;  %v1600_v57 = vld [vmem:[%s7117_s5 + $0x1c8] sm:$0xff]  ;;  %v1602_v58 = vld [vmem:[%s7117_s5 + $0x1d8] sm:$0xff] }
  0x4a   : > { %4063 = vmatprep.subr.bf16.mxu0 %v4062_v8  ;;  %4233 = vmatprep.subr.bf16.mxu1 %v4062_v8  ;;  %v4088_v59 = vpack.c.bf16 %v1597_v53, %v1595_v52  ;;  %v1599_v60 = vld [vmem:[%s7117_s5 + $0x1c0] sm:$0xff]  ;;  %v1601_v61 = vld [vmem:[%s7117_s5 + $0x1d0] sm:$0xff]  ;;  %v4090_v0 = vpack.c.bf16 %v1602_v58, %v1600_v57  ;;  %v1604_v1 = vld [vmem:[%s7117_s5 + $0x1e8] sm:$0xff] }
  0x4b   : > { %v1606_v2 = vld [vmem:[%s7117_s5 + $0x1f8] sm:$0xff]  ;;  %v4092_v3 = vpack.c.bf16 %v1601_v61, %v1599_v60  ;;  %v1603_v4 = vld [vmem:[%s7117_s5 + $0x1e0] sm:$0xff]  ;;  %v1605_v5 = vld [vmem:[%s7117_s5 + $0x1f0] sm:$0xff] }
  0x4c   : > { %816 = vperm.xlu1 %4281, %v757_v30   ;;  %548 = vperm.xlu0 %4280, %v489_v31   ;;  %v765_v30 = vld [vmem:[%s4973_s28 + $0x70] sm:$0xff]  ;;  %v4094_v8 = vpack.c.bf16 %v1606_v2, %v1604_v1  ;;  %v4096_v9 = vpack.c.bf16 %v1605_v5, %v1603_v4  ;;  %v771_v10 = vld [vmem:[%s4973_s28 + $0xa0] sm:$0xff]  ;;  %v772_v12 = vld [vmem:[%s4973_s28 + $0xa8] sm:$0xff] }
  0x4d   : > { %4065 = vmatpush1.bf16.msra.mxu0 %v4064_v11  ;;  %4249 = vmatpush1.bf16.msra.mxu1 %v4064_v11  ;;  %v497_v31 = vld [vmem:[%s4967_s17 + $0x70] sm:$0xff]  ;;  %v503_v11 = vld [vmem:[%s4967_s17 + $0xa0] sm:$0xff]  ;;  %v504_v13 = vld [vmem:[%s4967_s17 + $0xa8] sm:$0xff] }
  0x4e   : > { %4067 = vmatprep.subr.bf16.mxu0 %v4066_v16  ;;  %4234 = vmatprep.subr.bf16.mxu1 %v4066_v16  ;;  %v774_v16 = vld [vmem:[%s4973_s28 + $0xb8] sm:$0xff]  ;;  %v775_v18 = vld [vmem:[%s4973_s28 + $0xc0] sm:$0xff]  ;;  %v776_v20 = vld [vmem:[%s4973_s28 + $0xc8] sm:$0xff] }
  0x4f   : > { %v506_v17 = vld [vmem:[%s4967_s17 + $0xb8] sm:$0xff]  ;;  %v508_v21 = vld [vmem:[%s4967_s17 + $0xc8] sm:$0xff]  ;;  %v779_v26 = vld [vmem:[%s4973_s28 + $0xe0] sm:$0xff] }
  0x50   : > { %821 = vperm.xlu1 %4281, %v758_v38   ;;  %553 = vperm.xlu0 %4280, %v490_v39   ;;  %v766_v38 = vld [vmem:[%s4973_s28 + $0x78] sm:$0xff]  ;;  %v780_v28 = vld [vmem:[%s4973_s28 + $0xe8] sm:$0xff] }
  0x51   : > { %4069 = vmatpush1.bf16.msra.mxu0 %v4068_v19  ;;  %4250 = vmatpush1.bf16.msra.mxu1 %v4068_v19  ;;  %v498_v39 = vld [vmem:[%s4967_s17 + $0x78] sm:$0xff]  ;;  %v507_v19 = vld [vmem:[%s4967_s17 + $0xc0] sm:$0xff]  ;;  %v512_v29 = vld [vmem:[%s4967_s17 + $0xe8] sm:$0xff] }
  0x52   : > { %4071 = vmatprep.subr.bf16.mxu0 %v4070_v24  ;;  %4235 = vmatprep.subr.bf16.mxu1 %v4070_v24  ;;  %v778_v24 = vld [vmem:[%s4973_s28 + $0xd8] sm:$0xff] }
  0x53   : > { %v510_v25 = vld [vmem:[%s4967_s17 + $0xd8] sm:$0xff] }
  0x54   : > { %826 = vperm.xlu1 %4281, %v759_v46   ;;  %558 = vperm.xlu0 %4280, %v491_v47   ;;  %v767_v46 = vld [vmem:[%s4973_s28 + $0x80] sm:$0xff]  ;;  %v782_v34 = vld [vmem:[%s4973_s28 + $0xf8] sm:$0xff] }
  0x55   : > { %4073 = vmatpush1.bf16.msra.mxu0 %v4072_v27  ;;  %4251 = vmatpush1.bf16.msra.mxu1 %v4072_v27  ;;  %v499_v47 = vld [vmem:[%s4967_s17 + $0x80] sm:$0xff] }
  0x56   : > { %4075 = vmatprep.subr.bf16.mxu0 %v4074_v32  ;;  %4236 = vmatprep.subr.bf16.mxu1 %v4074_v32  ;;  %v511_v27 = vld [vmem:[%s4967_s17 + $0xe0] sm:$0xff]  ;;  %v513_v32 = vld [vmem:[%s4967_s17 + $0xf0] sm:$0xff] }
  0x58   : > { %831 = vperm.xlu1 %4281, %v760_v54   ;;  %563 = vperm.xlu0 %4280, %v492_v55   ;;  %v768_v54 = vld [vmem:[%s4973_s28 + $0x88] sm:$0xff] }
  0x59   : > { %4077 = vmatpush1.bf16.msra.mxu0 %v4076_v35  ;;  %4252 = vmatpush1.bf16.msra.mxu1 %v4076_v35  ;;  %v500_v55 = vld [vmem:[%s4967_s17 + $0x88] sm:$0xff]  ;;  %v514_v35 = vld [vmem:[%s4967_s17 + $0xf8] sm:$0xff] }
  0x5a   : > { %4079 = vmatprep.subr.bf16.mxu0 %v4078_v40  ;;  %4237 = vmatprep.subr.bf16.mxu1 %v4078_v40 }
  0x5c   : > { %836 = vperm.xlu1 %4281, %v761_v62   ;;  %568 = vperm.xlu0 %4280, %v493_v63   ;;  %v769_v62 = vld [vmem:[%s4973_s28 + $0x90] sm:$0xff] }
  0x5d   : > { %4081 = vmatpush1.bf16.msra.mxu0 %v4080_v43  ;;  %4253 = vmatpush1.bf16.msra.mxu1 %v4080_v43  ;;  %v501_v63 = vld [vmem:[%s4967_s17 + $0x90] sm:$0xff] }
  0x5e   : > { %4083 = vmatprep.subr.bf16.mxu0 %v4082_v48  ;;  %4238 = vmatprep.subr.bf16.mxu1 %v4082_v48 }
  0x60   : > { %841 = vperm.xlu1 %4281, %v762_v6   ;;  %573 = vperm.xlu0 %4280, %v494_v7   ;;  %v770_v6 = vld [vmem:[%s4973_s28 + $0x98] sm:$0xff] }
  0x61   : > { %4085 = vmatpush1.bf16.msra.mxu0 %v4084_v51  ;;  %4254 = vmatpush1.bf16.msra.mxu1 %v4084_v51  ;;  %v502_v7 = vld [vmem:[%s4967_s17 + $0x98] sm:$0xff] }
  0x62   : > { %4087 = vmatprep.subr.bf16.mxu0 %v4086_v56  ;;  %4239 = vmatprep.subr.bf16.mxu1 %v4086_v56 }
  0x64   : > { %846 = vperm.xlu1 %4281, %v763_v14   ;;  %578 = vperm.xlu0 %4280, %v495_v15   ;;  %v773_v14 = vld [vmem:[%s4973_s28 + $0xb0] sm:$0xff] }
  0x65   : > { %4089 = vmatpush1.bf16.msra.mxu0 %v4088_v59  ;;  %4255 = vmatpush1.bf16.msra.mxu1 %v4088_v59  ;;  %v505_v15 = vld [vmem:[%s4967_s17 + $0xb0] sm:$0xff] }
  0x66   : > { %4091 = vmatprep.subr.bf16.mxu0 %v4090_v0  ;;  %4240 = vmatprep.subr.bf16.mxu1 %v4090_v0 }
  0x68   : > { %851 = vperm.xlu1 %4281, %v764_v22   ;;  %583 = vperm.xlu0 %4280, %v496_v23   ;;  %v777_v22 = vld [vmem:[%s4973_s28 + $0xd0] sm:$0xff] }
  0x69   : > { %4093 = vmatpush1.bf16.msra.mxu0 %v4092_v3  ;;  %4256 = vmatpush1.bf16.msra.mxu1 %v4092_v3  ;;  %v509_v23 = vld [vmem:[%s4967_s17 + $0xd0] sm:$0xff] }
  0x6a   : > { %4095 = vmatprep.subr.bf16.mxu0 %v4094_v8  ;;  %4241 = vmatprep.subr.bf16.mxu1 %v4094_v8 }
  0x6c   : > { %856 = vperm.xlu1 %4281, %v765_v30   ;;  %588 = vperm.xlu0 %4280, %v497_v31   ;;  %v677_v30 = vlaneseq  ;;  %v781_v31 = vld [vmem:[%s4973_s28 + $0xf0] sm:$0xff] }
  0x6d   : > { %4097 = vmatpush1.bf16.msra.mxu0 %v4096_v9  ;;  %4257 = vmatpush1.bf16.msra.mxu1 %v4096_v9 }
  0x6e   : > { %v678_v33 = vshrl.u32 %v677_v30, 7 }
  0x70   : > { %861 = vperm.xlu1 %4281, %v766_v38   ;;  %593 = vperm.xlu0 %4280, %v498_v39   ;;  %v5231_v36 = vsub.s32 0, %v678_v33  ;;  %v5233_v37 = vsub.s32 1, %v678_v33  ;;  %v515_v38 = vld [vmem:[%s7114_s2] sm:$0x3] }
  0x71   : > { %v783_v39 = vld [vmem:[%s7115_s3] sm:$0x3] }
  0x72   : > { %v5242_v40 = vrot.slane %v515_v38, %v5231_v36  ;;  %v5245_v41 = vrot.slane %v515_v38, %v5233_v37  ;;  %v5248_v44 = vrot.slane %v783_v39, %v5231_v36  ;;  %v5251_v45 = vrot.slane %v783_v39, %v5233_v37 }
  0x74   : > { %866 = vperm.xlu1 %4281, %v767_v46   ;;  %598 = vperm.xlu0 %4280, %v499_v47   ;;  %v1083_v46 = vld [vmem:[%s7116_s4] sm:$0x3] }
  0x75   : > { %v5261_v51 = vrot.slane %v1083_v46, %v5231_v36  ;;  %v5264_v52 = vrot.slane %v1083_v46, %v5233_v37 }
  0x78   : > { %871 = vperm.xlu1 %4281, %v768_v54   ;;  %603 = vperm.xlu0 %4280, %v500_v55  }
  0x7c   : > { %876 = vperm.xlu1 %4281, %v769_v62   ;;  %608 = vperm.xlu0 %4280, %v501_v63  }
  0x80   : > { %881 = vperm.xlu1 %4281, %v770_v6   ;;  %613 = vperm.xlu0 %4280, %v502_v7  }
  0x84   : > { %886 = vperm.xlu1 %4281, %v771_v10   ;;  %618 = vperm.xlu0 %4280, %v503_v11  }
  0x88   : > { %891 = vperm.xlu1 %4281, %v772_v12   ;;  %623 = vperm.xlu0 %4280, %v504_v13  }
  0x8c   : > { %896 = vperm.xlu1 %4281, %v773_v14   ;;  %628 = vperm.xlu0 %4280, %v505_v15  }
  0x90   : > { %901 = vperm.xlu1 %4281, %v774_v16   ;;  %633 = vperm.xlu0 %4280, %v506_v17  }
  0x94   : > { %906 = vperm.xlu1 %4281, %v775_v18   ;;  %638 = vperm.xlu0 %4280, %v507_v19  }
  0x98   : > { %911 = vperm.xlu1 %4281, %v776_v20   ;;  %643 = vperm.xlu0 %4280, %v508_v21  }
  0x9c   : > { %916 = vperm.xlu1 %4281, %v777_v22   ;;  %648 = vperm.xlu0 %4280, %v509_v23  }
  0xa0   : > { %921 = vperm.xlu1 %4281, %v778_v24   ;;  %653 = vperm.xlu0 %4280, %v510_v25  }
  0xa4   : > { %926 = vperm.xlu1 %4281, %v779_v26   ;;  %658 = vperm.xlu0 %4280, %v511_v27  }
  0xa8   : > { %931 = vperm.xlu1 %4281, %v780_v28   ;;  %663 = vperm.xlu0 %4280, %v512_v29  }
  0xac   : > { %936 = vperm.xlu1 %4281, %v781_v31   ;;  %668 = vperm.xlu0 %4280, %v513_v32  }
  0xb0   : > { %941 = vperm.xlu1 %4281, %v782_v34   ;;  %673 = vperm.xlu0 %4280, %v514_v35  }
  0xb3   : > { %v524_v42 = vpop.permute.xlu1 %523  ;;  %v519_v43 = vpop.permute.xlu0 %518 }
  0xb4   : > { %v689_v47 = vmul.f32 %v5242_v40, %v524_v42  ;;  %v690_v48 = vmul.f32 %v5245_v41, %v524_v42  ;;  %v687_v49 = vmul.f32 %v5242_v40, %v519_v43  ;;  %v688_v50 = vmul.f32 %v5245_v41, %v519_v43 }
  0xb7   : > { %v792_v53 = vpop.permute.xlu1 %791  ;;  %v787_v54 = vpop.permute.xlu0 %786 }
  0xb8   : > { %v957_v55 = vmul.f32 %v5248_v44, %v792_v53  ;;  %v958_v56 = vmul.f32 %v5251_v45, %v792_v53  ;;  %v955_v57 = vmul.f32 %v5248_v44, %v787_v54  ;;  %v956_v58 = vmul.f32 %v5251_v45, %v787_v54 }
  0xba   : > { %v1021_v59 = vadd.f32 %v957_v55, %v689_v47  ;;  %v1022_v60 = vadd.f32 %v958_v56, %v690_v48  ;;  %v1019_v61 = vadd.f32 %v955_v57, %v687_v49  ;;  %v1020_v62 = vadd.f32 %v956_v58, %v688_v50 }
  0xbb   : > { %v797_v63 = vpop.permute.xlu1 %796  ;;  %v529_v0 = vpop.permute.xlu0 %528 }
  0xbc   : > { %v5271_v1 = vadd.f32 %v5261_v51, %v1021_v59  ;;  %v5274_v2 = vadd.f32 %v5264_v52, %v1022_v60  ;;  %v5277_v3 = vadd.f32 %v5261_v51, %v1019_v61  ;;  %v959_v4 = vmul.f32 %v5248_v44, %v797_v63 }
  0xbd   : > { %v960_v5 = vmul.f32 %v5251_v45, %v797_v63  ;;  %v691_v6 = vmul.f32 %v5242_v40, %v529_v0  ;;  %v692_v7 = vmul.f32 %v5245_v41, %v529_v0  ;;  %v5284_v8 = vadd.f32 %v5264_v52, %v1020_v62 }
  0xbe   : > { %v1226_v9 = vmin.f32 %v5274_v2, 0.0  ;;  %v1223_v10 = vmin.f32 %v5277_v3, 0.0  ;;  %v1225_v11 = vmin.f32 %v5271_v1, 0.0 }
  0xbf   : > { %v1023_v12 = vadd.f32 %v959_v4, %v691_v6  ;;  %v1024_v13 = vadd.f32 %v960_v5, %v692_v7  ;;  %v802_v14 = vpop.permute.xlu1 %801  ;;  %v534_v15 = vpop.permute.xlu0 %533  ;;  %v1224_v16 = vmin.f32 %v5284_v8, 0.0  ;;  %v1160_v4 = vmax.f32 %v5284_v8, 0.0 }
  0xc0   : > { %v1293_v17 = vmul.f32 1.442695, %v1226_v9  ;;  %v1287_v18 = vmul.f32 1.442695, %v1223_v10  ;;  %v961_v19 = vmul.f32 %v5248_v44, %v802_v14  ;;  %v962_v22 = vmul.f32 %v5251_v45, %v802_v14 }
  0xc1   : > { %v5292_v20 = vadd.f32 %v5261_v51, %v1023_v12  ;;  %v5295_v21 = vadd.f32 %v5264_v52, %v1024_v13  ;;  %v693_v23 = vmul.f32 %v5242_v40, %v534_v15  ;;  %v694_v24 = vmul.f32 %v5245_v41, %v534_v15 }
  0xc2   : > { %v1289_v25 = vmul.f32 1.442695, %v1224_v16  ;;  %4282 = vpow2.f32 %v1287_v18  ;;  %v1291_v26 = vmul.f32 1.442695, %v1225_v11  ;;  %v1159_v5 = vmax.f32 %v5277_v3, 0.0 }
  0xc3   : > { %v1227_v27 = vmin.f32 %v5292_v20, 0.0  ;;  %v1228_v28 = vmin.f32 %v5295_v21, 0.0  ;;  %v1025_v29 = vadd.f32 %v961_v19, %v693_v23  ;;  %v807_v30 = vpop.permute.xlu1 %806  ;;  %v539_v31 = vpop.permute.xlu0 %538  ;;  %v1026_v32 = vadd.f32 %v962_v22, %v694_v24 }
  0xc4   : > { %v963_v33 = vmul.f32 %v5248_v44, %v807_v30  ;;  %v964_v34 = vmul.f32 %v5251_v45, %v807_v30  ;;  %v695_v35 = vmul.f32 %v5242_v40, %v539_v31  ;;  %v696_v38 = vmul.f32 %v5245_v41, %v539_v31 }
  0xc5   : > { %4284 = vpow2.f32 %v1293_v17  ;;  %v1297_v39 = vmul.f32 1.442695, %v1228_v28  ;;  %v5307_v42 = vadd.f32 %v5264_v52, %v1026_v32  ;;  %v1295_v49 = vmul.f32 1.442695, %v1227_v27 }
  0xc6   : > { %v1027_v43 = vadd.f32 %v963_v33, %v695_v35  ;;  %4286 = vpow2.f32 %v1289_v25  ;;  %v1028_v46 = vadd.f32 %v964_v34, %v696_v38  ;;  %v5310_v50 = vadd.f32 %v5261_v51, %v1025_v29 }
  0xc7   : > { %v812_v47 = vpop.permute.xlu1 %811  ;;  %v544_v48 = vpop.permute.xlu0 %543  ;;  %v1230_v53 = vmin.f32 %v5307_v42, 0.0  ;;  %4288 = vpow2.f32 %v1291_v26  ;;  %v1162_v9 = vmax.f32 %v5274_v2, 0.0  ;;  %v1161_v10 = vmax.f32 %v5271_v1, 0.0 }
  0xc8   : > { %v5314_v54 = vadd.f32 %v5261_v51, %v1027_v43  ;;  %v5317_v55 = vadd.f32 %v5264_v52, %v1028_v46  ;;  %v965_v56 = vmul.f32 %v5248_v44, %v812_v47  ;;  %v966_v57 = vmul.f32 %v5251_v45, %v812_v47 }
  0xc9   : > { %v697_v58 = vmul.f32 %v5242_v40, %v544_v48  ;;  %v698_v59 = vmul.f32 %v5245_v41, %v544_v48  ;;  %4290 = vpow2.f32 %v1297_v39  ;;  %v1301_v60 = vmul.f32 1.442695, %v1230_v53 }
  0xca   : > { %v1229_v0 = vmin.f32 %v5310_v50, 0.0  ;;  %4292 = vpow2.f32 %v1295_v49  ;;  %v1231_v6 = vmin.f32 %v5314_v54, 0.0  ;;  %v1232_v7 = vmin.f32 %v5317_v55, 0.0 }
  0xcb   : > { %v817_v61 = vpop.permute.xlu1 %816  ;;  %v549_v62 = vpop.permute.xlu0 %548  ;;  %v1029_v11 = vadd.f32 %v965_v56, %v697_v58  ;;  %v1030_v12 = vadd.f32 %v966_v57, %v698_v59  ;;  %4294 = vpow2.f32 %v1301_v60  ;;  %v1164_v23 = vmax.f32 %v5295_v21, 0.0 }
  0xcc   : > { %v4283_v63 = vpop.eup %4282  ;;  %v967_v13 = vmul.f32 %v5248_v44, %v817_v61  ;;  %v968_v14 = vmul.f32 %v5251_v45, %v817_v61  ;;  %v699_v8 = vmul.f32 %v5242_v40, %v549_v62  ;;  %v700_v3 = vmul.f32 %v5245_v41, %v549_v62 }
  0xcd   : > { %v1415_v18 = vmul.f32 1.6732632, %v4283_v63  ;;  %v1299_v22 = vmul.f32 1.442695, %v1229_v0  ;;  %v5337_v24 = vmul.f32 1.442695, %v1231_v6  ;;  %v5345_v30 = vadd.f32 %v5261_v51, %v1029_v11 }
  0xce   : > { %v1163_v27 = vmax.f32 %v5292_v20, 0.0  ;;  %v5342_v29 = vmul.f32 1.442695, %v1232_v7  ;;  %v5348_v33 = vadd.f32 %v5264_v52, %v1030_v12  ;;  %v1031_v21 = vadd.f32 %v967_v13, %v699_v8 }
  0xcf   : > { %v4285_v15 = vpop.eup %4284  ;;  %v822_v16 = vpop.permute.xlu1 %821  ;;  %v1032_v34 = vadd.f32 %v968_v14, %v700_v3  ;;  %v1479_v35 = vadd.f32 %v1415_v18, %v1159_v5  ;;  %v1166_v48 = vmax.f32 %v5307_v42, 0.0  ;;  %v1233_v59 = vmin.f32 %v5345_v30, 0.0 }
  0xd0   : > { %v554_v17 = vpop.permute.xlu0 %553  ;;  %v4287_v19 = vpop.eup %4286  ;;  %v969_v2 = vmul.f32 %v5248_v44, %v822_v16  ;;  %v970_v25 = vmul.f32 %v5251_v45, %v822_v16  ;;  %v1418_v32 = vmul.f32 1.6732632, %v4285_v15  ;;  %v1234_v63 = vmin.f32 %v5348_v33, 0.0 }
  0xd1   : > { %v701_v1 = vmul.f32 %v5242_v40, %v554_v17  ;;  %v702_v26 = vmul.f32 %v5245_v41, %v554_v17  ;;  %v4289_v28 = vpop.eup %4288  ;;  %v1416_v31 = vmul.f32 1.6732632, %v4287_v19  ;;  %v5358_v0 = vadd.f32 %v5261_v51, %v1031_v21 }
  0xd2   : > { %v1417_v57 = vmul.f32 1.6732632, %v4289_v28  ;;  %v1482_v60 = vadd.f32 %v1418_v32, %v1162_v9  ;;  %v5361_v42 = vadd.f32 %v5264_v52, %v1032_v34  ;;  %4296 = vpow2.f32 %v1299_v22 }
  0xd3   : > { %v827_v38 = vpop.permute.xlu1 %826  ;;  %v4291_v43 = vpop.eup %4290  ;;  %v1033_v46 = vadd.f32 %v969_v2, %v701_v1  ;;  %v1480_v47 = vadd.f32 %v1416_v31, %v1160_v4  ;;  %v1034_v49 = vadd.f32 %v970_v25, %v702_v26  ;;  %v1309_v2 = vmul.f32 1.442695, %v1234_v63 }
  0xd4   : > { %v559_v39 = vpop.permute.xlu0 %558  ;;  %v971_v20 = vmul.f32 %v5248_v44, %v827_v38  ;;  %v972_v53 = vmul.f32 %v5251_v45, %v827_v38  ;;  %v4293_v58 = vpop.eup %4292  ;;  %v1420_v62 = vmul.f32 1.6732632, %v4291_v43  ;;  %v1481_v15 = vadd.f32 %v1417_v57, %v1161_v10 }
  0xd5   : > { %v703_v56 = vmul.f32 %v5242_v40, %v559_v39  ;;  %1683 = vmatprep.mubr.f32.mxu0 %v1480_v47  ;;  %v704_v61 = vmul.f32 %v5245_v41, %v559_v39  ;;  %v5364_v7 = vadd.f32 %v5261_v51, %v1033_v46  ;;  %v4295_v13 = vpop.eup %4294  ;;  %v5369_v14 = vadd.f32 %v5264_v52, %v1034_v49 }
  0xd6   : > { %1684 = vmatmul.mubr.f32.vlgmr.msra.gmra.mrb[0].mxu0 %v1479_v35  ;;  %v1419_v3 = vmul.f32 1.6732632, %v4293_v58  ;;  %v1484_v17 = vadd.f32 %v1420_v62, %v1164_v23  ;;  %v1422_v19 = vmul.f32 1.6732632, %v4295_v13  ;;  %v1235_v1 = vmin.f32 %v5358_v0, 0.0 }
  0xd7   : > { %v1035_v4 = vadd.f32 %v971_v20, %v703_v56  ;;  %v832_v5 = vpop.permute.xlu1 %831  ;;  %1689 = vmatprep.mubr.f32.mxu0 %v1482_v60  ;;  %v1036_v9 = vadd.f32 %v972_v53, %v704_v61  ;;  %v1236_v10 = vmin.f32 %v5361_v42, 0.0  ;;  %v1237_v21 = vmin.f32 %v5364_v7, 0.0 }
  0xd8   : > { %v564_v6 = vpop.permute.xlu0 %563  ;;  %v973_v11 = vmul.f32 %v5248_v44, %v832_v5  ;;  %v974_v12 = vmul.f32 %v5251_v45, %v832_v5  ;;  %v1238_v34 = vmin.f32 %v5369_v14, 0.0  ;;  %v1483_v35 = vadd.f32 %v1419_v3, %v1163_v27 }
  0xd9   : > { %v705_v8 = vmul.f32 %v5242_v40, %v564_v6  ;;  %v5373_v16 = vadd.f32 %v5261_v51, %v1035_v4  ;;  %v706_v18 = vmul.f32 %v5245_v41, %v564_v6  ;;  %v5379_v31 = vadd.f32 %v5264_v52, %v1036_v9 }
  0xda   : > { %1690 = vmatmul.mubr.f32.gmra.mrb[2].mxu0 %v1481_v15  ;;  %v1486_v43 = vadd.f32 %v1422_v19, %v1166_v48  ;;  %4298 = vpow2.f32 %v5342_v29  ;;  %v1307_v53 = vmul.f32 1.442695, %v1233_v59  ;;  %v1311_v56 = vmul.f32 1.442695, %v1235_v1 }
  0xdb   : > { %v1037_v25 = vadd.f32 %v973_v11, %v705_v8  ;;  %v837_v26 = vpop.permute.xlu1 %836  ;;  %1695 = vmatprep.mubr.f32.mxu0 %v1484_v17  ;;  %v1038_v32 = vadd.f32 %v974_v12, %v706_v18  ;;  %v1239_v39 = vmin.f32 %v5373_v16, 0.0  ;;  %4300 = vpow2.f32 %v5337_v24 }
  0xdc   : > { %v569_v28 = vpop.permute.xlu0 %568  ;;  %v975_v23 = vmul.f32 %v5248_v44, %v837_v26  ;;  %v976_v22 = vmul.f32 %v5251_v45, %v837_v26  ;;  %v1240_v57 = vmin.f32 %v5379_v31, 0.0  ;;  %v1313_v29 = vmul.f32 1.442695, %v1236_v10 }
  0xdd   : > { %v707_v38 = vmul.f32 %v5242_v40, %v569_v28  ;;  %v5389_v46 = vadd.f32 %v5261_v51, %v1037_v25  ;;  %v5392_v47 = vadd.f32 %v5264_v52, %v1038_v32  ;;  %v708_v20 = vmul.f32 %v5245_v41, %v569_v28 }
  0xde   : > { %1696 = vmatmul.mubr.f32.gmra.mrb[4].mxu0 %v1483_v35  ;;  %v1165_v58 = vmax.f32 %v5310_v50, 0.0  ;;  %v5400_v62 = vmul.f32 1.442695, %v1237_v21  ;;  %v5402_v63 = vmul.f32 1.442695, %v1238_v34  ;;  %v1168_v4 = vmax.f32 %v5317_v55, 0.0  ;;  %v4297_v55 = vpop.eup %4296 }
  0xdf   : > { %v842_v49 = vpop.permute.xlu1 %841  ;;  %1701 = vmatprep.mubr.f32.mxu0 %v1486_v43  ;;  %v1039_v48 = vadd.f32 %v975_v23, %v707_v38  ;;  %4302 = vpow2.f32 %v1309_v2  ;;  %v5405_v24 = vmul.f32 1.442695, %v1239_v39  ;;  %v1241_v59 = vmin.f32 %v5389_v46, 0.0 }
  0xe0   : > { %v574_v27 = vpop.permute.xlu0 %573  ;;  %v977_v60 = vmul.f32 %v5248_v44, %v842_v49  ;;  %v1242_v5 = vmin.f32 %v5392_v47, 0.0  ;;  %v1040_v6 = vadd.f32 %v976_v22, %v708_v20  ;;  %v5409_v11 = vmul.f32 1.442695, %v1240_v57 }
  0xe1   : > { %v709_v61 = vmul.f32 %v5242_v40, %v574_v27  ;;  %v5412_v12 = vadd.f32 %v5261_v51, %v1039_v48  ;;  %v978_v13 = vmul.f32 %v5251_v45, %v842_v49  ;;  %v710_v15 = vmul.f32 %v5245_v41, %v574_v27 }
  0xe2   : > { %v1167_v3 = vmax.f32 %v5314_v54, 0.0  ;;  %v1421_v19 = vmul.f32 1.6732632, %v4297_v55  ;;  %4304 = vpow2.f32 %v1307_v53  ;;  %v5421_v25 = vmul.f32 1.442695, %v1241_v59 }
  0xe3   : > { %v847_v9 = vpop.permute.xlu1 %846  ;;  %v1041_v8 = vadd.f32 %v977_v60, %v709_v61  ;;  %v5423_v26 = vmul.f32 1.442695, %v1242_v5  ;;  %v5426_v28 = vadd.f32 %v5264_v52, %v1040_v6  ;;  %v1170_v10 = vmax.f32 %v5348_v33, 0.0 }
  0xe4   : > { %v579_v50 = vpop.permute.xlu0 %578  ;;  %v979_v17 = vmul.f32 %v5248_v44, %v847_v9  ;;  %v980_v2 = vmul.f32 %v5251_v45, %v847_v9  ;;  %v4299_v23 = vpop.eup %4298  ;;  %v1243_v21 = vmin.f32 %v5412_v12, 0.0  ;;  %v1485_v34 = vadd.f32 %v1421_v19, %v1165_v58 }
  0xe5   : > { %v711_v18 = vmul.f32 %v5242_v40, %v579_v50  ;;  %v712_v1 = vmul.f32 %v5245_v41, %v579_v50  ;;  %v1042_v35 = vadd.f32 %v978_v13, %v710_v15  ;;  %v4301_v39 = vpop.eup %4300  ;;  %v1424_v22 = vmul.f32 1.6732632, %v4299_v23 }
  0xe6   : > { %v5432_v43 = vadd.f32 %v5261_v51, %v1041_v8  ;;  %1702 = vmatmul.mubr.f32.gmra.mrb[6].mxu0 %v1485_v34  ;;  %v1423_v27 = vmul.f32 1.6732632, %v4301_v39  ;;  %4306 = vpow2.f32 %v1313_v29  ;;  %v1244_v57 = vmin.f32 %v5426_v28, 0.0 }
  0xe7   : > { %v852_v54 = vpop.permute.xlu1 %851  ;;  %v1043_v20 = vadd.f32 %v979_v17, %v711_v18  ;;  %v1044_v33 = vadd.f32 %v980_v2, %v712_v1  ;;  %v1488_v48 = vadd.f32 %v1424_v22, %v1168_v4  ;;  %v1169_v58 = vmax.f32 %v5345_v30, 0.0 }
  0xe8   : > { %v584_v32 = vpop.permute.xlu0 %583  ;;  %v981_v38 = vmul.f32 %v5248_v44, %v852_v54  ;;  %v982_v49 = vmul.f32 %v5251_v45, %v852_v54  ;;  %v5440_v6 = vadd.f32 %v5264_v52, %v1042_v35  ;;  %v1487_v9 = vadd.f32 %v1423_v27, %v1167_v3 }
  0xe9   : > { %v713_v53 = vmul.f32 %v5242_v40, %v584_v32  ;;  %v714_v60 = vmul.f32 %v5245_v41, %v584_v32  ;;  %v4303_v5 = vpop.eup %4302  ;;  %4308 = vpow2.f32 %v1311_v56  ;;  %1707 = vmatprep.mubr.f32.mxu0 %v1488_v48  ;;  %v1245_v29 = vmin.f32 %v5432_v43, 0.0 }
  0xea   : > { %v1426_v13 = vmul.f32 1.6732632, %v4303_v5  ;;  %v5444_v15 = vadd.f32 %v5261_v51, %v1043_v20  ;;  %1708 = vmatmul.mubr.f32.gmra.mrb[8].mxu0 %v1487_v9  ;;  %v5447_v30 = vadd.f32 %v5264_v52, %v1044_v33  ;;  %4310 = vpow2.f32 %v5402_v63 }
  0xeb   : > { %v857_v61 = vpop.permute.xlu1 %856  ;;  %v1045_v50 = vadd.f32 %v981_v38, %v713_v53  ;;  %v1046_v4 = vadd.f32 %v982_v49, %v714_v60  ;;  %v5457_v54 = vmul.f32 1.442695, %v1243_v21  ;;  %v5459_v32 = vmul.f32 1.442695, %v1244_v57 }
  0xec   : > { %v589_v59 = vpop.permute.xlu0 %588  ;;  %v983_v55 = vmul.f32 %v5248_v44, %v857_v61  ;;  %v984_v8 = vmul.f32 %v5251_v45, %v857_v61  ;;  %v1490_v3 = vadd.f32 %v1426_v13, %v1170_v10  ;;  %v4305_v1 = vpop.eup %4304  ;;  %v1246_v23 = vmin.f32 %v5440_v6, 0.0 }
  0xed   : > { %v5453_v56 = vadd.f32 %v5261_v51, %v1045_v50  ;;  %v715_v17 = vmul.f32 %v5242_v40, %v589_v59  ;;  %v716_v18 = vmul.f32 %v5245_v41, %v589_v59  ;;  %4312 = vpow2.f32 %v5400_v62 }
  0xee   : > { %1713 = vmatprep.mubr.f32.mxu0 %v1490_v3  ;;  %v1247_v63 = vmin.f32 %v5444_v15, 0.0  ;;  %v1425_v10 = vmul.f32 1.6732632, %v4305_v1  ;;  %v1172_v34 = vmax.f32 %v5361_v42, 0.0  ;;  %v5466_v35 = vadd.f32 %v5264_v52, %v1046_v4 }
  0xef   : > { %v862_v19 = vpop.permute.xlu1 %861  ;;  %v1248_v38 = vmin.f32 %v5447_v30, 0.0  ;;  %v1047_v39 = vadd.f32 %v983_v55, %v715_v17  ;;  %v1048_v21 = vadd.f32 %v984_v8, %v716_v18  ;;  %4314 = vpow2.f32 %v5409_v11 }
  0xf0   : > { %v594_v2 = vpop.permute.xlu0 %593  ;;  %v5470_v22 = vmul.f32 1.442695, %v1245_v29  ;;  %v1489_v20 = vadd.f32 %v1425_v10, %v1169_v58  ;;  %v1249_v62 = vmin.f32 %v5453_v56, 0.0  ;;  %v985_v49 = vmul.f32 %v5248_v44, %v862_v19  ;;  %v4307_v53 = vpop.eup %4306 }
  0xf1   : > { %v986_v42 = vmul.f32 %v5251_v45, %v862_v19  ;;  %v717_v57 = vmul.f32 %v5242_v40, %v594_v2  ;;  %v718_v48 = vmul.f32 %v5245_v41, %v594_v2  ;;  %4316 = vpow2.f32 %v5405_v24 }
  0xf2   : > { %v5478_v60 = vmul.f32 1.442695, %v1246_v23  ;;  %1714 = vmatmul.mubr.f32.gmra.mrb[10].mxu0 %v1489_v20  ;;  %v1428_v11 = vmul.f32 1.6732632, %v4307_v53  ;;  %v1250_v58 = vmin.f32 %v5466_v35, 0.0  ;;  %v1171_v61 = vmax.f32 %v5358_v0, 0.0 }
  0xf3   : > { %v867_v27 = vpop.permute.xlu1 %866  ;;  %v4309_v59 = vpop.eup %4308  ;;  %v5482_v5 = vmul.f32 1.442695, %v1247_v63  ;;  %v5484_v9 = vmul.f32 1.442695, %v1248_v38  ;;  %v5487_v50 = vadd.f32 %v5261_v51, %v1047_v39  ;;  %v5490_v29 = vadd.f32 %v5264_v52, %v1048_v21 }
  0xf4   : > { %v599_v33 = vpop.permute.xlu0 %598  ;;  %v1492_v24 = vadd.f32 %v1428_v11, %v1172_v34  ;;  %v1427_v13 = vmul.f32 1.6732632, %v4309_v59  ;;  %v1174_v4 = vmax.f32 %v5369_v14, 0.0  ;;  %v1049_v55 = vadd.f32 %v985_v49, %v717_v57  ;;  %v4311_v17 = vpop.eup %4310 }
  0xf5   : > { %v5493_v0 = vmul.f32 1.442695, %v1249_v62  ;;  %v1173_v18 = vmax.f32 %v5364_v7, 0.0  ;;  %v1050_v19 = vadd.f32 %v986_v42, %v718_v48  ;;  %4318 = vpow2.f32 %v5423_v26 }
  0xf6   : > { %1719 = vmatprep.mubr.f32.mxu0 %v1492_v24  ;;  %v5497_v2 = vmul.f32 1.442695, %v1250_v58  ;;  %v1491_v1 = vadd.f32 %v1427_v13, %v1171_v61  ;;  %v1430_v23 = vmul.f32 1.6732632, %v4311_v17  ;;  %v1176_v63 = vmax.f32 %v5379_v31, 0.0 }
  0xf7   : > { %v872_v8 = vpop.permute.xlu1 %871  ;;  %v4313_v10 = vpop.eup %4312  ;;  %v1251_v14 = vmin.f32 %v5487_v50, 0.0  ;;  %v1252_v34 = vmin.f32 %v5490_v29, 0.0  ;;  %v1175_v38 = vmax.f32 %v5373_v16, 0.0  ;;  %4320 = vpow2.f32 %v5421_v25 }
  0xf8   : > { %v604_v3 = vpop.permute.xlu0 %603  ;;  %1720 = vmatmul.mubr.f32.gmra.mrb[12].mxu0 %v1491_v1  ;;  %v1494_v7 = vadd.f32 %v1430_v23, %v1174_v4  ;;  %v1429_v39 = vmul.f32 1.6732632, %v4313_v10  ;;  %v5505_v26 = vadd.f32 %v5261_v51, %v1049_v55  ;;  %v987_v21 = vmul.f32 %v5248_v44, %v867_v27 }
  0xf9   : > { %v4315_v31 = vpop.eup %4314  ;;  %v5509_v49 = vadd.f32 %v5264_v52, %v1050_v19  ;;  %v988_v53 = vmul.f32 %v5251_v45, %v867_v27  ;;  %v719_v16 = vmul.f32 %v5242_v40, %v599_v33  ;;  %v989_v25 = vmul.f32 %v5248_v44, %v872_v8 }
  0xfa   : > { %1725 = vmatprep.mubr.f32.mxu0 %v1494_v7  ;;  %v1493_v42 = vadd.f32 %v1429_v39, %v1173_v18  ;;  %v1432_v57 = vmul.f32 1.6732632, %v4315_v31  ;;  %v990_v48 = vmul.f32 %v5251_v45, %v872_v8  ;;  %4322 = vpow2.f32 %v5459_v32 }
  0xfb   : > { %v877_v20 = vpop.permute.xlu1 %876  ;;  %v4317_v11 = vpop.eup %4316  ;;  %v1178_v58 = vmax.f32 %v5392_v47, 0.0  ;;  %v720_v61 = vmul.f32 %v5245_v41, %v599_v33  ;;  %v721_v59 = vmul.f32 %v5242_v40, %v604_v3  ;;  %v722_v27 = vmul.f32 %v5245_v41, %v604_v3 }
  0xfc   : > { %v609_v62 = vpop.permute.xlu0 %608  ;;  %1726 = vmatmul.mubr.f32.gmra.mrb[14].mxu0 %v1493_v42  ;;  %v1496_v24 = vadd.f32 %v1432_v57, %v1176_v63  ;;  %v1253_v13 = vmin.f32 %v5505_v26, 0.0  ;;  %v1431_v4 = vmul.f32 1.6732632, %v4317_v11  ;;  %4324 = vpow2.f32 %v5457_v54 }
  0xfd   : > { %v1254_v32 = vmin.f32 %v5509_v49, 0.0  ;;  %v1051_v17 = vadd.f32 %v987_v21, %v719_v16  ;;  %v1053_v18 = vadd.f32 %v989_v25, %v721_v59  ;;  %v991_v47 = vmul.f32 %v5248_v44, %v877_v20 }
  0xfe   : > { %1731 = vmatprep.mubr.f32.mxu0 %v1496_v24  ;;  %v1495_v33 = vadd.f32 %v1431_v4, %v1175_v38  ;;  %v1054_v19 = vadd.f32 %v990_v48, %v722_v27  ;;  %4326 = vpow2.f32 %v5478_v60  ;;  %v723_v3 = vmul.f32 %v5242_v40, %v609_v62 }
  0xff   : > { %v882_v55 = vpop.permute.xlu1 %881  ;;  %v4319_v1 = vpop.eup %4318  ;;  %v5526_v23 = vmul.f32 1.442695, %v1251_v14  ;;  %v5528_v63 = vmul.f32 1.442695, %v1252_v34  ;;  %v992_v54 = vmul.f32 %v5251_v45, %v877_v20  ;;  %v724_v10 = vmul.f32 %v5245_v41, %v609_v62 }
 0x100   : > { %v614_v8 = vpop.permute.xlu0 %613  ;;  %1732 = vmatmul.mubr.f32.gmra.mrb[16].mxu0 %v1495_v33  ;;  %v1434_v7 = vmul.f32 1.6732632, %v4319_v1  ;;  %v5532_v39 = vadd.f32 %v988_v53, %v720_v61  ;;  %v1177_v38 = vmax.f32 %v5389_v46, 0.0  ;;  %4328 = vpow2.f32 %v5470_v22 }
 0x101   : > { %v4321_v31 = vpop.eup %4320  ;;  %v5536_v16 = vmul.f32 1.442695, %v1253_v13  ;;  %v5538_v14 = vmul.f32 1.442695, %v1254_v32  ;;  %v5541_v34 = vadd.f32 %v5261_v51, %v1051_v17  ;;  %v5544_v20 = vadd.f32 %v5261_v51, %v1053_v18 }
 0x102   : > { %v1498_v62 = vadd.f32 %v1434_v7, %v1178_v58  ;;  %v1433_v53 = vmul.f32 1.6732632, %v4321_v31  ;;  %v5547_v25 = vadd.f32 %v5264_v52, %v1054_v19  ;;  %v1055_v46 = vadd.f32 %v991_v47, %v723_v3 }
 0x103   : > { %v887_v60 = vpop.permute.xlu1 %886  ;;  %v1180_v22 = vmax.f32 %v5426_v28, 0.0  ;;  %v1056_v42 = vadd.f32 %v992_v54, %v724_v10  ;;  %v993_v57 = vmul.f32 %v5248_v44, %v882_v55  ;;  %4330 = vpow2.f32 %v5484_v9 }
 0x104   : > { %v619_v21 = vpop.permute.xlu0 %618  ;;  %v4323_v48 = vpop.eup %4322  ;;  %1737 = vmatprep.mubr.f32.mxu0 %v1498_v62  ;;  %v1497_v11 = vadd.f32 %v1433_v53, %v1177_v38  ;;  %v994_v61 = vmul.f32 %v5251_v45, %v882_v55  ;;  %v725_v59 = vmul.f32 %v5242_v40, %v614_v8  ;;  %v726_v58 = vmul.f32 %v5245_v41, %v614_v8 }
 0x105   : > { %v1255_v13 = vmin.f32 %v5541_v34, 0.0  ;;  %v1436_v4 = vmul.f32 1.6732632, %v4323_v48  ;;  %v1179_v28 = vmax.f32 %v5412_v12, 0.0  ;;  %4332 = vpow2.f32 %v5482_v5 }
 0x106   : > { %v4325_v32 = vpop.eup %4324  ;;  %1738 = vmatmul.mubr.f32.gmra.mrb[18].mxu0 %v1497_v11  ;;  %v1257_v9 = vmin.f32 %v5544_v20, 0.0  ;;  %v1258_v17 = vmin.f32 %v5547_v25, 0.0  ;;  %v1182_v55 = vmax.f32 %v5440_v6, 0.0  ;;  %v5562_v18 = vadd.f32 %v5261_v51, %v1055_v46 }
 0x107   : > { %v892_v27 = vpop.permute.xlu1 %891  ;;  %v1500_v8 = vadd.f32 %v1436_v4, %v1180_v22  ;;  %v1435_v47 = vmul.f32 1.6732632, %v4325_v32  ;;  %v5565_v33 = vadd.f32 %v5264_v52, %v1056_v42  ;;  %v1057_v19 = vadd.f32 %v993_v57, %v725_v59 }
 0x108   : > { %v624_v24 = vpop.permute.xlu0 %623  ;;  %v4327_v12 = vpop.eup %4326  ;;  %v1058_v3 = vadd.f32 %v994_v61, %v726_v58  ;;  %v995_v5 = vmul.f32 %v5248_v44, %v887_v60  ;;  %v996_v1 = vmul.f32 %v5251_v45, %v887_v60  ;;  %4334 = vpow2.f32 %v5497_v2 }
 0x109   : > { %1743 = vmatprep.mubr.f32.mxu0 %v1500_v8  ;;  %v1499_v54 = vadd.f32 %v1435_v47, %v1179_v28  ;;  %v1438_v6 = vmul.f32 1.6732632, %v4327_v12  ;;  %v727_v10 = vmul.f32 %v5242_v40, %v619_v21  ;;  %v728_v7 = vmul.f32 %v5245_v41, %v619_v21 }
 0x10a   : > { %v4329_v31 = vpop.eup %4328  ;;  %v5572_v62 = vmul.f32 1.442695, %v1255_v13  ;;  %v1259_v53 = vmin.f32 %v5562_v18, 0.0  ;;  %v1181_v46 = vmax.f32 %v5432_v43, 0.0  ;;  %4336 = vpow2.f32 %v5493_v0 }
 0x10b   : > { %v897_v38 = vpop.permute.xlu1 %896  ;;  %1744 = vmatmul.mubr.f32.gmra.mrb[20].mxu0 %v1499_v54  ;;  %v1502_v2 = vadd.f32 %v1438_v6, %v1182_v55  ;;  %v1260_v22 = vmin.f32 %v5565_v33, 0.0  ;;  %v1437_v42 = vmul.f32 1.6732632, %v4329_v31  ;;  %v5579_v57 = vadd.f32 %v5261_v51, %v1057_v19 }
 0x10c   : > { %v629_v60 = vpop.permute.xlu0 %628  ;;  %v5581_v21 = vmul.f32 1.442695, %v1257_v9  ;;  %v5583_v48 = vmul.f32 1.442695, %v1258_v17  ;;  %v1184_v11 = vmax.f32 %v5447_v30, 0.0  ;;  %v1183_v61 = vmax.f32 %v5444_v15, 0.0 }
 0x10d   : > { %v4331_v43 = vpop.eup %4330  ;;  %1749 = vmatprep.mubr.f32.mxu0 %v1502_v2  ;;  %v1501_v0 = vadd.f32 %v1437_v42, %v1181_v46  ;;  %v5588_v59 = vadd.f32 %v5264_v52, %v1058_v3  ;;  %v1059_v58 = vadd.f32 %v995_v5, %v727_v10  ;;  %v1060_v13 = vadd.f32 %v996_v1, %v728_v7 }
 0x10e   : > { %v1440_v4 = vmul.f32 1.6732632, %v4331_v43  ;;  %v997_v28 = vmul.f32 %v5248_v44, %v892_v27  ;;  %4338 = vpow2.f32 %v5528_v63  ;;  %v729_v32 = vmul.f32 %v5242_v40, %v624_v24 }
 0x10f   : > { %v4333_v9 = vpop.eup %4332  ;;  %v5593_v17 = vmul.f32 1.442695, %v1259_v53  ;;  %v5595_v30 = vmul.f32 1.442695, %v1260_v22  ;;  %1750 = vmatmul.mubr.f32.gmra.mrb[22].mxu0 %v1501_v0  ;;  %v1261_v15 = vmin.f32 %v5579_v57, 0.0  ;;  %4340 = vpow2.f32 %v5526_v23  ;;  %v902_v55 = vpop.permute.xlu1 %901 }
 0x110   : > { %v1504_v8 = vadd.f32 %v1440_v4, %v1184_v11  ;;  %v1439_v47 = vmul.f32 1.6732632, %v4333_v9  ;;  %v998_v19 = vmul.f32 %v5251_v45, %v892_v27  ;;  %v730_v12 = vmul.f32 %v5245_v41, %v624_v24  ;;  %v634_v63 = vpop.permute.xlu0 %633 }
 0x111   : > { %v1262_v3 = vmin.f32 %v5588_v59, 0.0  ;;  %v1186_v5 = vmax.f32 %v5466_v35, 0.0  ;;  %v999_v1 = vmul.f32 %v5248_v44, %v897_v38  ;;  %v1000_v54 = vmul.f32 %v5251_v45, %v897_v38 }
 0x112   : > { %v4335_v6 = vpop.eup %4334  ;;  %1755 = vmatprep.mubr.f32.mxu0 %v1504_v8  ;;  %v1503_v10 = vadd.f32 %v1439_v47, %v1183_v61  ;;  %v5606_v23 = vadd.f32 %v5261_v51, %v1059_v58  ;;  %v5609_v7 = vadd.f32 %v5264_v52, %v1060_v13  ;;  %v1061_v27 = vadd.f32 %v997_v28, %v729_v32 }
 0x113   : > { %v1442_v24 = vmul.f32 1.6732632, %v4335_v6  ;;  %4342 = vpow2.f32 %v5538_v14  ;;  %v731_v31 = vmul.f32 %v5242_v40, %v629_v60  ;;  %v732_v35 = vmul.f32 %v5245_v41, %v629_v60  ;;  %v907_v14 = vpop.permute.xlu1 %906 }
 0x114   : > { %v4337_v53 = vpop.eup %4336  ;;  %v5614_v46 = vmul.f32 1.442695, %v1261_v15  ;;  %1756 = vmatmul.mubr.f32.gmra.mrb[24].mxu0 %v1503_v10  ;;  %v1185_v38 = vmax.f32 %v5453_v56, 0.0  ;;  %v1062_v2 = vadd.f32 %v998_v19, %v730_v12  ;;  %v5619_v22 = vadd.f32 %v5264_v52, %v5532_v39  ;;  %v639_v4 = vpop.permute.xlu0 %638 }
 0x115   : > { %v1506_v42 = vadd.f32 %v1442_v24, %v1186_v5  ;;  %v1441_v11 = vmul.f32 1.6732632, %v4337_v53  ;;  %v1063_v61 = vadd.f32 %v999_v1, %v731_v31  ;;  %v1064_v43 = vadd.f32 %v1000_v54, %v732_v35 }
 0x116   : > { %v1263_v0 = vmin.f32 %v5606_v23, 0.0  ;;  %v1264_v60 = vmin.f32 %v5609_v7, 0.0  ;;  %v1188_v58 = vmax.f32 %v5490_v29, 0.0  ;;  %v1256_v13 = vmin.f32 %v5619_v22, 0.0 }
 0x117   : > { %1761 = vmatprep.mubr.f32.mxu0 %v1506_v42  ;;  %v1505_v56 = vadd.f32 %v1441_v11, %v1185_v38  ;;  %v5626_v28 = vadd.f32 %v5261_v51, %v1061_v27  ;;  %v1187_v39 = vmax.f32 %v5487_v50, 0.0  ;;  %4344 = vpow2.f32 %v5536_v16  ;;  %v912_v27 = vpop.permute.xlu1 %911 }
 0x118   : > { %v4339_v32 = vpop.eup %4338  ;;  %v5631_v9 = vadd.f32 %v5264_v52, %v1062_v2  ;;  %v5634_v15 = vadd.f32 %v5261_v51, %v1063_v61  ;;  %v1353_v29 = vmul.f32 1.442695, %v1256_v13  ;;  %4346 = vpow2.f32 %v5572_v62 }
 0x119   : > { %v4341_v8 = vpop.eup %4340  ;;  %1762 = vmatmul.mubr.f32.gmra.mrb[26].mxu0 %v1505_v56  ;;  %v1444_v47 = vmul.f32 1.6732632, %v4339_v32  ;;  %v5638_v19 = vadd.f32 %v5264_v52, %v1064_v43  ;;  %v1001_v50 = vmul.f32 %v5248_v44, %v902_v55  ;;  %v1002_v16 = vmul.f32 %v5251_v45, %v902_v55  ;;  %v644_v55 = vpop.permute.xlu0 %643 }
 0x11a   : > { %v1443_v12 = vmul.f32 1.6732632, %v4341_v8  ;;  %4348 = vpow2.f32 %v1353_v29  ;;  %v733_v5 = vmul.f32 %v5242_v40, %v634_v63  ;;  %v734_v1 = vmul.f32 %v5245_v41, %v634_v63 }
 0x11b   : > { %v1365_v54 = vmul.f32 1.442695, %v1262_v3  ;;  %v5644_v6 = vmul.f32 1.442695, %v1263_v0  ;;  %v5646_v62 = vmul.f32 1.442695, %v1264_v60  ;;  %v1508_v10 = vadd.f32 %v1444_v47, %v1188_v58 }
 0x11c   : > { %v1265_v24 = vmin.f32 %v5626_v28, 0.0  ;;  %v1266_v31 = vmin.f32 %v5631_v9, 0.0  ;;  %v1507_v35 = vadd.f32 %v1443_v12, %v1187_v39  ;;  %4350 = vpow2.f32 %v5583_v48 }
 0x11d   : > { %v4343_v53 = vpop.eup %4342  ;;  %1767 = vmatprep.mubr.f32.mxu0 %v1508_v10  ;;  %v1190_v38 = vmax.f32 %v5509_v49, 0.0  ;;  %v1267_v63 = vmin.f32 %v5634_v15, 0.0  ;;  %v1065_v3 = vadd.f32 %v1001_v50, %v733_v5  ;;  %4352 = vpow2.f32 %v5581_v21  ;;  %v649_v47 = vpop.permute.xlu0 %648 }
 0x11e   : > { %1768 = vmatmul.mubr.f32.gmra.mrb[28].mxu0 %v1507_v35  ;;  %v1446_v2 = vmul.f32 1.6732632, %v4343_v53  ;;  %v1268_v42 = vmin.f32 %v5638_v19, 0.0  ;;  %v1066_v11 = vadd.f32 %v1002_v16, %v734_v1  ;;  %v1003_v61 = vmul.f32 %v5248_v44, %v907_v14 }
 0x11f   : > { %v1004_v43 = vmul.f32 %v5251_v45, %v907_v14  ;;  %v735_v48 = vmul.f32 %v5242_v40, %v639_v4  ;;  %v736_v0 = vmul.f32 %v5245_v41, %v639_v4  ;;  %4354 = vpow2.f32 %v5595_v30  ;;  %v917_v4 = vpop.permute.xlu1 %916 }
 0x120   : > { %v5660_v49 = vmul.f32 1.442695, %v1265_v24  ;;  %v5662_v60 = vmul.f32 1.442695, %v1266_v31  ;;  %v1510_v21 = vadd.f32 %v1446_v2, %v1190_v38  ;;  %v1189_v58 = vmax.f32 %v5505_v26, 0.0 }
 0x121   : > { %v4345_v13 = vpop.eup %4344  ;;  %v1192_v56 = vmax.f32 %v5619_v22, 0.0  ;;  %v1191_v39 = vmax.f32 %v5541_v34, 0.0  ;;  %v5668_v14 = vadd.f32 %v5261_v51, %v1065_v3  ;;  %4356 = vpow2.f32 %v5593_v17 }
 0x122   : > { %v4347_v32 = vpop.eup %4346  ;;  %1773 = vmatprep.mubr.f32.mxu0 %v1510_v21  ;;  %v5671_v30 = vmul.f32 1.442695, %v1267_v63  ;;  %v5673_v29 = vmul.f32 1.442695, %v1268_v42  ;;  %v1445_v8 = vmul.f32 1.6732632, %v4345_v13  ;;  %v5676_v50 = vadd.f32 %v5264_v52, %v1066_v11 }
 0x123   : > { %v1447_v26 = vmul.f32 1.6732632, %v4347_v32  ;;  %v1067_v22 = vadd.f32 %v1003_v61, %v735_v48  ;;  %v1068_v34 = vadd.f32 %v1004_v43, %v736_v0  ;;  %v1005_v5 = vmul.f32 %v5248_v44, %v912_v27  ;;  %v654_v48 = vpop.permute.xlu0 %653 }
 0x124   : > { %v4349_v16 = vpop.eup %4348  ;;  %v1509_v12 = vadd.f32 %v1445_v8, %v1189_v58  ;;  %v737_v17 = vmul.f32 %v5242_v40, %v644_v55  ;;  %4358 = vpow2.f32 %v1365_v54  ;;  %v1269_v10 = vmin.f32 %v5668_v14, 0.0 }
 0x125   : > { %v1448_v1 = vmul.f32 1.6732632, %v4349_v16  ;;  %v1194_v24 = vmax.f32 %v5547_v25, 0.0  ;;  %v1193_v31 = vmax.f32 %v5544_v20, 0.0  ;;  %v1511_v53 = vadd.f32 %v1447_v26, %v1191_v39  ;;  %v922_v25 = vpop.permute.xlu1 %921 }
 0x126   : > { %v4351_v35 = vpop.eup %4350  ;;  %1774 = vmatmul.mubr.f32.gmra.mrb[30].mxu0 %v1509_v12  ;;  %v1006_v38 = vmul.f32 %v5251_v45, %v912_v27  ;;  %v738_v63 = vmul.f32 %v5245_v41, %v644_v55  ;;  %4360 = vpow2.f32 %v5614_v46  ;;  %v1270_v54 = vmin.f32 %v5676_v50, 0.0 }
 0x127   : > { %v4353_v3 = vpop.eup %4352  ;;  %v1512_v2 = vadd.f32 %v1448_v1, %v1192_v56  ;;  %v1450_v42 = vmul.f32 1.6732632, %v4351_v35  ;;  %v5688_v11 = vadd.f32 %v5261_v51, %v1067_v22  ;;  %v5691_v20 = vadd.f32 %v5264_v52, %v1068_v34  ;;  %v659_v35 = vpop.permute.xlu0 %658 }
 0x128   : > { %v1449_v61 = vmul.f32 1.6732632, %v4353_v3  ;;  %v1069_v43 = vadd.f32 %v1005_v5, %v737_v17  ;;  %v1007_v27 = vmul.f32 %v5248_v44, %v917_v4  ;;  %v1008_v0 = vmul.f32 %v5251_v45, %v917_v4 }
 0x129   : > { %v4355_v55 = vpop.eup %4354  ;;  %1779 = vmatprep.mubr.f32.mxu1 %v1512_v2  ;;  %v1514_v46 = vadd.f32 %v1450_v42, %v1194_v24  ;;  %v739_v21 = vmul.f32 %v5242_v40, %v649_v47  ;;  %v740_v58 = vmul.f32 %v5245_v41, %v649_v47  ;;  %v1196_v56 = vmax.f32 %v5565_v33, 0.0  ;;  %v927_v1 = vpop.permute.xlu1 %926 }
 0x12a   : > { %1780 = vmatmul.mubr.f32.vlgmr.msra.gmra.mrb[0].mxu1 %v1511_v53  ;;  %v1513_v13 = vadd.f32 %v1449_v61, %v1193_v31  ;;  %v1452_v39 = vmul.f32 1.6732632, %v4355_v55  ;;  %v1070_v32 = vadd.f32 %v1006_v38, %v738_v63  ;;  %v5698_v26 = vmul.f32 1.442695, %v1269_v10 }
 0x12b   : > { %v4357_v8 = vpop.eup %4356  ;;  %1785 = vmatprep.mubr.f32.mxu1 %v1514_v46  ;;  %v1271_v22 = vmin.f32 %v5688_v11, 0.0  ;;  %v1195_v34 = vmax.f32 %v5562_v18, 0.0  ;;  %4362 = vpow2.f32 %v5646_v62  ;;  %v5704_v47 = vadd.f32 %v5261_v51, %v1069_v43 }
 0x12c   : > { %v1516_v4 = vadd.f32 %v1452_v39, %v1196_v56  ;;  %v1451_v16 = vmul.f32 1.6732632, %v4357_v8  ;;  %v1071_v12 = vadd.f32 %v1007_v27, %v739_v21  ;;  %v5706_v5 = vmul.f32 1.442695, %v1270_v54  ;;  %v664_v39 = vpop.permute.xlu0 %663 }
 0x12d   : > { %v1272_v33 = vmin.f32 %v5691_v20, 0.0  ;;  %v1072_v17 = vadd.f32 %v1008_v0, %v740_v58  ;;  %4364 = vpow2.f32 %v5644_v6  ;;  %v5711_v18 = vadd.f32 %v5264_v52, %v1070_v32 }
 0x12e   : > { %v4359_v10 = vpop.eup %4358  ;;  %1786 = vmatmul.mubr.f32.gmra.mrb[2].mxu1 %v1513_v13  ;;  %v1515_v24 = vadd.f32 %v1451_v16, %v1195_v34  ;;  %v1009_v62 = vmul.f32 %v5248_v44, %v922_v25  ;;  %v741_v31 = vmul.f32 %v5242_v40, %v654_v48  ;;  %v1198_v53 = vmax.f32 %v5588_v59, 0.0 }
 0x12f   : > { %1791 = vmatprep.mubr.f32.mxu1 %v1516_v4  ;;  %v1454_v38 = vmul.f32 1.6732632, %v4359_v10  ;;  %v1010_v63 = vmul.f32 %v5251_v45, %v922_v25  ;;  %v742_v6 = vmul.f32 %v5245_v41, %v654_v48  ;;  %v5718_v2 = vmul.f32 1.442695, %v1271_v22 }
 0x130   : > { %v4361_v3 = vpop.eup %4360  ;;  %v1273_v54 = vmin.f32 %v5704_v47, 0.0  ;;  %v5722_v42 = vadd.f32 %v5261_v51, %v1071_v12  ;;  %4366 = vpow2.f32 %v5662_v60  ;;  %v1197_v43 = vmax.f32 %v5579_v57, 0.0  ;;  %v932_v57 = vpop.permute.xlu1 %931 }
 0x131   : > { %v1518_v61 = vadd.f32 %v1454_v38, %v1198_v53  ;;  %v1453_v27 = vmul.f32 1.6732632, %v4361_v3  ;;  %v5727_v59 = vadd.f32 %v5264_v52, %v1072_v17  ;;  %v5729_v25 = vmul.f32 1.442695, %v1272_v33 }
 0x132   : > { %1792 = vmatmul.mubr.f32.gmra.mrb[4].mxu1 %v1515_v24  ;;  %v1274_v48 = vmin.f32 %v5711_v18, 0.0  ;;  %v1073_v55 = vadd.f32 %v1009_v62, %v741_v31  ;;  %4368 = vpow2.f32 %v5660_v49  ;;  %v1074_v0 = vadd.f32 %v1010_v63, %v742_v6  ;;  %v669_v6 = vpop.permute.xlu0 %668 }
 0x133   : > { %1797 = vmatprep.mubr.f32.mxu1 %v1518_v61  ;;  %v1517_v46 = vadd.f32 %v1453_v27, %v1197_v43  ;;  %v1011_v60 = vmul.f32 %v5248_v44, %v927_v1  ;;  %v743_v21 = vmul.f32 %v5242_v40, %v659_v35  ;;  %v5735_v58 = vmul.f32 1.442695, %v1273_v54 }
 0x134   : > { %v1275_v13 = vmin.f32 %v5722_v42, 0.0  ;;  %v1200_v56 = vmax.f32 %v5609_v7, 0.0  ;;  %4370 = vpow2.f32 %v5673_v29  ;;  %v1276_v49 = vmin.f32 %v5727_v59, 0.0 }
 0x135   : > { %v4363_v32 = vpop.eup %4362  ;;  %v1012_v8 = vmul.f32 %v5251_v45, %v927_v1  ;;  %v744_v22 = vmul.f32 %v5245_v41, %v659_v35  ;;  %4372 = vpow2.f32 %v5671_v30  ;;  %v5744_v34 = vmul.f32 1.442695, %v1274_v48  ;;  %v937_v35 = vpop.permute.xlu1 %936 }
 0x136   : > { %1798 = vmatmul.mubr.f32.gmra.mrb[6].mxu1 %v1517_v46  ;;  %v1456_v4 = vmul.f32 1.6732632, %v4363_v32  ;;  %v1199_v16 = vmax.f32 %v5606_v23, 0.0  ;;  %v1202_v7 = vmax.f32 %v5631_v9, 0.0  ;;  %v5749_v29 = vadd.f32 %v5261_v51, %v1073_v55 }
 0x137   : > { %v4365_v12 = vpop.eup %4364  ;;  %v5752_v33 = vadd.f32 %v5264_v52, %v1074_v0  ;;  %v1201_v17 = vmax.f32 %v5626_v28, 0.0  ;;  %v1075_v1 = vadd.f32 %v1011_v60, %v743_v21  ;;  %v1014_v24 = vmul.f32 %v5251_v45, %v932_v57 }
 0x138   : > { %v1520_v10 = vadd.f32 %v1456_v4, %v1200_v56  ;;  %v1455_v30 = vmul.f32 1.6732632, %v4365_v12  ;;  %v746_v62 = vmul.f32 %v5245_v41, %v664_v39  ;;  %v5757_v31 = vmul.f32 1.442695, %v1275_v13 }
 0x139   : > { %v5759_v23 = vmul.f32 1.442695, %v1276_v49  ;;  %v1076_v9 = vadd.f32 %v1012_v8, %v744_v22  ;;  %4374 = vpow2.f32 %v5706_v5  ;;  %v1013_v28 = vmul.f32 %v5248_v44, %v932_v57  ;;  %v942_v22 = vpop.permute.xlu1 %941 }
 0x13a   : > { %v4367_v53 = vpop.eup %4366  ;;  %1803 = vmatprep.mubr.f32.mxu1 %v1520_v10  ;;  %v1519_v38 = vadd.f32 %v1455_v30, %v1199_v16  ;;  %v745_v63 = vmul.f32 %v5242_v40, %v664_v39  ;;  %4376 = vpow2.f32 %v5698_v26  ;;  %v1277_v3 = vmin.f32 %v5749_v29, 0.0 }
 0x13b   : > { %v1278_v54 = vmin.f32 %v5752_v33, 0.0  ;;  %v1458_v61 = vmul.f32 1.6732632, %v4367_v53  ;;  %v1204_v43 = vmax.f32 %v5638_v19, 0.0  ;;  %v5769_v5 = vadd.f32 %v5261_v51, %v1075_v1  ;;  %v674_v1 = vpop.permute.xlu0 %673 }
 0x13c   : > { %v4369_v27 = vpop.eup %4368  ;;  %1804 = vmatmul.mubr.f32.gmra.mrb[8].mxu1 %v1519_v38  ;;  %v1203_v48 = vmax.f32 %v5634_v15, 0.0  ;;  %v1078_v55 = vadd.f32 %v1014_v24, %v746_v62  ;;  %v1016_v46 = vmul.f32 %v5251_v45, %v937_v35  ;;  %v5774_v60 = vadd.f32 %v5264_v52, %v1076_v9 }
 0x13d   : > { %v1522_v0 = vadd.f32 %v1458_v61, %v1202_v7  ;;  %v1457_v26 = vmul.f32 1.6732632, %v4369_v27  ;;  %v748_v21 = vmul.f32 %v5245_v41, %v669_v6  ;;  %v1077_v13 = vadd.f32 %v1013_v28, %v745_v63 }
 0x13e   : > { %v4371_v57 = vpop.eup %4370  ;;  %v1015_v19 = vmul.f32 %v5248_v44, %v937_v35  ;;  %v747_v56 = vmul.f32 %v5242_v40, %v669_v6  ;;  %4378 = vpow2.f32 %v5729_v25  ;;  %v1395_v15 = vmul.f32 1.442695, %v1277_v3 }
 0x13f   : > { %v4373_v39 = vpop.eup %4372  ;;  %v1397_v32 = vmul.f32 1.442695, %v1278_v54  ;;  %1809 = vmatprep.mubr.f32.mxu1 %v1522_v0  ;;  %v1521_v49 = vadd.f32 %v1457_v26, %v1201_v17  ;;  %v1460_v8 = vmul.f32 1.6732632, %v4371_v57  ;;  %v5781_v16 = vadd.f32 %v5264_v52, %v1078_v55 }
 0x140   : > { %v1459_v4 = vmul.f32 1.6732632, %v4373_v39  ;;  %v1206_v7 = vmax.f32 %v5676_v50, 0.0  ;;  %v1080_v12 = vadd.f32 %v1016_v46, %v748_v21  ;;  %v1279_v10 = vmin.f32 %v5769_v5, 0.0  ;;  %v2263_v21 = vld [vmem:[%s7119_s7 + $0x18] sm:$0xff]  ;;  %v2265_v39 = vld [vmem:[%s7119_s7 + $0x28] sm:$0xff] }
 0x141   : > { %1810 = vmatmul.mubr.f32.gmra.mrb[10].mxu1 %v1521_v49  ;;  %v1280_v25 = vmin.f32 %v5774_v60, 0.0  ;;  %v1524_v30 = vadd.f32 %v1460_v8, %v1204_v43  ;;  %4380 = vpow2.f32 %v5718_v2  ;;  %v5788_v17 = vadd.f32 %v5261_v51, %v1077_v13 }
 0x142   : > { %v1523_v24 = vadd.f32 %v1459_v4, %v1203_v48  ;;  %v1079_v62 = vadd.f32 %v1015_v19, %v747_v56  ;;  %v1018_v9 = vmul.f32 %v5251_v45, %v942_v22  ;;  %v1017_v50 = vmul.f32 %v5248_v44, %v942_v22  ;;  %v2260_v19 = vld [vmem:[%s7119_s7] sm:$0xff]  ;;  %v2262_v56 = vld [vmem:[%s7119_s7 + $0x10] sm:$0xff] }
 0x143   : > { %v4375_v35 = vpop.eup %4374  ;;  %1815 = vmatprep.mubr.f32.mxu1 %v1524_v30  ;;  %v749_v53 = vmul.f32 %v5242_v40, %v674_v1  ;;  %v750_v38 = vmul.f32 %v5245_v41, %v674_v1  ;;  %4382 = vpow2.f32 %v5744_v34  ;;  %v1282_v2 = vmin.f32 %v5781_v16, 0.0 }
 0x144   : > { %v4377_v28 = vpop.eup %4376  ;;  %v1462_v63 = vmul.f32 1.6732632, %v4375_v35  ;;  %v1205_v6 = vmax.f32 %v5668_v14, 0.0  ;;  %v5798_v3 = vadd.f32 %v5264_v52, %v1080_v12  ;;  %v1401_v45 = vmul.f32 1.442695, %v1280_v25  ;;  %v2266_v25 = vld [vmem:[%s7119_s7 + $0x30] sm:$0xff] }
 0x145   : > { %1816 = vmatmul.mubr.f32.gmra.mrb[12].mxu1 %v1523_v24  ;;  %v1461_v54 = vmul.f32 1.6732632, %v4377_v28  ;;  %v1082_v61 = vadd.f32 %v1018_v9, %v750_v38  ;;  %4384 = vpow2.f32 %v5735_v58  ;;  %v1281_v40 = vmin.f32 %v5788_v17, 0.0  ;;  %v2269_v9 = vld [vmem:[%s7119_s7 + $0x48] sm:$0xff]  ;;  %v2271_v35 = vld [vmem:[%s7119_s7 + $0x58] sm:$0xff] }
 0x146   : > { %v1526_v41 = vadd.f32 %v1462_v63, %v1206_v7  ;;  %v5803_v44 = vadd.f32 %v5261_v51, %v1079_v62  ;;  %4386 = vpow2.f32 %v5759_v23  ;;  %v1399_v34 = vmul.f32 1.442695, %v1279_v10  ;;  %v2264_v10 = vld [vmem:[%s7119_s7 + $0x20] sm:$0xff] }
 0x147   : > { %v1525_v43 = vadd.f32 %v1461_v54, %v1205_v6  ;;  %v1081_v14 = vadd.f32 %v1017_v50, %v749_v53  ;;  %4388 = vpow2.f32 %v5757_v31  ;;  %v1405_v48 = vmul.f32 1.442695, %v1282_v2  ;;  %v2261_v31 = vld [vmem:[%s7119_s7 + $0x8] sm:$0xff] }
 0x148   : > { %v4379_v27 = vpop.eup %4378  ;;  %1821 = vmatprep.mubr.f32.mxu1 %v1526_v41  ;;  %v1284_v55 = vmin.f32 %v5798_v3, 0.0  ;;  %v5809_v58 = vadd.f32 %v5264_v52, %v1082_v61  ;;  %4390 = vpow2.f32 %v1397_v32  ;;  %v1208_v46 = vmax.f32 %v5691_v20, 0.0 }
 0x149   : > { %1822 = vmatmul.mubr.f32.gmra.mrb[14].mxu1 %v1525_v43  ;;  %v1464_v0 = vmul.f32 1.6732632, %v4379_v27  ;;  %4392 = vpow2.f32 %v1395_v15  ;;  %v1403_v23 = vmul.f32 1.442695, %v1281_v40  ;;  %v1283_v26 = vmin.f32 %v5803_v44, 0.0  ;;  %v2268_v43 = vld [vmem:[%s7119_s7 + $0x40] sm:$0xff] }
 0x14a   : > { %4394 = vpow2.f32 %v1401_v45  ;;  %v1207_v13 = vmax.f32 %v5688_v11, 0.0  ;;  %v5821_v20 = vadd.f32 %v5261_v51, %v1081_v14  ;;  %v1409_v15 = vmul.f32 1.442695, %v1284_v55  ;;  %v2267_v51 = vld [vmem:[%s7119_s7 + $0x38] sm:$0xff]  ;;  %v2273_v55 = vld [vmem:[%s7119_s7 + $0x68] sm:$0xff] }
 0x14b   : > { %v4381_v52 = vpop.eup %4380  ;;  %v1528_v57 = vadd.f32 %v1464_v0, %v1208_v46  ;;  %4396 = vpow2.f32 %v1399_v34  ;;  %v1286_v11 = vmin.f32 %v5809_v58, 0.0  ;;  %v1210_v8 = vmax.f32 %v5711_v18, 0.0 }
 0x14c   : > { %v1463_v32 = vmul.f32 1.6732632, %v4381_v52  ;;  %4398 = vpow2.f32 %v1405_v48  ;;  %v4098_v22 = vpack.c.bf16 %v2263_v21, %v2261_v31  ;;  %v1407_v4 = vmul.f32 1.442695, %v1283_v26 }
 0x14d   : > { %v4383_v49 = vpop.eup %4382  ;;  %1827 = vmatprep.mubr.f32.mxu1 %v1528_v57  ;;  %v4100_v1 = vpack.c.bf16 %v2262_v56, %v2260_v19  ;;  %v1285_v24 = vmin.f32 %v5821_v20, 0.0  ;;  %v1209_v62 = vmax.f32 %v5704_v47, 0.0  ;;  %4400 = vpow2.f32 %v1403_v23  ;;  %v2272_v56 = vld [vmem:[%s7119_s7 + $0x60] sm:$0xff] }
 0x14e   : > { %v1527_v7 = vadd.f32 %v1463_v32, %v1207_v13  ;;  %v1466_v12 = vmul.f32 1.6732632, %v4383_v49  ;;  %4099 = vmatprep.subr.bf16.mxu1 %v4098_v22  ;;  %v4102_v18 = vpack.c.bf16 %v2267_v51, %v2265_v39  ;;  %v1413_v53 = vmul.f32 1.442695, %v1286_v11  ;;  %v2274_v39 = vld [vmem:[%s7119_s7 + $0x70] sm:$0xff]  ;;  %v2277_v32 = vld [vmem:[%s7119_s7 + $0x88] sm:$0xff] }
 0x14f   : > { %v4385_v30 = vpop.eup %4384  ;;  %4402 = vpow2.f32 %v1409_v15  ;;  %v1212_v47 = vmax.f32 %v5727_v59, 0.0  ;;  %v1211_v6 = vmax.f32 %v5722_v42, 0.0  ;;  %4101 = vmatpush1.bf16.msra.mxu1 %v4100_v1  ;;  %v4104_v45 = vpack.c.bf16 %v2266_v25, %v2264_v10  ;;  %v2270_v59 = vld [vmem:[%s7119_s7 + $0x50] sm:$0xff]  ;;  %v2276_v1 = vld [vmem:[%s7119_s7 + $0x80] sm:$0xff] }
 0x150   : > { %v4387_v50 = vpop.eup %4386  ;;  %1828 = vmatmul.mubr.f32.gmra.mrb[16].mxu1 %v1527_v7  ;;  %v1530_v38 = vadd.f32 %v1466_v12, %v1210_v8  ;;  %v1465_v28 = vmul.f32 1.6732632, %v4385_v30  ;;  %v1214_v41 = vmax.f32 %v5752_v33, 0.0  ;;  %4103 = vmatprep.subr.bf16.mxu1 %v4102_v18  ;;  %v4106_v34 = vpack.c.bf16 %v2271_v35, %v2269_v9  ;;  %v2275_v33 = vld [vmem:[%s7119_s7 + $0x78] sm:$0xff]  ;;  %v2278_v10 = vld [vmem:[%s7119_s7 + $0x90] sm:$0xff]  ;;  %v2281_v30 = vld [vmem:[%s7119_s7 + $0xa8] sm:$0xff] }
 0x151   : > { %v4389_v2 = vpop.eup %4388  ;;  %v1468_v63 = vmul.f32 1.6732632, %v4387_v50  ;;  %v1411_v42 = vmul.f32 1.442695, %v1285_v24  ;;  %4404 = vpow2.f32 %v1407_v4  ;;  %v4108_v52 = vpack.c.bf16 %v2270_v59, %v2268_v43  ;;  %v2284_v43 = vld [vmem:[%s7119_s7 + $0xc0] sm:$0xff]  ;;  %v2286_v59 = vld [vmem:[%s7119_s7 + $0xd0] sm:$0xff] }
 0x152   : > { %v4391_v54 = vpop.eup %4390  ;;  %1833 = vmatprep.mubr.f32.mxu1 %v1530_v38  ;;  %v1529_v61 = vadd.f32 %v1465_v28, %v1209_v62  ;;  %v1467_v40 = vmul.f32 1.6732632, %v4389_v2  ;;  %4406 = vpow2.f32 %v1413_v53  ;;  %v1213_v13 = vmax.f32 %v5749_v29, 0.0  ;;  %v2279_v29 = vld [vmem:[%s7119_s7 + $0x98] sm:$0xff]  ;;  %v2280_v28 = vld [vmem:[%s7119_s7 + $0xa0] sm:$0xff]  ;;  %v2282_v2 = vld [vmem:[%s7119_s7 + $0xb0] sm:$0xff] }
 0x153   : > { %v4393_v14 = vpop.eup %4392  ;;  %v1532_v27 = vadd.f32 %v1468_v63, %v1212_v47  ;;  %v1470_v48 = vmul.f32 1.6732632, %v4391_v54  ;;  %4105 = vmatpush1.bf16.msra.mxu1 %v4104_v45  ;;  %v4110_v19 = vpack.c.bf16 %v2275_v33, %v2273_v55  ;;  %v1216_v15 = vmax.f32 %v5774_v60, 0.0  ;;  %v2285_v63 = vld [vmem:[%s7119_s7 + $0xc8] sm:$0xff] }
 0x154   : > { %v4395_v46 = vpop.eup %4394  ;;  %1834 = vmatmul.mubr.f32.gmra.mrb[18].mxu1 %v1529_v61  ;;  %v1531_v0 = vadd.f32 %v1467_v40, %v1211_v6  ;;  %v1469_v23 = vmul.f32 1.6732632, %v4393_v14  ;;  %4107 = vmatprep.subr.bf16.mxu1 %v4106_v34  ;;  %4408 = vpow2.f32 %v1411_v42  ;;  %v4112_v4 = vpack.c.bf16 %v2274_v39, %v2272_v56  ;;  %v2289_v42 = vld [vmem:[%s7119_s7 + $0xe8] sm:$0xff]  ;;  %v2299_v56 = vld [vmem:[%s7119_s7 + $0x138] sm:$0xff] }
 0x155   : > { %v4397_v26 = vpop.eup %4396  ;;  %1839 = vmatprep.mubr.f32.mxu1 %v1532_v27  ;;  %v1534_v31 = vadd.f32 %v1470_v48, %v1214_v41  ;;  %v1472_v21 = vmul.f32 1.6732632, %v4395_v46  ;;  %v1215_v60 = vmax.f32 %v5769_v5, 0.0  ;;  %v4114_v12 = vpack.c.bf16 %v2279_v29, %v2277_v32  ;;  %v2283_v5 = vld [vmem:[%s7119_s7 + $0xb8] sm:$0xff]  ;;  %v2296_v32 = vld [vmem:[%s7119_s7 + $0x120] sm:$0xff]  ;;  %v2298_v29 = vld [vmem:[%s7119_s7 + $0x130] sm:$0xff] }
 0x156   : > { %v4399_v57 = vpop.eup %4398  ;;  %v1533_v11 = vadd.f32 %v1469_v23, %v1213_v13  ;;  %v1471_v51 = vmul.f32 1.6732632, %v4397_v26  ;;  %v1218_v25 = vmax.f32 %v5781_v16, 0.0  ;;  %v4116_v50 = vpack.c.bf16 %v2278_v10, %v2276_v1  ;;  %v2290_v23 = vld [vmem:[%s7119_s7 + $0xf0] sm:$0xff]  ;;  %v2293_v26 = vld [vmem:[%s7119_s7 + $0x108] sm:$0xff]  ;;  %v2304_v10 = vld [vmem:[%s7119_s7 + $0x160] sm:$0xff] }
 0x157   : > { %v4401_v49 = vpop.eup %4400  ;;  %v1536_v8 = vadd.f32 %v1472_v21, %v1216_v15  ;;  %v1474_v22 = vmul.f32 1.6732632, %v4399_v57  ;;  %4109 = vmatpush1.bf16.msra.mxu1 %v4108_v52  ;;  %v1217_v16 = vmax.f32 %v5788_v17, 0.0  ;;  %v4118_v38 = vpack.c.bf16 %v2283_v5, %v2281_v30  ;;  %v2287_v17 = vld [vmem:[%s7119_s7 + $0xd8] sm:$0xff]  ;;  %v2292_v57 = vld [vmem:[%s7119_s7 + $0x100] sm:$0xff]  ;;  %v2294_v13 = vld [vmem:[%s7119_s7 + $0x110] sm:$0xff] }
 0x158   : > { %1840 = vmatmul.mubr.f32.gmra.mrb[20].mxu1 %v1531_v0  ;;  %4111 = vmatprep.subr.bf16.mxu1 %v4110_v19  ;;  %v1535_v24 = vadd.f32 %v1471_v51, %v1215_v60  ;;  %v1473_v62 = vmul.f32 1.6732632, %v4401_v49  ;;  %v1220_v47 = vmax.f32 %v5798_v3, 0.0  ;;  %v4120_v41 = vpack.c.bf16 %v2282_v2, %v2280_v28  ;;  %v2297_v19 = vld [vmem:[%s7119_s7 + $0x128] sm:$0xff]  ;;  %v2303_v51 = vld [vmem:[%s7119_s7 + $0x158] sm:$0xff]  ;;  %v2314_v28 = vld [vmem:[%s7119_s7 + $0x1b0] sm:$0xff] }
 0x159   : > { %1845 = vmatprep.mubr.f32.mxu1 %v1534_v31  ;;  %v4403_v7 = vpop.eup %4402  ;;  %v1538_v9 = vadd.f32 %v1474_v22, %v1218_v25  ;;  %v1219_v34 = vmax.f32 %v5803_v44, 0.0  ;;  %v4122_v3 = vpack.c.bf16 %v2287_v17, %v2285_v63  ;;  %v1222_v14 = vmax.f32 %v5809_v58, 0.0  ;;  %v2291_v44 = vld [vmem:[%s7119_s7 + $0xf8] sm:$0xff]  ;;  %v2288_v58 = vld [vmem:[%s7119_s7 + $0xe0] sm:$0xff]  ;;  %v2306_v25 = vld [vmem:[%s7119_s7 + $0x170] sm:$0xff] }
 0x15a   : > { %v1476_v35 = vmul.f32 1.6732632, %v4403_v7  ;;  %v1537_v6 = vadd.f32 %v1473_v62, %v1217_v16  ;;  %v4124_v33 = vpack.c.bf16 %v2286_v59, %v2284_v43  ;;  %v1221_v46 = vmax.f32 %v5821_v20, 0.0  ;;  %v2295_v31 = vld [vmem:[%s7119_s7 + $0x118] sm:$0xff]  ;;  %v2300_v22 = vld [vmem:[%s7119_s7 + $0x140] sm:$0xff]  ;;  %v2305_v7 = vld [vmem:[%s7119_s7 + $0x168] sm:$0xff] }
 0x15b   : > { %v4405_v18 = vpop.eup %4404  ;;  %4113 = vmatpush1.bf16.msra.mxu1 %v4112_v4  ;;  %v4126_v0 = vpack.c.bf16 %v2291_v44, %v2289_v42  ;;  %v4128_v21 = vpack.c.bf16 %v2290_v23, %v2288_v58  ;;  %v4130_v52 = vpack.c.bf16 %v2295_v31, %v2293_v26  ;;  %v4132_v39 = vpack.c.bf16 %v2294_v13, %v2292_v57  ;;  %v2302_v4 = vld [vmem:[%s7119_s7 + $0x150] sm:$0xff]  ;;  %v2307_v60 = vld [vmem:[%s7119_s7 + $0x178] sm:$0xff]  ;;  %v2309_v30 = vld [vmem:[%s7119_s7 + $0x188] sm:$0xff] }
 0x15c   : > { %1846 = vmatmul.mubr.f32.gmra.mrb[22].mxu1 %v1533_v11  ;;  %v4407_v53 = vpop.eup %4406  ;;  %4115 = vmatprep.subr.bf16.mxu1 %v4114_v12  ;;  %v1475_v45 = vmul.f32 1.6732632, %v4405_v18  ;;  %v1540_v61 = vadd.f32 %v1476_v35, %v1220_v47  ;;  %v4134_v15 = vpack.c.bf16 %v2299_v56, %v2297_v19  ;;  %v2301_v11 = vld [vmem:[%s7119_s7 + $0x148] sm:$0xff]  ;;  %v4136_v49 = vpack.c.bf16 %v2298_v29, %v2296_v32  ;;  %v2311_v5 = vld [vmem:[%s7119_s7 + $0x198] sm:$0xff]  ;;  %v2308_v18 = vld [vmem:[%s7119_s7 + $0x180] sm:$0xff] }
 0x15d   : > { %1851 = vmatprep.mubr.f32.mxu1 %v1536_v8  ;;  %v1478_v40 = vmul.f32 1.6732632, %v4407_v53  ;;  %v4138_v8 = vpack.c.bf16 %v2303_v51, %v2301_v11  ;;  %v4140_v12 = vpack.c.bf16 %v2302_v4, %v2300_v22  ;;  %v4142_v1 = vpack.c.bf16 %v2307_v60, %v2305_v7  ;;  %v2313_v35 = vld [vmem:[%s7119_s7 + $0x1a8] sm:$0xff]  ;;  %v2319_v47 = vld [vmem:[%s7119_s7 + $0x1d8] sm:$0xff]  ;;  %v1607_v59 = vld [vmem:[%s7118_s6] sm:$0x3] }
 0x15e   : > { %v4409_v54 = vpop.eup %4408  ;;  %v1539_v27 = vadd.f32 %v1475_v45, %v1219_v34  ;;  %v4146_v62 = vpack.c.bf16 %v2311_v5, %v2309_v30  ;;  %v2317_v2 = vld [vmem:[%s7119_s7 + $0x1c8] sm:$0xff]  ;;  %v2318_v45 = vld [vmem:[%s7119_s7 + $0x1d0] sm:$0xff]  ;;  %v2320_v34 = vld [vmem:[%s7119_s7 + $0x1e0] sm:$0xff]  ;;  %v6032_v42 = vrot.slane %v1607_v59, %v5233_v37 }
 0x15f   : > { %4117 = vmatpush1.bf16.msra.mxu1 %v4116_v50  ;;  %v1477_v48 = vmul.f32 1.6732632, %v4409_v54  ;;  %v1542_v55 = vadd.f32 %v1478_v40, %v1222_v14  ;;  %v2315_v50 = vld [vmem:[%s7119_s7 + $0x1b8] sm:$0xff]  ;;  %v4154_v17 = vpack.c.bf16 %v2319_v47, %v2317_v2  ;;  %v2321_v54 = vld [vmem:[%s7119_s7 + $0x1e8] sm:$0xff]  ;;  %v6029_v14 = vrot.slane %v1607_v59, %v5231_v36 }
 0x160   : > { %1852 = vmatmul.mubr.f32.gmra.mrb[24].mxu1 %v1535_v24  ;;  %4119 = vmatprep.subr.bf16.mxu1 %v4118_v38  ;;  %v4144_v24 = vpack.c.bf16 %v2306_v25, %v2304_v10  ;;  %v4150_v16 = vpack.c.bf16 %v2315_v50, %v2313_v35  ;;  %v2312_v38 = vld [vmem:[%s7119_s7 + $0x1a0] sm:$0xff] }
 0x161   : > { %1857 = vmatprep.mubr.f32.mxu1 %v1538_v9  ;;  %v1541_v20 = vadd.f32 %v1477_v48, %v1221_v46  ;;  %v2310_v9 = vld [vmem:[%s7119_s7 + $0x190] sm:$0xff]  ;;  %v4152_v63 = vpack.c.bf16 %v2314_v28, %v2312_v38 }
 0x162   : > { %v4148_v53 = vpack.c.bf16 %v2310_v9, %v2308_v18 }
 0x163   : > { %4121 = vmatpush1.bf16.msra.mxu1 %v4120_v41 }
 0x164   : > { %1858 = vmatmul.mubr.f32.gmra.mrb[26].mxu1 %v1537_v6  ;;  %4123 = vmatprep.subr.bf16.mxu1 %v4122_v3  ;;  %v2316_v6 = vld [vmem:[%s7119_s7 + $0x1c0] sm:$0xff]  ;;  %v2322_v3 = vld [vmem:[%s7119_s7 + $0x1f0] sm:$0xff] }
 0x165   : > { %1863 = vmatprep.mubr.f32.mxu1 %v1540_v61  ;;  %v2323_v61 = vld [vmem:[%s7119_s7 + $0x1f8] sm:$0xff]  ;;  %v4156_v40 = vpack.c.bf16 %v2318_v45, %v2316_v6  ;;  %v4160_v43 = vpack.c.bf16 %v2322_v3, %v2320_v34 }
 0x166   : > { %v4158_v41 = vpack.c.bf16 %v2323_v61, %v2321_v54 }
 0x167   : > { %4125 = vmatpush1.bf16.msra.mxu1 %v4124_v33 }
 0x168   : > { %1864 = vmatmul.mubr.f32.gmra.mrb[28].mxu1 %v1539_v27  ;;  %4127 = vmatprep.subr.bf16.mxu1 %v4126_v0 }
 0x169   : > { %1869 = vmatprep.mubr.f32.mxu1 %v1542_v55 }
 0x16b   : > { %4129 = vmatpush1.bf16.msra.mxu1 %v4128_v21 }
 0x16c   : > { %1870 = vmatmul.mubr.f32.gmra.mrb[30].mxu1 %v1541_v20  ;;  %4131 = vmatprep.subr.bf16.mxu1 %v4130_v52 }
 0x16f   : > { %4133 = vmatpush1.bf16.msra.mxu1 %v4132_v39 }
 0x170   : > { %4135 = vmatprep.subr.bf16.mxu1 %v4134_v15 }
 0x173   : > { %4137 = vmatpush1.bf16.msra.mxu1 %v4136_v49 }
 0x174   : > { %4139 = vmatprep.subr.bf16.mxu1 %v4138_v8 }
 0x177   : > { %4141 = vmatpush1.bf16.msra.mxu1 %v4140_v12 }
 0x178   : > { %4143 = vmatprep.subr.bf16.mxu1 %v4142_v1 }
 0x17b   : > { %4145 = vmatpush1.bf16.msra.mxu1 %v4144_v24 }
 0x17c   : > { %4147 = vmatprep.subr.bf16.mxu1 %v4146_v62 }
 0x17f   : > { %4149 = vmatpush1.bf16.msra.mxu1 %v4148_v53 }
 0x180   : > { %4151 = vmatprep.subr.bf16.mxu1 %v4150_v16 }
 0x183   : > { %4153 = vmatpush1.bf16.msra.mxu1 %v4152_v63 }
 0x184   : > { %4155 = vmatprep.subr.bf16.mxu1 %v4154_v17 }
 0x187   : > { %4157 = vmatpush1.bf16.msra.mxu1 %v4156_v40 }
 0x188   : > { %4159 = vmatprep.subr.bf16.mxu1 %v4158_v41 }
 0x18b   : > { %4161 = vmatpush1.bf16.msra.mxu1 %v4160_v43 }
 0x1a9   : > { %v1685_v44 = vpop.f32.mrb[0].mxu0 }
 0x1aa   : > { %v1686_v27 = vadd.f32 %v1685_v44, %v6029_v14  ;;  %v1687_v48 = vpop.f32.mrb[1].mxu0 }
 0x1ab   : > { %v1688_v55 = vadd.f32 %v1687_v48, %v6032_v42 }
 0x1ac   : > { %v1940_v33 = vmin.f32 %v1686_v27, 0.0  ;;  %v1876_v12 = vmax.f32 %v1686_v27, 0.0 }
 0x1ad   : > { %v1941_v46 = vmin.f32 %v1688_v55, 0.0  ;;  %v1691_v0 = vpop.f32.mrb[2].mxu0  ;;  %v1877_v4 = vmax.f32 %v1688_v55, 0.0 }
 0x1ae   : > { %v2004_v58 = vmul.f32 1.442695, %v1940_v33  ;;  %v1692_v23 = vadd.f32 %v1691_v0, %v6029_v14  ;;  %v1693_v26 = vpop.f32.mrb[3].mxu0 }
 0x1af   : > { %v2006_v31 = vmul.f32 1.442695, %v1941_v46  ;;  %v1694_v20 = vadd.f32 %v1693_v26, %v6032_v42 }
 0x1b0   : > { %4410 = vpow2.f32 %v2004_v58  ;;  %v1942_v21 = vmin.f32 %v1692_v23, 0.0  ;;  %v1878_v38 = vmax.f32 %v1692_v23, 0.0 }
 0x1b1   : > { %4412 = vpow2.f32 %v2006_v31  ;;  %v1943_v52 = vmin.f32 %v1694_v20, 0.0  ;;  %v1697_v57 = vpop.f32.mrb[4].mxu0  ;;  %v1879_v35 = vmax.f32 %v1694_v20, 0.0 }
 0x1b2   : > { %v2008_v13 = vmul.f32 1.442695, %v1942_v21  ;;  %v1698_v19 = vadd.f32 %v1697_v57, %v6029_v14  ;;  %v1699_v56 = vpop.f32.mrb[5].mxu0 }
 0x1b3   : > { %v2010_v39 = vmul.f32 1.442695, %v1943_v52  ;;  %v1700_v15 = vadd.f32 %v1699_v56, %v6032_v42 }
 0x1b4   : > { %4414 = vpow2.f32 %v2008_v13  ;;  %v1944_v32 = vmin.f32 %v1698_v19, 0.0  ;;  %v1880_v59 = vmax.f32 %v1698_v19, 0.0 }
 0x1b5   : > { %4416 = vpow2.f32 %v2010_v39  ;;  %v1945_v29 = vmin.f32 %v1700_v15, 0.0  ;;  %v1881_v34 = vmax.f32 %v1700_v15, 0.0 }
 0x1b6   : > { %v2012_v11 = vmul.f32 1.442695, %v1944_v32 }
 0x1b7   : > { %v2014_v51 = vmul.f32 1.442695, %v1945_v29 }
 0x1b8   : > { %4418 = vpow2.f32 %v2012_v11 }
 0x1b9   : > { %4420 = vpow2.f32 %v2014_v51  ;;  %v1703_v7 = vpop.f32.mrb[6].mxu0 }
 0x1ba   : > { %v4411_v49 = vpop.eup %4410  ;;  %v6041_v1 = vadd.f32 %v1703_v7, %v6029_v14  ;;  %v1705_v10 = vpop.f32.mrb[7].mxu0 }
 0x1bb   : > { %v4413_v8 = vpop.eup %4412  ;;  %v2132_v22 = vmul.f32 1.6732632, %v4411_v49  ;;  %v6044_v30 = vadd.f32 %v1705_v10, %v6032_v42 }
 0x1bc   : > { %v2133_v60 = vmul.f32 1.6732632, %v4413_v8  ;;  %v1946_v18 = vmin.f32 %v6041_v1, 0.0  ;;  %v1882_v29 = vmax.f32 %v6041_v1, 0.0 }
 0x1bd   : > { %v2196_v62 = vadd.f32 %v2132_v22, %v1876_v12  ;;  %v1947_v50 = vmin.f32 %v6044_v30, 0.0  ;;  %v1709_v53 = vpop.f32.mrb[8].mxu0  ;;  %v1883_v39 = vmax.f32 %v6044_v30, 0.0 }
 0x1be   : > { %v4415_v25 = vpop.eup %4414  ;;  %v2197_v5 = vadd.f32 %v2133_v60, %v1877_v4  ;;  %v2016_v28 = vmul.f32 1.442695, %v1946_v18  ;;  %v6049_v2 = vadd.f32 %v1709_v53, %v6029_v14  ;;  %v1711_v47 = vpop.f32.mrb[9].mxu0 }
 0x1bf   : > { %v4417_v24 = vpop.eup %4416  ;;  %v2134_v9 = vmul.f32 1.6732632, %v4415_v25  ;;  %v2018_v17 = vmul.f32 1.442695, %v1947_v50  ;;  %v6052_v6 = vadd.f32 %v1711_v47, %v6032_v42 }
 0x1c0   : > { %2400 = vmatprep.mubr.f32.mxu1 %v2197_v5  ;;  %v2135_v16 = vmul.f32 1.6732632, %v4417_v24  ;;  %4422 = vpow2.f32 %v2016_v28  ;;  %v1948_v61 = vmin.f32 %v6049_v2, 0.0 }
 0x1c1   : > { %2401 = vmatmul.mubr.f32.vlgmr.msra.gmra.mrb[32].mxu1 %v2196_v62  ;;  %v2198_v40 = vadd.f32 %v2134_v9, %v1878_v38  ;;  %4424 = vpow2.f32 %v2018_v17  ;;  %v1949_v3 = vmin.f32 %v6052_v6, 0.0  ;;  %v1885_v30 = vmax.f32 %v6052_v6, 0.0 }
 0x1c2   : > { %v4419_v63 = vpop.eup %4418  ;;  %v2199_v45 = vadd.f32 %v2135_v16, %v1879_v35  ;;  %v2020_v44 = vmul.f32 1.442695, %v1948_v61  ;;  %v1884_v62 = vmax.f32 %v6049_v2, 0.0 }
 0x1c3   : > { %v4421_v54 = vpop.eup %4420  ;;  %v2136_v41 = vmul.f32 1.6732632, %v4419_v63  ;;  %v2022_v27 = vmul.f32 1.442695, %v1949_v3 }
 0x1c4   : > { %2406 = vmatprep.mubr.f32.mxu1 %v2199_v45  ;;  %v2137_v43 = vmul.f32 1.6732632, %v4421_v54  ;;  %4426 = vpow2.f32 %v2020_v44  ;;  %v2977_v44 = vld [vmem:[#allocation3] sm:$0xff] }
 0x1c5   : > { %2407 = vmatmul.mubr.f32.gmra.mrb[34].mxu1 %v2198_v40  ;;  %v1715_v55 = vpop.f32.mrb[10].mxu0  ;;  %v2200_v33 = vadd.f32 %v2136_v41, %v1880_v59  ;;  %4428 = vpow2.f32 %v2022_v27  ;;  %v2978_v41 = vld [vmem:[#allocation3 + $0x8] sm:$0xff]  ;;  %v2979_v27 = vld [vmem:[#allocation3 + $0x10] sm:$0xff] }
 0x1c6   : > { %v2201_v48 = vadd.f32 %v2137_v43, %v1881_v34  ;;  %v6057_v46 = vadd.f32 %v1715_v55, %v6029_v14  ;;  %v1717_v0 = vpop.f32.mrb[11].mxu0  ;;  %v2980_v34 = vld [vmem:[#allocation3 + $0x18] sm:$0xff] }
 0x1c7   : > { %v6060_v58 = vadd.f32 %v1717_v0, %v6032_v42  ;;  %v4162_v59 = vpack.c.bf16 %v2980_v34, %v2978_v41  ;;  %v2984_v0 = vld [vmem:[#allocation3 + $0x38] sm:$0xff] }
 0x1c8   : > { %2412 = vmatprep.mubr.f32.mxu1 %v2201_v48  ;;  %v1950_v23 = vmin.f32 %v6057_v46, 0.0  ;;  %v1886_v17 = vmax.f32 %v6057_v46, 0.0  ;;  %v2982_v46 = vld [vmem:[#allocation3 + $0x28] sm:$0xff] }
 0x1c9   : > { %2413 = vmatmul.mubr.f32.gmra.mrb[36].mxu1 %v2200_v33  ;;  %v1951_v26 = vmin.f32 %v6060_v58, 0.0  ;;  %v1887_v54 = vmax.f32 %v6060_v58, 0.0  ;;  %v4164_v33 = vpack.c.bf16 %v2979_v27, %v2977_v44  ;;  %4163 = vmatprep.subr.bf16.mxu0 %v4162_v59 }
 0x1ca   : > { %v2024_v31 = vmul.f32 1.442695, %v1950_v23  ;;  %v4423_v20 = vpop.eup %4422  ;;  %v2981_v23 = vld [vmem:[#allocation3 + $0x20] sm:$0xff] }
 0x1cb   : > { %v2026_v21 = vmul.f32 1.442695, %v1951_v26  ;;  %v1721_v52 = vpop.f32.mrb[12].mxu0  ;;  %v4425_v57 = vpop.eup %4424  ;;  %v2138_v56 = vmul.f32 1.6732632, %v4423_v20  ;;  %v4166_v20 = vpack.c.bf16 %v2984_v0, %v2982_v46  ;;  %4165 = vmatpush1.bf16.msra.mxu0 %v4164_v33  ;;  %v2993_v0 = vld [vmem:[#allocation3 + $0x80] sm:$0xff] }
 0x1cc   : > { %4430 = vpow2.f32 %v2024_v31  ;;  %v6065_v13 = vadd.f32 %v1721_v52, %v6029_v14  ;;  %v1723_v19 = vpop.f32.mrb[13].mxu0  ;;  %v2139_v32 = vmul.f32 1.6732632, %v4425_v57  ;;  %v2986_v52 = vld [vmem:[#allocation3 + $0x48] sm:$0xff]  ;;  %v2988_v57 = vld [vmem:[#allocation3 + $0x58] sm:$0xff] }
 0x1cd   : > { %4432 = vpow2.f32 %v2026_v21  ;;  %v6069_v15 = vadd.f32 %v1723_v19, %v6032_v42  ;;  %v2202_v10 = vadd.f32 %v2138_v56, %v1882_v29  ;;  %v2983_v21 = vld [vmem:[#allocation3 + $0x30] sm:$0xff]  ;;  %4167 = vmatprep.subr.bf16.mxu0 %v4166_v20 }
 0x1ce   : > { %v1952_v11 = vmin.f32 %v6065_v13, 0.0  ;;  %v4427_v51 = vpop.eup %4426  ;;  %v2203_v22 = vadd.f32 %v2139_v32, %v1883_v39  ;;  %v4168_v39 = vpack.c.bf16 %v2983_v21, %v2981_v23  ;;  %v2995_v23 = vld [vmem:[#allocation3 + $0x90] sm:$0xff]  ;;  %v2998_v21 = vld [vmem:[#allocation3 + $0xa8] sm:$0xff] }
 0x1cf   : > { %v1953_v49 = vmin.f32 %v6069_v15, 0.0  ;;  %v1727_v8 = vpop.f32.mrb[14].mxu0  ;;  %v4429_v4 = vpop.eup %4428  ;;  %v2140_v25 = vmul.f32 1.6732632, %v4427_v51  ;;  %v2985_v51 = vld [vmem:[#allocation3 + $0x40] sm:$0xff] }
 0x1d0   : > { %v2028_v7 = vmul.f32 1.442695, %v1952_v11  ;;  %v6075_v60 = vadd.f32 %v1727_v8, %v6029_v14  ;;  %v1729_v12 = vpop.f32.mrb[15].mxu0  ;;  %2418 = vmatprep.mubr.f32.mxu1 %v2203_v22  ;;  %v2141_v24 = vmul.f32 1.6732632, %v4429_v4  ;;  %v4170_v11 = vpack.c.bf16 %v2988_v57, %v2986_v52  ;;  %4169 = vmatpush1.bf16.msra.mxu0 %v4168_v39  ;;  %v3000_v52 = vld [vmem:[#allocation3 + $0xb8] sm:$0xff] }
 0x1d1   : > { %v2030_v5 = vmul.f32 1.442695, %v1953_v49  ;;  %v6079_v1 = vadd.f32 %v1729_v12, %v6032_v42  ;;  %2419 = vmatmul.mubr.f32.gmra.mrb[38].mxu1 %v2202_v10  ;;  %v2204_v28 = vadd.f32 %v2140_v25, %v1884_v62  ;;  %v2987_v49 = vld [vmem:[#allocation3 + $0x50] sm:$0xff]  ;;  %v2992_v12 = vld [vmem:[#allocation3 + $0x78] sm:$0xff]  ;;  %v1889_v10 = vmax.f32 %v6069_v15, 0.0 }
 0x1d2   : > { %4434 = vpow2.f32 %v2028_v7  ;;  %v1954_v18 = vmin.f32 %v6075_v60, 0.0  ;;  %v2205_v50 = vadd.f32 %v2141_v24, %v1885_v30  ;;  %v2990_v7 = vld [vmem:[#allocation3 + $0x68] sm:$0xff]  ;;  %v1888_v24 = vmax.f32 %v6065_v13, 0.0  ;;  %4171 = vmatprep.subr.bf16.mxu0 %v4170_v11 }
 0x1d3   : > { %4436 = vpow2.f32 %v2030_v5  ;;  %v1955_v9 = vmin.f32 %v6079_v1, 0.0  ;;  %v1733_v35 = vpop.f32.mrb[16].mxu0  ;;  %v4174_v15 = vpack.c.bf16 %v2992_v12, %v2990_v7  ;;  %v2997_v7 = vld [vmem:[#allocation3 + $0xa0] sm:$0xff]  ;;  %v2999_v12 = vld [vmem:[#allocation3 + $0xb0] sm:$0xff] }
 0x1d4   : > { %v2032_v53 = vmul.f32 1.442695, %v1954_v18  ;;  %v6085_v16 = vadd.f32 %v1733_v35, %v6029_v14  ;;  %v1735_v38 = vpop.f32.mrb[17].mxu0  ;;  %2424 = vmatprep.mubr.f32.mxu1 %v2205_v50  ;;  %v4172_v35 = vpack.c.bf16 %v2987_v49, %v2985_v51  ;;  %v4180_v51 = vpack.c.bf16 %v2995_v23, %v2993_v0  ;;  %v3010_v23 = vld [vmem:[#allocation3 + $0x108] sm:$0xff] }
 0x1d5   : > { %v2034_v47 = vmul.f32 1.442695, %v1955_v9  ;;  %v6088_v63 = vadd.f32 %v1735_v38, %v6032_v42  ;;  %2425 = vmatmul.mubr.f32.gmra.mrb[40].mxu1 %v2204_v28  ;;  %v2989_v28 = vld [vmem:[#allocation3 + $0x60] sm:$0xff] }
 0x1d6   : > { %v4431_v2 = vpop.eup %4430  ;;  %4438 = vpow2.f32 %v2032_v53  ;;  %v1956_v6 = vmin.f32 %v6085_v16, 0.0  ;;  %4173 = vmatpush1.bf16.msra.mxu0 %v4172_v35 }
 0x1d7   : > { %v4433_v45 = vpop.eup %4432  ;;  %4440 = vpow2.f32 %v2034_v47  ;;  %v1957_v61 = vmin.f32 %v6088_v63, 0.0  ;;  %v2142_v40 = vmul.f32 1.6732632, %v4431_v2  ;;  %v2991_v47 = vld [vmem:[#allocation3 + $0x70] sm:$0xff]  ;;  %4175 = vmatprep.subr.bf16.mxu0 %v4174_v15  ;;  %v1893_v57 = vmax.f32 %v6088_v63, 0.0  ;;  %v3001_v15 = vld [vmem:[#allocation3 + $0xc0] sm:$0xff] }
 0x1d8   : > { %v2036_v3 = vmul.f32 1.442695, %v1956_v6  ;;  %v2143_v43 = vmul.f32 1.6732632, %v4433_v45  ;;  %v2994_v45 = vld [vmem:[#allocation3 + $0x88] sm:$0xff]  ;;  %v4176_v27 = vpack.c.bf16 %v2991_v47, %v2989_v28  ;;  %v4182_v63 = vpack.c.bf16 %v3000_v52, %v2998_v21 }
 0x1d9   : > { %v2038_v48 = vmul.f32 1.442695, %v1957_v61  ;;  %v1739_v55 = vpop.f32.mrb[18].mxu0  ;;  %v2206_v56 = vadd.f32 %v2142_v40, %v1886_v17  ;;  %v1891_v61 = vmax.f32 %v6079_v1, 0.0 }
 0x1da   : > { %4442 = vpow2.f32 %v2036_v3  ;;  %v6095_v58 = vadd.f32 %v1739_v55, %v6029_v14  ;;  %v1741_v26 = vpop.f32.mrb[19].mxu0  ;;  %v2207_v31 = vadd.f32 %v2143_v43, %v1887_v54  ;;  %v2996_v54 = vld [vmem:[#allocation3 + $0x98] sm:$0xff]  ;;  %v1890_v3 = vmax.f32 %v6075_v60, 0.0  ;;  %4177 = vmatpush1.bf16.msra.mxu0 %v4176_v27 }
 0x1db   : > { %4444 = vpow2.f32 %v2038_v48  ;;  %v6098_v19 = vadd.f32 %v1741_v26, %v6032_v42  ;;  %v4178_v46 = vpack.c.bf16 %v2996_v54, %v2994_v45 }
 0x1dc   : > { %v4435_v32 = vpop.eup %4434  ;;  %v1958_v29 = vmin.f32 %v6095_v58, 0.0  ;;  %2430 = vmatprep.mubr.f32.mxu1 %v2207_v31 }
 0x1dd   : > { %v4437_v8 = vpop.eup %4436  ;;  %v1959_v22 = vmin.f32 %v6098_v19, 0.0  ;;  %2431 = vmatmul.mubr.f32.gmra.mrb[42].mxu1 %v2206_v56  ;;  %v2144_v4 = vmul.f32 1.6732632, %v4435_v32  ;;  %v1892_v32 = vmax.f32 %v6085_v16, 0.0  ;;  %4179 = vmatprep.subr.bf16.mxu0 %v4178_v46 }
 0x1de   : > { %v2040_v25 = vmul.f32 1.442695, %v1958_v29  ;;  %v1745_v30 = vpop.f32.mrb[20].mxu0  ;;  %v2145_v5 = vmul.f32 1.6732632, %v4437_v8  ;;  %4181 = vmatpush1.bf16.msra.mxu0 %v4180_v51 }
 0x1df   : > { %v2042_v62 = vmul.f32 1.442695, %v1959_v22  ;;  %v6105_v18 = vadd.f32 %v1745_v30, %v6029_v14  ;;  %v1747_v9 = vpop.f32.mrb[21].mxu0  ;;  %v2208_v17 = vadd.f32 %v2144_v4, %v1888_v24  ;;  %v3004_v30 = vld [vmem:[#allocation3 + $0xd8] sm:$0xff]  ;;  %4183 = vmatprep.subr.bf16.mxu0 %v4182_v63  ;;  %v3009_v63 = vld [vmem:[#allocation3 + $0x100] sm:$0xff] }
 0x1e0   : > { %v4439_v50 = vpop.eup %4438  ;;  %4446 = vpow2.f32 %v2040_v25  ;;  %v6108_v53 = vadd.f32 %v1747_v9, %v6032_v42  ;;  %v2209_v38 = vadd.f32 %v2145_v5, %v1889_v10  ;;  %v3002_v25 = vld [vmem:[#allocation3 + $0xc8] sm:$0xff]  ;;  %v1895_v9 = vmax.f32 %v6098_v19, 0.0 }
 0x1e1   : > { %v4441_v2 = vpop.eup %4440  ;;  %4448 = vpow2.f32 %v2042_v62  ;;  %v1960_v13 = vmin.f32 %v6105_v18, 0.0  ;;  %v2146_v6 = vmul.f32 1.6732632, %v4439_v50  ;;  %v1896_v52 = vmax.f32 %v6105_v18, 0.0 }
 0x1e2   : > { %v1961_v40 = vmin.f32 %v6108_v53, 0.0  ;;  %v1751_v41 = vpop.f32.mrb[22].mxu0  ;;  %2436 = vmatprep.mubr.f32.mxu1 %v2209_v38  ;;  %v2147_v34 = vmul.f32 1.6732632, %v4441_v2  ;;  %v4184_v38 = vpack.c.bf16 %v2999_v12, %v2997_v7  ;;  %v3011_v7 = vld [vmem:[#allocation3 + $0x110] sm:$0xff] }
 0x1e3   : > { %v2044_v43 = vmul.f32 1.442695, %v1960_v13  ;;  %v6115_v59 = vadd.f32 %v1751_v41, %v6029_v14  ;;  %v1753_v44 = vpop.f32.mrb[23].mxu0  ;;  %2437 = vmatmul.mubr.f32.gmra.mrb[44].mxu1 %v2208_v17  ;;  %v2210_v31 = vadd.f32 %v2146_v6, %v1890_v3  ;;  %v4186_v13 = vpack.c.bf16 %v3004_v30, %v3002_v25  ;;  %v3003_v17 = vld [vmem:[#allocation3 + $0xd0] sm:$0xff]  ;;  %v3014_v30 = vld [vmem:[#allocation3 + $0x128] sm:$0xff] }
 0x1e4   : > { %v4443_v48 = vpop.eup %4442  ;;  %v2046_v55 = vmul.f32 1.442695, %v1961_v40  ;;  %v6118_v33 = vadd.f32 %v1753_v44, %v6032_v42  ;;  %v2211_v1 = vadd.f32 %v2147_v34, %v1891_v61  ;;  %v1894_v6 = vmax.f32 %v6095_v58, 0.0  ;;  %v3006_v61 = vld [vmem:[#allocation3 + $0xe8] sm:$0xff]  ;;  %v3008_v40 = vld [vmem:[#allocation3 + $0xf8] sm:$0xff]  ;;  %4185 = vmatpush1.bf16.msra.mxu0 %v4184_v38  ;;  %v3005_v58 = vld [vmem:[#allocation3 + $0xe0] sm:$0xff] }
 0x1e5   : > { %v4445_v26 = vpop.eup %4444  ;;  %4450 = vpow2.f32 %v2044_v43  ;;  %v1962_v60 = vmin.f32 %v6115_v59, 0.0  ;;  %v2148_v20 = vmul.f32 1.6732632, %v4443_v48  ;;  %v4188_v27 = vpack.c.bf16 %v3003_v17, %v3001_v15  ;;  %v3007_v48 = vld [vmem:[#allocation3 + $0xf0] sm:$0xff]  ;;  %4187 = vmatprep.subr.bf16.mxu0 %v4186_v13 }
 0x1e6   : > { %4452 = vpow2.f32 %v2046_v55  ;;  %v1963_v56 = vmin.f32 %v6118_v33, 0.0  ;;  %2442 = vmatprep.mubr.f32.mxu1 %v2211_v1  ;;  %v2149_v39 = vmul.f32 1.6732632, %v4445_v26  ;;  %v4190_v0 = vpack.c.bf16 %v3008_v40, %v3006_v61  ;;  %v3012_v26 = vld [vmem:[#allocation3 + $0x118] sm:$0xff] }
 0x1e7   : > { %v2048_v29 = vmul.f32 1.442695, %v1962_v60  ;;  %v1757_v11 = vpop.f32.mrb[24].mxu0  ;;  %2443 = vmatmul.mubr.f32.gmra.mrb[46].mxu1 %v2210_v31  ;;  %v2212_v16 = vadd.f32 %v2148_v20, %v1892_v32  ;;  %v1897_v60 = vmax.f32 %v6108_v53, 0.0  ;;  %v4192_v32 = vpack.c.bf16 %v3007_v48, %v3005_v58 }
 0x1e8   : > { %v2050_v49 = vmul.f32 1.442695, %v1963_v56  ;;  %v6125_v8 = vadd.f32 %v1757_v11, %v6029_v14  ;;  %v1759_v22 = vpop.f32.mrb[25].mxu0  ;;  %v2213_v4 = vadd.f32 %v2149_v39, %v1893_v57  ;;  %4189 = vmatpush1.bf16.msra.mxu0 %v4188_v27  ;;  %v4194_v53 = vpack.c.bf16 %v3012_v26, %v3010_v23 }
 0x1e9   : > { %4454 = vpow2.f32 %v2048_v29  ;;  %v6128_v10 = vadd.f32 %v1759_v22, %v6032_v42  ;;  %4191 = vmatprep.subr.bf16.mxu0 %v4190_v0  ;;  %v1899_v12 = vmax.f32 %v6118_v33, 0.0  ;;  %v3013_v33 = vld [vmem:[#allocation3 + $0x120] sm:$0xff] }
 0x1ea   : > { %v4447_v5 = vpop.eup %4446  ;;  %4456 = vpow2.f32 %v2050_v49  ;;  %v1964_v24 = vmin.f32 %v6125_v8, 0.0  ;;  %2448 = vmatprep.mubr.f32.mxu1 %v2213_v4 }
 0x1eb   : > { %v4449_v62 = vpop.eup %4448  ;;  %v1965_v35 = vmin.f32 %v6128_v10, 0.0  ;;  %2449 = vmatmul.mubr.f32.gmra.mrb[48].mxu1 %v2212_v16  ;;  %v2150_v50 = vmul.f32 1.6732632, %v4447_v5  ;;  %v3016_v5 = vld [vmem:[#allocation3 + $0x138] sm:$0xff] }
 0x1ec   : > { %v2052_v28 = vmul.f32 1.442695, %v1964_v24  ;;  %v1763_v47 = vpop.f32.mrb[26].mxu0  ;;  %v2151_v2 = vmul.f32 1.6732632, %v4449_v62  ;;  %v1898_v24 = vmax.f32 %v6115_v59, 0.0  ;;  %4193 = vmatpush1.bf16.msra.mxu0 %v4192_v32 }
 0x1ed   : > { %v2054_v45 = vmul.f32 1.442695, %v1965_v35  ;;  %v6135_v54 = vadd.f32 %v1763_v47, %v6029_v14  ;;  %v1765_v19 = vpop.f32.mrb[27].mxu0  ;;  %v2214_v44 = vadd.f32 %v2150_v50, %v1894_v6  ;;  %v4196_v50 = vpack.c.bf16 %v3011_v7, %v3009_v63  ;;  %4195 = vmatprep.subr.bf16.mxu0 %v4194_v53  ;;  %v3015_v47 = vld [vmem:[#allocation3 + $0x130] sm:$0xff]  ;;  %v3018_v6 = vld [vmem:[#allocation3 + $0x148] sm:$0xff]  ;;  %v3020_v59 = vld [vmem:[#allocation3 + $0x158] sm:$0xff] }
 0x1ee   : > { %4458 = vpow2.f32 %v2052_v28  ;;  %v6138_v41 = vadd.f32 %v1765_v19, %v6032_v42  ;;  %v2215_v34 = vadd.f32 %v2151_v2, %v1895_v9  ;;  %v4198_v28 = vpack.c.bf16 %v3016_v5, %v3014_v30 }
 0x1ef   : > { %v4451_v3 = vpop.eup %4450  ;;  %4460 = vpow2.f32 %v2054_v45  ;;  %v1966_v43 = vmin.f32 %v6135_v54, 0.0  ;;  %v1901_v45 = vmax.f32 %v6128_v10, 0.0  ;;  %v4202_v58 = vpack.c.bf16 %v3020_v59, %v3018_v6 }
 0x1f0   : > { %v4453_v55 = vpop.eup %4452  ;;  %v1967_v1 = vmin.f32 %v6138_v41, 0.0  ;;  %2454 = vmatprep.mubr.f32.mxu1 %v2215_v34  ;;  %v2152_v46 = vmul.f32 1.6732632, %v4451_v3  ;;  %v1900_v34 = vmax.f32 %v6125_v8, 0.0  ;;  %4197 = vmatpush1.bf16.msra.mxu0 %v4196_v50 }
 0x1f1   : > { %v2056_v31 = vmul.f32 1.442695, %v1966_v43  ;;  %v1769_v20 = vpop.f32.mrb[28].mxu0  ;;  %2455 = vmatmul.mubr.f32.gmra.mrb[50].mxu1 %v2214_v44  ;;  %v2153_v21 = vmul.f32 1.6732632, %v4453_v55  ;;  %v4200_v43 = vpack.c.bf16 %v3015_v47, %v3013_v33  ;;  %4199 = vmatprep.subr.bf16.mxu0 %v4198_v28 }
 0x1f2   : > { %v2058_v57 = vmul.f32 1.442695, %v1967_v1  ;;  %v6145_v56 = vadd.f32 %v1769_v20, %v6029_v14  ;;  %v1771_v39 = vpop.f32.mrb[29].mxu0  ;;  %v2216_v4 = vadd.f32 %v2152_v46, %v1896_v52  ;;  %v1902_v52 = vmax.f32 %v6135_v54, 0.0 }
 0x1f3   : > { %v4455_v29 = vpop.eup %4454  ;;  %4462 = vpow2.f32 %v2056_v31  ;;  %v6148_v11 = vadd.f32 %v1771_v39, %v6032_v42  ;;  %v2217_v51 = vadd.f32 %v2153_v21, %v1897_v60  ;;  %v1903_v60 = vmax.f32 %v6138_v41, 0.0 }
 0x1f4   : > { %v4457_v49 = vpop.eup %4456  ;;  %4464 = vpow2.f32 %v2058_v57  ;;  %v1968_v22 = vmin.f32 %v6145_v56, 0.0  ;;  %v2154_v18 = vmul.f32 1.6732632, %v4455_v29  ;;  %4201 = vmatpush1.bf16.msra.mxu0 %v4200_v43 }
 0x1f5   : > { %v1969_v16 = vmin.f32 %v6148_v11, 0.0  ;;  %2460 = vmatprep.mubr.f32.mxu1 %v2217_v51  ;;  %v2155_v25 = vmul.f32 1.6732632, %v4457_v49  ;;  %4203 = vmatprep.subr.bf16.mxu0 %v4202_v58  ;;  %v1905_v7 = vmax.f32 %v6148_v11, 0.0 }
 0x1f6   : > { %v2060_v62 = vmul.f32 1.442695, %v1968_v22  ;;  %2461 = vmatmul.mubr.f32.gmra.mrb[52].mxu1 %v2216_v4  ;;  %v2218_v15 = vadd.f32 %v2154_v18, %v1898_v24 }
 0x1f7   : > { %v2062_v9 = vmul.f32 1.442695, %v1969_v16  ;;  %v2219_v35 = vadd.f32 %v2155_v25, %v1899_v12  ;;  %v1904_v25 = vmax.f32 %v6145_v56, 0.0 }
 0x1f8   : > { %v4459_v38 = vpop.eup %4458  ;;  %4466 = vpow2.f32 %v2060_v62 }
 0x1f9   : > { %v4461_v2 = vpop.eup %4460  ;;  %4468 = vpow2.f32 %v2062_v9  ;;  %v1775_v13 = vpop.f32.mrb[30].mxu0  ;;  %2466 = vmatprep.mubr.f32.mxu1 %v2219_v35  ;;  %v2156_v17 = vmul.f32 1.6732632, %v4459_v38 }
 0x1fa   : > { %v6156_v19 = vadd.f32 %v1775_v13, %v6029_v14  ;;  %v1777_v61 = vpop.f32.mrb[31].mxu0  ;;  %2467 = vmatmul.mubr.f32.gmra.mrb[54].mxu1 %v2218_v15  ;;  %v2157_v40 = vmul.f32 1.6732632, %v4461_v2 }
 0x1fb   : > { %v6160_v3 = vadd.f32 %v1777_v61, %v6032_v42  ;;  %v2220_v1 = vadd.f32 %v2156_v17, %v1900_v34 }
 0x1fc   : > { %v1970_v44 = vmin.f32 %v6156_v19, 0.0  ;;  %v2221_v27 = vadd.f32 %v2157_v40, %v1901_v45  ;;  %v1906_v43 = vmax.f32 %v6156_v19, 0.0 }
 0x1fd   : > { %v4463_v48 = vpop.eup %4462  ;;  %v1781_v10 = vpop.f32.mrb[0].mxu1  ;;  %v1971_v55 = vmin.f32 %v6160_v3, 0.0  ;;  %v1907_v61 = vmax.f32 %v6160_v3, 0.0 }
 0x1fe   : > { %v4465_v46 = vpop.eup %4464  ;;  %v2064_v0 = vmul.f32 1.442695, %v1970_v44  ;;  %v6165_v23 = vadd.f32 %v1781_v10, %v6029_v14  ;;  %v1783_v8 = vpop.f32.mrb[1].mxu1  ;;  %2472 = vmatprep.mubr.f32.mxu1 %v2221_v27  ;;  %v2158_v26 = vmul.f32 1.6732632, %v4463_v48 }
 0x1ff   : > { %v2066_v31 = vmul.f32 1.442695, %v1971_v55  ;;  %v6169_v20 = vadd.f32 %v1783_v8, %v6032_v42  ;;  %2473 = vmatmul.mubr.f32.gmra.mrb[56].mxu1 %v2220_v1  ;;  %v2159_v21 = vmul.f32 1.6732632, %v4465_v46 }
 0x200   : > { %4470 = vpow2.f32 %v2064_v0  ;;  %v1972_v57 = vmin.f32 %v6165_v23, 0.0  ;;  %v2222_v22 = vadd.f32 %v2158_v26, %v1902_v52 }
 0x201   : > { %4472 = vpow2.f32 %v2066_v31  ;;  %v1973_v39 = vmin.f32 %v6169_v20, 0.0  ;;  %v1787_v32 = vpop.f32.mrb[2].mxu1  ;;  %v2223_v29 = vadd.f32 %v2159_v21, %v1903_v60  ;;  %v1909_v8 = vmax.f32 %v6169_v20, 0.0 }
 0x202   : > { %v4467_v51 = vpop.eup %4466  ;;  %v2068_v41 = vmul.f32 1.442695, %v1972_v57  ;;  %v6175_v53 = vadd.f32 %v1787_v32, %v6029_v14  ;;  %v1789_v49 = vpop.f32.mrb[3].mxu1  ;;  %v1908_v60 = vmax.f32 %v6165_v23, 0.0 }
 0x203   : > { %v4469_v4 = vpop.eup %4468  ;;  %v2070_v18 = vmul.f32 1.442695, %v1973_v39  ;;  %v6178_v54 = vadd.f32 %v1789_v49, %v6032_v42  ;;  %2478 = vmatprep.mubr.f32.mxu1 %v2223_v29  ;;  %v2160_v63 = vmul.f32 1.6732632, %v4467_v51 }
 0x204   : > { %4474 = vpow2.f32 %v2068_v41  ;;  %v1974_v12 = vmin.f32 %v6175_v53, 0.0  ;;  %2479 = vmatmul.mubr.f32.gmra.mrb[58].mxu1 %v2222_v22  ;;  %v2161_v16 = vmul.f32 1.6732632, %v4469_v4  ;;  %v1910_v22 = vmax.f32 %v6175_v53, 0.0 }
 0x205   : > { %4476 = vpow2.f32 %v2070_v18  ;;  %v1975_v30 = vmin.f32 %v6178_v54, 0.0  ;;  %v1793_v5 = vpop.f32.mrb[4].mxu1  ;;  %v2224_v38 = vadd.f32 %v2160_v63, %v1904_v25  ;;  %v1911_v51 = vmax.f32 %v6178_v54, 0.0 }
 0x206   : > { %v2072_v24 = vmul.f32 1.442695, %v1974_v12  ;;  %v6185_v62 = vadd.f32 %v1793_v5, %v6029_v14  ;;  %v1795_v9 = vpop.f32.mrb[5].mxu1  ;;  %v2225_v35 = vadd.f32 %v2161_v16, %v1905_v7 }
 0x207   : > { %v2074_v50 = vmul.f32 1.442695, %v1975_v30  ;;  %v6188_v11 = vadd.f32 %v1795_v9, %v6032_v42 }
 0x208   : > { %4478 = vpow2.f32 %v2072_v24  ;;  %v1976_v15 = vmin.f32 %v6185_v62, 0.0  ;;  %2484 = vmatprep.mubr.f32.mxu1 %v2225_v35 }
 0x209   : > { %4480 = vpow2.f32 %v2074_v50  ;;  %v1977_v56 = vmin.f32 %v6188_v11, 0.0  ;;  %v1799_v28 = vpop.f32.mrb[6].mxu1  ;;  %2485 = vmatmul.mubr.f32.gmra.mrb[60].mxu1 %v2224_v38  ;;  %v1913_v53 = vmax.f32 %v6188_v11, 0.0  ;;  %v1912_v50 = vmax.f32 %v6185_v62, 0.0 }
 0x20a   : > { %v4471_v33 = vpop.eup %4470  ;;  %v2076_v47 = vmul.f32 1.442695, %v1976_v15  ;;  %v6193_v2 = vadd.f32 %v1799_v28, %v6029_v14  ;;  %v1801_v13 = vpop.f32.mrb[7].mxu1 }
 0x20b   : > { %v4473_v17 = vpop.eup %4472  ;;  %v2078_v6 = vmul.f32 1.442695, %v1977_v56  ;;  %v6196_v59 = vadd.f32 %v1801_v13, %v6032_v42  ;;  %v2162_v45 = vmul.f32 1.6732632, %v4471_v33 }
 0x20c   : > { %4482 = vpow2.f32 %v2076_v47  ;;  %v1978_v40 = vmin.f32 %v6193_v2, 0.0  ;;  %v2163_v34 = vmul.f32 1.6732632, %v4473_v17 }
 0x20d   : > { %4484 = vpow2.f32 %v2078_v6  ;;  %v1979_v44 = vmin.f32 %v6196_v59, 0.0  ;;  %v2226_v46 = vadd.f32 %v2162_v45, %v1906_v43  ;;  %v1915_v62 = vmax.f32 %v6196_v59, 0.0 }
 0x20e   : > { %v4475_v27 = vpop.eup %4474  ;;  %v2080_v58 = vmul.f32 1.442695, %v1978_v40  ;;  %v2227_v48 = vadd.f32 %v2163_v34, %v1907_v61  ;;  %v1914_v43 = vmax.f32 %v6193_v2, 0.0 }
 0x20f   : > { %v4477_v10 = vpop.eup %4476  ;;  %v2082_v55 = vmul.f32 1.442695, %v1979_v44  ;;  %v1805_v1 = vpop.f32.mrb[8].mxu1  ;;  %v2164_v0 = vmul.f32 1.6732632, %v4475_v27 }
 0x210   : > { %4486 = vpow2.f32 %v2080_v58  ;;  %v6204_v3 = vadd.f32 %v1805_v1, %v6029_v14  ;;  %v1807_v26 = vpop.f32.mrb[9].mxu1  ;;  %2490 = vmatprep.mubr.f32.mxu1 %v2227_v48  ;;  %v2165_v19 = vmul.f32 1.6732632, %v4477_v10 }
 0x211   : > { %4488 = vpow2.f32 %v2082_v55  ;;  %v6208_v31 = vadd.f32 %v1807_v26, %v6032_v42  ;;  %2491 = vmatmul.mubr.f32.gmra.mrb[62].mxu1 %v2226_v46  ;;  %v2228_v32 = vadd.f32 %v2164_v0, %v1908_v60 }
 0x212   : > { %v4479_v21 = vpop.eup %4478  ;;  %v1980_v52 = vmin.f32 %v6204_v3, 0.0  ;;  %v2229_v57 = vadd.f32 %v2165_v19, %v1909_v8 }
 0x213   : > { %v4481_v39 = vpop.eup %4480  ;;  %v1981_v20 = vmin.f32 %v6208_v31, 0.0  ;;  %v2166_v29 = vmul.f32 1.6732632, %v4479_v21  ;;  %v1917_v19 = vmax.f32 %v6208_v31, 0.0 }
 0x214   : > { %v2084_v41 = vmul.f32 1.442695, %v1980_v52  ;;  %v1811_v49 = vpop.f32.mrb[10].mxu1  ;;  %2496 = vmatprep.mubr.f32.mxu1 %v2229_v57  ;;  %v2167_v23 = vmul.f32 1.6732632, %v4481_v39  ;;  %v1916_v52 = vmax.f32 %v6204_v3, 0.0 }
 0x215   : > { %v2086_v4 = vmul.f32 1.442695, %v1981_v20  ;;  %v6215_v18 = vadd.f32 %v1811_v49, %v6029_v14  ;;  %v1813_v63 = vpop.f32.mrb[11].mxu1  ;;  %2497 = vmatmul.mubr.f32.gmra.mrb[64].mxu1 %v2228_v32  ;;  %v2230_v30 = vadd.f32 %v2166_v29, %v1910_v22  ;;  %v3017_v22 = vld [vmem:[#allocation3 + $0x140] sm:$0xff]  ;;  %v3019_v3 = vld [vmem:[#allocation3 + $0x150] sm:$0xff] }
 0x216   : > { %v4483_v7 = vpop.eup %4482  ;;  %4490 = vpow2.f32 %v2084_v41  ;;  %v6218_v12 = vadd.f32 %v1813_v63, %v6032_v42  ;;  %v2231_v16 = vadd.f32 %v2167_v23, %v1911_v51 }
 0x217   : > { %v4485_v25 = vpop.eup %4484  ;;  %4492 = vpow2.f32 %v2086_v4  ;;  %v1982_v54 = vmin.f32 %v6215_v18, 0.0  ;;  %v2168_v5 = vmul.f32 1.6732632, %v4483_v7 }
 0x218   : > { %v1983_v24 = vmin.f32 %v6218_v12, 0.0  ;;  %v1817_v9 = vpop.f32.mrb[12].mxu1  ;;  %2502 = vmatprep.mubr.f32.mxu1 %v2231_v16  ;;  %v2169_v35 = vmul.f32 1.6732632, %v4485_v25  ;;  %v1919_v4 = vmax.f32 %v6218_v12, 0.0  ;;  %v4204_v25 = vpack.c.bf16 %v3019_v3, %v3017_v22 }
 0x219   : > { %v2088_v38 = vmul.f32 1.442695, %v1982_v54  ;;  %v6225_v15 = vadd.f32 %v1817_v9, %v6029_v14  ;;  %v1819_v56 = vpop.f32.mrb[13].mxu1  ;;  %2503 = vmatmul.mubr.f32.gmra.mrb[66].mxu1 %v2230_v30  ;;  %v2232_v6 = vadd.f32 %v2168_v5, %v1912_v50  ;;  %v3022_v54 = vld [vmem:[#allocation3 + $0x168] sm:$0xff]  ;;  %v1918_v30 = vmax.f32 %v6215_v18, 0.0 }
 0x21a   : > { %v4487_v28 = vpop.eup %4486  ;;  %v2090_v33 = vmul.f32 1.442695, %v1983_v24  ;;  %v6228_v47 = vadd.f32 %v1819_v56, %v6032_v42  ;;  %v2233_v13 = vadd.f32 %v2169_v35, %v1913_v53  ;;  %v3024_v35 = vld [vmem:[#allocation3 + $0x178] sm:$0xff]  ;;  %4205 = vmatpush1.bf16.msra.mxu0 %v4204_v25 }
 0x21b   : > { %v4489_v11 = vpop.eup %4488  ;;  %4494 = vpow2.f32 %v2088_v38  ;;  %v1984_v17 = vmin.f32 %v6225_v15, 0.0  ;;  %v2170_v45 = vmul.f32 1.6732632, %v4487_v28  ;;  %v1920_v5 = vmax.f32 %v6225_v15, 0.0 }
 0x21c   : > { %4496 = vpow2.f32 %v2090_v33  ;;  %v1985_v61 = vmin.f32 %v6228_v47, 0.0  ;;  %v1823_v40 = vpop.f32.mrb[14].mxu1  ;;  %2508 = vmatprep.mubr.f32.mxu1 %v2233_v13  ;;  %v2171_v34 = vmul.f32 1.6732632, %v4489_v11  ;;  %v4206_v28 = vpack.c.bf16 %v3024_v35, %v3022_v54  ;;  %v3021_v33 = vld [vmem:[#allocation3 + $0x160] sm:$0xff]  ;;  %v3023_v13 = vld [vmem:[#allocation3 + $0x170] sm:$0xff] }
 0x21d   : > { %v2092_v44 = vmul.f32 1.442695, %v1984_v17  ;;  %v6235_v27 = vadd.f32 %v1823_v40, %v6029_v14  ;;  %v1825_v58 = vpop.f32.mrb[15].mxu1  ;;  %2509 = vmatmul.mubr.f32.gmra.mrb[68].mxu1 %v2232_v6  ;;  %v2234_v1 = vadd.f32 %v2170_v45, %v1914_v43  ;;  %v3026_v6 = vld [vmem:[#allocation3 + $0x188] sm:$0xff]  ;;  %v3028_v45 = vld [vmem:[#allocation3 + $0x198] sm:$0xff] }
 0x21e   : > { %v2094_v48 = vmul.f32 1.442695, %v1985_v61  ;;  %v6238_v10 = vadd.f32 %v1825_v58, %v6032_v42  ;;  %v2235_v55 = vadd.f32 %v2171_v34, %v1915_v62  ;;  %v1921_v62 = vmax.f32 %v6228_v47, 0.0  ;;  %4207 = vmatprep.subr.bf16.mxu0 %v4206_v28 }
 0x21f   : > { %4498 = vpow2.f32 %v2092_v44  ;;  %v1986_v59 = vmin.f32 %v6235_v27, 0.0 }
 0x220   : > { %v4491_v46 = vpop.eup %4490  ;;  %4500 = vpow2.f32 %v2094_v48  ;;  %v1987_v0 = vmin.f32 %v6238_v10, 0.0  ;;  %2514 = vmatprep.mubr.f32.mxu1 %v2235_v55  ;;  %v1923_v43 = vmax.f32 %v6238_v10, 0.0  ;;  %v4208_v55 = vpack.c.bf16 %v3023_v13, %v3021_v33 }
 0x221   : > { %v4493_v2 = vpop.eup %4492  ;;  %v2096_v8 = vmul.f32 1.442695, %v1986_v59  ;;  %2515 = vmatmul.mubr.f32.gmra.mrb[70].mxu1 %v2234_v1  ;;  %v2172_v26 = vmul.f32 1.6732632, %v4491_v46 }
 0x222   : > { %v2098_v60 = vmul.f32 1.442695, %v1987_v0  ;;  %v2173_v21 = vmul.f32 1.6732632, %v4493_v2  ;;  %v4210_v0 = vpack.c.bf16 %v3028_v45, %v3026_v6  ;;  %v3025_v2 = vld [vmem:[#allocation3 + $0x180] sm:$0xff]  ;;  %4209 = vmatpush1.bf16.msra.mxu0 %v4208_v55 }
 0x223   : > { %4502 = vpow2.f32 %v2096_v8  ;;  %v1829_v57 = vpop.f32.mrb[16].mxu1  ;;  %v2236_v41 = vadd.f32 %v2172_v26, %v1916_v52  ;;  %v3027_v8 = vld [vmem:[#allocation3 + $0x190] sm:$0xff]  ;;  %v3032_v52 = vld [vmem:[#allocation3 + $0x1b8] sm:$0xff] }
 0x224   : > { %4504 = vpow2.f32 %v2098_v60  ;;  %v6245_v39 = vadd.f32 %v1829_v57, %v6029_v14  ;;  %v1831_v20 = vpop.f32.mrb[17].mxu1  ;;  %v2237_v32 = vadd.f32 %v2173_v21, %v1917_v19  ;;  %v3030_v21 = vld [vmem:[#allocation3 + $0x1a8] sm:$0xff]  ;;  %4211 = vmatprep.subr.bf16.mxu0 %v4210_v0  ;;  %v4212_v3 = vpack.c.bf16 %v3027_v8, %v3025_v2 }
 0x225   : > { %v4495_v29 = vpop.eup %4494  ;;  %v6248_v51 = vadd.f32 %v1831_v20, %v6032_v42  ;;  %v4214_v54 = vpack.c.bf16 %v3032_v52, %v3030_v21 }
 0x226   : > { %v4497_v49 = vpop.eup %4496  ;;  %v1988_v31 = vmin.f32 %v6245_v39, 0.0  ;;  %2520 = vmatprep.mubr.f32.mxu1 %v2237_v32  ;;  %v2174_v23 = vmul.f32 1.6732632, %v4495_v29  ;;  %v3029_v29 = vld [vmem:[#allocation3 + $0x1a0] sm:$0xff]  ;;  %4213 = vmatpush1.bf16.msra.mxu0 %v4212_v3 }
 0x227   : > { %v1989_v63 = vmin.f32 %v6248_v51, 0.0  ;;  %v1835_v7 = vpop.f32.mrb[18].mxu1  ;;  %2521 = vmatmul.mubr.f32.gmra.mrb[72].mxu1 %v2236_v41  ;;  %v2175_v16 = vmul.f32 1.6732632, %v4497_v49  ;;  %v3031_v41 = vld [vmem:[#allocation3 + $0x1b0] sm:$0xff]  ;;  %v1922_v49 = vmax.f32 %v6235_v27, 0.0  ;;  %4215 = vmatprep.subr.bf16.mxu0 %v4214_v54 }
 0x228   : > { %v2100_v53 = vmul.f32 1.442695, %v1988_v31  ;;  %v6256_v24 = vadd.f32 %v1835_v7, %v6029_v14  ;;  %v1837_v9 = vpop.f32.mrb[19].mxu1  ;;  %v2238_v15 = vadd.f32 %v2174_v23, %v1918_v30  ;;  %v4216_v27 = vpack.c.bf16 %v3031_v41, %v3029_v29 }
 0x229   : > { %v4499_v50 = vpop.eup %4498  ;;  %v2102_v38 = vmul.f32 1.442695, %v1989_v63  ;;  %v6259_v12 = vadd.f32 %v1837_v9, %v6032_v42  ;;  %v2239_v56 = vadd.f32 %v2175_v16, %v1919_v4  ;;  %v3034_v4 = vld [vmem:[#allocation3 + $0x1c8] sm:$0xff]  ;;  %v3036_v63 = vld [vmem:[#allocation3 + $0x1d8] sm:$0xff] }
 0x22a   : > { %v4501_v11 = vpop.eup %4500  ;;  %4506 = vpow2.f32 %v2100_v53  ;;  %v1990_v18 = vmin.f32 %v6256_v24, 0.0  ;;  %v2176_v17 = vmul.f32 1.6732632, %v4499_v50  ;;  %v4218_v35 = vpack.c.bf16 %v3036_v63, %v3034_v4  ;;  %v3033_v50 = vld [vmem:[#allocation3 + $0x1c0] sm:$0xff]  ;;  %4217 = vmatpush1.bf16.msra.mxu0 %v4216_v27 }
 0x22b   : > { %4508 = vpow2.f32 %v2102_v38  ;;  %v1991_v61 = vmin.f32 %v6259_v12, 0.0  ;;  %v1841_v40 = vpop.f32.mrb[20].mxu1  ;;  %2526 = vmatprep.mubr.f32.mxu1 %v2239_v56  ;;  %v2177_v34 = vmul.f32 1.6732632, %v4501_v11  ;;  %v3035_v38 = vld [vmem:[#allocation3 + $0x1d0] sm:$0xff]  ;;  %v3038_v11 = vld [vmem:[#allocation3 + $0x1e8] sm:$0xff] }
 0x22c   : > { %v2104_v44 = vmul.f32 1.442695, %v1990_v18  ;;  %v6266_v58 = vadd.f32 %v1841_v40, %v6029_v14  ;;  %v1843_v48 = vpop.f32.mrb[21].mxu1  ;;  %2527 = vmatmul.mubr.f32.gmra.mrb[74].mxu1 %v2238_v15  ;;  %v2240_v19 = vadd.f32 %v2176_v17, %v1920_v5  ;;  %v3040_v18 = vld [vmem:[#allocation3 + $0x1f8] sm:$0xff]  ;;  %v1925_v17 = vmax.f32 %v6248_v51, 0.0  ;;  %4219 = vmatprep.subr.bf16.mxu0 %v4218_v35  ;;  %v3037_v51 = vld [vmem:[#allocation3 + $0x1e0] sm:$0xff] }
 0x22d   : > { %v4503_v59 = vpop.eup %4502  ;;  %v2106_v1 = vmul.f32 1.442695, %v1991_v61  ;;  %v6269_v47 = vadd.f32 %v1843_v48, %v6032_v42  ;;  %v2241_v46 = vadd.f32 %v2177_v34, %v1921_v62  ;;  %v4220_v34 = vpack.c.bf16 %v3035_v38, %v3033_v50 }
 0x22e   : > { %v4505_v26 = vpop.eup %4504  ;;  %4510 = vpow2.f32 %v2104_v44  ;;  %v1992_v10 = vmin.f32 %v6266_v58, 0.0  ;;  %v2178_v60 = vmul.f32 1.6732632, %v4503_v59  ;;  %v4222_v55 = vpack.c.bf16 %v3040_v18, %v3038_v11  ;;  %v3039_v59 = vld [vmem:[#allocation3 + $0x1f0] sm:$0xff] }
 0x22f   : > { %4512 = vpow2.f32 %v2106_v1  ;;  %v1993_v57 = vmin.f32 %v6269_v47, 0.0  ;;  %v1847_v20 = vpop.f32.mrb[22].mxu1  ;;  %2532 = vmatprep.mubr.f32.mxu1 %v2241_v46  ;;  %v2179_v32 = vmul.f32 1.6732632, %v4505_v26  ;;  %v1927_v46 = vmax.f32 %v6259_v12, 0.0  ;;  %4221 = vmatpush1.bf16.msra.mxu0 %v4220_v34 }
 0x230   : > { %v2108_v31 = vmul.f32 1.442695, %v1992_v10  ;;  %v6275_v23 = vadd.f32 %v1847_v20, %v6029_v14  ;;  %v1849_v22 = vpop.f32.mrb[23].mxu1  ;;  %2533 = vmatmul.mubr.f32.gmra.mrb[76].mxu1 %v2240_v19  ;;  %v2242_v5 = vadd.f32 %v2178_v60, %v1922_v49  ;;  %v4224_v12 = vpack.c.bf16 %v3039_v59, %v3037_v51  ;;  %4223 = vmatprep.subr.bf16.mxu0 %v4222_v55 }
 0x231   : > { %v2110_v7 = vmul.f32 1.442695, %v1993_v57  ;;  %v6278_v16 = vadd.f32 %v1849_v22, %v6032_v42  ;;  %v2243_v25 = vadd.f32 %v2179_v32, %v1923_v43  ;;  %v1924_v43 = vmax.f32 %v6245_v39, 0.0 }
 0x232   : > { %4514 = vpow2.f32 %v2108_v31  ;;  %v1994_v30 = vmin.f32 %v6275_v23, 0.0  ;;  %v1926_v20 = vmax.f32 %v6256_v24, 0.0  ;;  %v1929_v54 = vmax.f32 %v6269_v47, 0.0 }
 0x233   : > { %4516 = vpow2.f32 %v2110_v7  ;;  %v1995_v53 = vmin.f32 %v6278_v16, 0.0  ;;  %v1853_v9 = vpop.f32.mrb[24].mxu1  ;;  %2538 = vmatprep.mubr.f32.mxu1 %v2243_v25  ;;  %4225 = vmatpush1.bf16.msra.mxu0 %v4224_v12  ;;  %v1928_v27 = vmax.f32 %v6266_v58, 0.0  ;;  %v1931_v58 = vmax.f32 %v6278_v16, 0.0 }
 0x234   : > { %v4507_v56 = vpop.eup %4506  ;;  %v2112_v28 = vmul.f32 1.442695, %v1994_v30  ;;  %v6283_v33 = vadd.f32 %v1853_v9, %v6029_v14  ;;  %v1855_v13 = vpop.f32.mrb[25].mxu1  ;;  %2539 = vmatmul.mubr.f32.gmra.mrb[78].mxu1 %v2242_v5 }
 0x235   : > { %v4509_v15 = vpop.eup %4508  ;;  %v2114_v6 = vmul.f32 1.442695, %v1995_v53  ;;  %v6287_v45 = vadd.f32 %v1855_v13, %v6032_v42  ;;  %v2180_v62 = vmul.f32 1.6732632, %v4507_v56 }
 0x236   : > { %4518 = vpow2.f32 %v2112_v28  ;;  %v1996_v61 = vmin.f32 %v6283_v33, 0.0  ;;  %v2181_v40 = vmul.f32 1.6732632, %v4509_v15  ;;  %v1932_v51 = vmax.f32 %v6283_v33, 0.0 }
 0x237   : > { %4520 = vpow2.f32 %v2114_v6  ;;  %v1997_v44 = vmin.f32 %v6287_v45, 0.0  ;;  %v1859_v48 = vpop.f32.mrb[26].mxu1  ;;  %v2244_v60 = vadd.f32 %v2180_v62, %v1924_v43  ;;  %v1930_v62 = vmax.f32 %v6275_v23, 0.0 }
 0x238   : > { %v4511_v1 = vpop.eup %4510  ;;  %v2116_v0 = vmul.f32 1.442695, %v1996_v61  ;;  %v6294_v2 = vadd.f32 %v1859_v48, %v6029_v14  ;;  %v1861_v8 = vpop.f32.mrb[27].mxu1  ;;  %v2245_v26 = vadd.f32 %v2181_v40, %v1925_v17  ;;  %v1933_v55 = vmax.f32 %v6287_v45, 0.0 }
 0x239   : > { %v4513_v10 = vpop.eup %4512  ;;  %v2118_v19 = vmul.f32 1.442695, %v1997_v44  ;;  %v6297_v39 = vadd.f32 %v1861_v8, %v6032_v42  ;;  %v2182_v21 = vmul.f32 1.6732632, %v4511_v1 }
 0x23a   : > { %4522 = vpow2.f32 %v2116_v0  ;;  %v1998_v52 = vmin.f32 %v6294_v2, 0.0  ;;  %2544 = vmatprep.mubr.f32.mxu1 %v2245_v26  ;;  %v2183_v57 = vmul.f32 1.6732632, %v4513_v10  ;;  %v1934_v10 = vmax.f32 %v6294_v2, 0.0 }
 0x23b   : > { %4524 = vpow2.f32 %v2118_v19  ;;  %v1999_v32 = vmin.f32 %v6297_v39, 0.0  ;;  %v1865_v29 = vpop.f32.mrb[28].mxu1  ;;  %2545 = vmatmul.mubr.f32.gmra.mrb[80].mxu1 %v2244_v60  ;;  %v2246_v25 = vadd.f32 %v2182_v21, %v1926_v20  ;;  %v1935_v8 = vmax.f32 %v6297_v39, 0.0 }
 0x23c   : > { %v4515_v41 = vpop.eup %4514  ;;  %v2120_v49 = vmul.f32 1.442695, %v1998_v52  ;;  %v6303_v31 = vadd.f32 %v1865_v29, %v6029_v14  ;;  %v1867_v22 = vpop.f32.mrb[29].mxu1  ;;  %v2247_v3 = vadd.f32 %v2183_v57, %v1927_v46 }
 0x23d   : > { %v4517_v4 = vpop.eup %4516  ;;  %v2122_v63 = vmul.f32 1.442695, %v1999_v32  ;;  %v6306_v7 = vadd.f32 %v1867_v22, %v6032_v42  ;;  %v2184_v24 = vmul.f32 1.6732632, %v4515_v41 }
 0x23e   : > { %4526 = vpow2.f32 %v2120_v49  ;;  %v2000_v30 = vmin.f32 %v6303_v31, 0.0  ;;  %2550 = vmatprep.mubr.f32.mxu1 %v2247_v3  ;;  %v2185_v5 = vmul.f32 1.6732632, %v4517_v4  ;;  %v1936_v12 = vmax.f32 %v6303_v31, 0.0  ;;  %v2324_v31 = vld [vmem:[%s7120_s8] sm:$0x3] }
 0x23f   : > { %4528 = vpow2.f32 %v2122_v63  ;;  %v2001_v53 = vmin.f32 %v6306_v7, 0.0  ;;  %v1871_v9 = vpop.f32.mrb[30].mxu1  ;;  %2551 = vmatmul.mubr.f32.gmra.mrb[82].mxu1 %v2246_v25  ;;  %v2248_v18 = vadd.f32 %v2184_v24, %v1928_v27  ;;  %v1937_v33 = vmax.f32 %v6306_v7, 0.0 }
 0x240   : > { %v4519_v35 = vpop.eup %4518  ;;  %v2124_v50 = vmul.f32 1.442695, %v2000_v30  ;;  %v6313_v38 = vadd.f32 %v1871_v9, %v6029_v14  ;;  %v1873_v56 = vpop.f32.mrb[31].mxu1  ;;  %v2249_v47 = vadd.f32 %v2185_v5, %v1929_v54  ;;  %v6330_v63 = vrot.slane %v2324_v31, %v5231_v36 }
 0x241   : > { %v4521_v28 = vpop.eup %4520  ;;  %v2126_v13 = vmul.f32 1.442695, %v2001_v53  ;;  %v1874_v11 = vadd.f32 %v1873_v56, %v6032_v42  ;;  %v2186_v15 = vmul.f32 1.6732632, %v4519_v35  ;;  %v6333_v7 = vrot.slane %v2324_v31, %v5233_v37 }
 0x242   : > { %4530 = vpow2.f32 %v2124_v50  ;;  %v2002_v17 = vmin.f32 %v6313_v38, 0.0  ;;  %2556 = vmatprep.mubr.f32.mxu1 %v2249_v47  ;;  %v2187_v6 = vmul.f32 1.6732632, %v4521_v28  ;;  %v1938_v22 = vmax.f32 %v6313_v38, 0.0 }
 0x243   : > { %4532 = vpow2.f32 %v2126_v13  ;;  %v2003_v14 = vmin.f32 %v1874_v11, 0.0  ;;  %2557 = vmatmul.mubr.f32.gmra.mrb[84].mxu1 %v2248_v18  ;;  %v2250_v42 = vadd.f32 %v2186_v15, %v1930_v62  ;;  %v1939_v49 = vmax.f32 %v1874_v11, 0.0 }
 0x244   : > { %v4523_v61 = vpop.eup %4522  ;;  %v2128_v40 = vmul.f32 1.442695, %v2002_v17  ;;  %v2251_v34 = vadd.f32 %v2187_v6, %v1931_v58 }
 0x245   : > { %v4525_v43 = vpop.eup %4524  ;;  %v2130_v44 = vmul.f32 1.442695, %v2003_v14  ;;  %v2188_v48 = vmul.f32 1.6732632, %v4523_v61 }
 0x246   : > { %4534 = vpow2.f32 %v2128_v40  ;;  %2562 = vmatprep.mubr.f32.mxu1 %v2251_v34  ;;  %v2189_v16 = vmul.f32 1.6732632, %v4525_v43 }
 0x247   : > { %4536 = vpow2.f32 %v2130_v44  ;;  %2563 = vmatmul.mubr.f32.gmra.mrb[86].mxu1 %v2250_v42  ;;  %v2252_v46 = vadd.f32 %v2188_v48, %v1932_v51 }
 0x248   : > { %v4527_v23 = vpop.eup %4526  ;;  %v2253_v59 = vadd.f32 %v2189_v16, %v1933_v55 }
 0x249   : > { %v4529_v1 = vpop.eup %4528  ;;  %v2190_v0 = vmul.f32 1.6732632, %v4527_v23 }
 0x24a   : > { %2568 = vmatprep.mubr.f32.mxu1 %v2253_v59  ;;  %v2191_v26 = vmul.f32 1.6732632, %v4529_v1 }
 0x24b   : > { %2569 = vmatmul.mubr.f32.gmra.mrb[88].mxu1 %v2252_v46  ;;  %v2254_v21 = vadd.f32 %v2190_v0, %v1934_v10 }
 0x24c   : > { %v4531_v45 = vpop.eup %4530  ;;  %v2255_v19 = vadd.f32 %v2191_v26, %v1935_v8 }
 0x24d   : > { %v4533_v60 = vpop.eup %4532  ;;  %v2192_v52 = vmul.f32 1.6732632, %v4531_v45 }
 0x24e   : > { %2574 = vmatprep.mubr.f32.mxu1 %v2255_v19  ;;  %v2193_v57 = vmul.f32 1.6732632, %v4533_v60 }
 0x24f   : > { %2575 = vmatmul.mubr.f32.gmra.mrb[90].mxu1 %v2254_v21  ;;  %v2256_v29 = vadd.f32 %v2192_v52, %v1936_v12 }
 0x250   : > { %v4535_v20 = vpop.eup %4534  ;;  %v2257_v32 = vadd.f32 %v2193_v57, %v1937_v33 }
 0x251   : > { %v4537_v39 = vpop.eup %4536  ;;  %v2194_v41 = vmul.f32 1.6732632, %v4535_v20 }
 0x252   : > { %2580 = vmatprep.mubr.f32.mxu1 %v2257_v32  ;;  %v2195_v2 = vmul.f32 1.6732632, %v4537_v39 }
 0x253   : > { %2581 = vmatmul.mubr.f32.gmra.mrb[92].mxu1 %v2256_v29  ;;  %v2258_v4 = vadd.f32 %v2194_v41, %v1938_v22 }
 0x254   : > { %v2259_v3 = vadd.f32 %v2195_v2, %v1939_v49 }
 0x256   : > { %2586 = vmatprep.mubr.f32.mxu1 %v2259_v3 }
 0x257   : > { %2587 = vmatmul.mubr.f32.gmra.mrb[94].mxu1 %v2258_v4 }
 0x294   : > { %v2402_v25 = vpop.f32.mrb[32].mxu1 }
 0x295   : > { %v2403_v24 = vadd.f32 %v2402_v25, %v6330_v63  ;;  %v2404_v54 = vpop.f32.mrb[33].mxu1 }
 0x296   : > { %v2405_v30 = vadd.f32 %v2404_v54, %v6333_v7 }
 0x297   : > { %v2657_v5 = vmin.f32 %v2403_v24, 0.0  ;;  %v2593_v55 = vmax.f32 %v2403_v24, 0.0 }
 0x298   : > { %v2658_v27 = vmin.f32 %v2405_v30, 0.0  ;;  %v2408_v53 = vpop.f32.mrb[34].mxu1  ;;  %v2594_v44 = vmax.f32 %v2405_v30, 0.0 }
 0x299   : > { %v2721_v9 = vmul.f32 1.442695, %v2657_v5  ;;  %v2409_v35 = vadd.f32 %v2408_v53, %v6330_v63  ;;  %v2410_v50 = vpop.f32.mrb[35].mxu1 }
 0x29a   : > { %v2723_v38 = vmul.f32 1.442695, %v2658_v27  ;;  %v2411_v56 = vadd.f32 %v2410_v50, %v6333_v7 }
 0x29b   : > { %4538 = vpow2.f32 %v2721_v9  ;;  %v2659_v47 = vmin.f32 %v2409_v35, 0.0  ;;  %v2595_v21 = vmax.f32 %v2409_v35, 0.0 }
 0x29c   : > { %4540 = vpow2.f32 %v2723_v38  ;;  %v2660_v28 = vmin.f32 %v2411_v56, 0.0  ;;  %v2414_v13 = vpop.f32.mrb[36].mxu1  ;;  %v2596_v10 = vmax.f32 %v2411_v56, 0.0 }
 0x29d   : > { %v2725_v11 = vmul.f32 1.442695, %v2659_v47  ;;  %v2415_v18 = vadd.f32 %v2414_v13, %v6330_v63  ;;  %v2416_v15 = vpop.f32.mrb[37].mxu1 }
 0x29e   : > { %v2727_v58 = vmul.f32 1.442695, %v2660_v28  ;;  %v2417_v17 = vadd.f32 %v2416_v15, %v6333_v7 }
 0x29f   : > { %4542 = vpow2.f32 %v2725_v11  ;;  %v2661_v6 = vmin.f32 %v2415_v18, 0.0  ;;  %v2597_v31 = vmax.f32 %v2415_v18, 0.0 }
 0x2a0   : > { %4544 = vpow2.f32 %v2727_v58  ;;  %v2662_v62 = vmin.f32 %v2417_v17, 0.0  ;;  %v2598_v22 = vmax.f32 %v2417_v17, 0.0 }
 0x2a1   : > { %v2729_v14 = vmul.f32 1.442695, %v2661_v6 }
 0x2a2   : > { %v2731_v61 = vmul.f32 1.442695, %v2662_v62 }
 0x2a3   : > { %4546 = vpow2.f32 %v2729_v14 }
 0x2a4   : > { %4548 = vpow2.f32 %v2731_v61  ;;  %v2420_v42 = vpop.f32.mrb[38].mxu1 }
 0x2a5   : > { %v4539_v40 = vpop.eup %4538  ;;  %v6342_v16 = vadd.f32 %v2420_v42, %v6330_v63  ;;  %v2422_v51 = vpop.f32.mrb[39].mxu1 }
 0x2a6   : > { %v4541_v34 = vpop.eup %4540  ;;  %v2849_v43 = vmul.f32 1.6732632, %v4539_v40  ;;  %v6345_v59 = vadd.f32 %v2422_v51, %v6333_v7 }
 0x2a7   : > { %v2850_v48 = vmul.f32 1.6732632, %v4541_v34  ;;  %v2663_v8 = vmin.f32 %v6342_v16, 0.0  ;;  %v2599_v62 = vmax.f32 %v6342_v16, 0.0 }
 0x2a8   : > { %v2913_v0 = vadd.f32 %v2849_v43, %v2593_v55  ;;  %v2664_v45 = vmin.f32 %v6345_v59, 0.0  ;;  %v2426_v19 = vpop.f32.mrb[40].mxu1  ;;  %v2600_v58 = vmax.f32 %v6345_v59, 0.0 }
 0x2a9   : > { %v4543_v23 = vpop.eup %4542  ;;  %v2914_v1 = vadd.f32 %v2850_v48, %v2594_v44  ;;  %v2733_v52 = vmul.f32 1.442695, %v2663_v8  ;;  %v6350_v33 = vadd.f32 %v2426_v19, %v6330_v63  ;;  %v2428_v57 = vpop.f32.mrb[41].mxu1 }
 0x2aa   : > { %v4545_v46 = vpop.eup %4544  ;;  %v2851_v26 = vmul.f32 1.6732632, %v4543_v23  ;;  %v2735_v20 = vmul.f32 1.442695, %v2664_v45  ;;  %v6353_v32 = vadd.f32 %v2428_v57, %v6333_v7 }
 0x2ab   : > { %3117 = vmatprep.mubr.f32.mxu0 %v2914_v1  ;;  %v2852_v60 = vmul.f32 1.6732632, %v4545_v46  ;;  %4550 = vpow2.f32 %v2733_v52  ;;  %v2665_v41 = vmin.f32 %v6350_v33, 0.0 }
 0x2ac   : > { %3118 = vmatmul.mubr.f32.vlgmr.msra.gmra.mrb[32].mxu0 %v2913_v0  ;;  %v2915_v49 = vadd.f32 %v2851_v26, %v2595_v21  ;;  %4552 = vpow2.f32 %v2735_v20  ;;  %v2666_v3 = vmin.f32 %v6353_v32, 0.0  ;;  %v2602_v59 = vmax.f32 %v6353_v32, 0.0 }
 0x2ad   : > { %v4547_v12 = vpop.eup %4546  ;;  %v2916_v39 = vadd.f32 %v2852_v60, %v2596_v10  ;;  %v2737_v25 = vmul.f32 1.442695, %v2665_v41  ;;  %v2601_v0 = vmax.f32 %v6350_v33, 0.0 }
 0x2ae   : > { %v4549_v29 = vpop.eup %4548  ;;  %v2853_v2 = vmul.f32 1.6732632, %v4547_v12  ;;  %v2739_v24 = vmul.f32 1.442695, %v2666_v3 }
 0x2af   : > { %3123 = vmatprep.mubr.f32.mxu0 %v2916_v39  ;;  %v2854_v4 = vmul.f32 1.6732632, %v4549_v29  ;;  %4554 = vpow2.f32 %v2737_v25 }
 0x2b0   : > { %3124 = vmatmul.mubr.f32.gmra.mrb[34].mxu0 %v2915_v49  ;;  %v2432_v30 = vpop.f32.mrb[42].mxu1  ;;  %v2917_v5 = vadd.f32 %v2853_v2, %v2597_v31  ;;  %4556 = vpow2.f32 %v2739_v24 }
 0x2b1   : > { %v2918_v54 = vadd.f32 %v2854_v4, %v2598_v22  ;;  %v6358_v27 = vadd.f32 %v2432_v30, %v6330_v63  ;;  %v2434_v53 = vpop.f32.mrb[43].mxu1 }
 0x2b2   : > { %v6361_v9 = vadd.f32 %v2434_v53, %v6333_v7 }
 0x2b3   : > { %3129 = vmatprep.mubr.f32.mxu0 %v2918_v54  ;;  %v2667_v35 = vmin.f32 %v6358_v27, 0.0  ;;  %v2603_v22 = vmax.f32 %v6358_v27, 0.0 }
 0x2b4   : > { %3130 = vmatmul.mubr.f32.gmra.mrb[36].mxu0 %v2917_v5  ;;  %v2668_v50 = vmin.f32 %v6361_v9, 0.0  ;;  %v2604_v41 = vmax.f32 %v6361_v9, 0.0 }
 0x2b5   : > { %v2741_v38 = vmul.f32 1.442695, %v2667_v35  ;;  %v4551_v56 = vpop.eup %4550 }
 0x2b6   : > { %v2743_v47 = vmul.f32 1.442695, %v2668_v50  ;;  %v2438_v28 = vpop.f32.mrb[44].mxu1  ;;  %v4553_v13 = vpop.eup %4552  ;;  %v2855_v15 = vmul.f32 1.6732632, %v4551_v56 }
 0x2b7   : > { %4558 = vpow2.f32 %v2741_v38  ;;  %v6366_v11 = vadd.f32 %v2438_v28, %v6330_v63  ;;  %v2440_v18 = vpop.f32.mrb[45].mxu1  ;;  %v2856_v6 = vmul.f32 1.6732632, %v4553_v13 }
 0x2b8   : > { %4560 = vpow2.f32 %v2743_v47  ;;  %v6370_v17 = vadd.f32 %v2440_v18, %v6333_v7  ;;  %v2919_v51 = vadd.f32 %v2855_v15, %v2599_v62 }
 0x2b9   : > { %v2669_v14 = vmin.f32 %v6366_v11, 0.0  ;;  %v4555_v61 = vpop.eup %4554  ;;  %v2920_v43 = vadd.f32 %v2856_v6, %v2600_v58  ;;  %v2605_v28 = vmax.f32 %v6366_v11, 0.0 }
 0x2ba   : > { %v2670_v40 = vmin.f32 %v6370_v17, 0.0  ;;  %v2444_v34 = vpop.f32.mrb[46].mxu1  ;;  %v4557_v44 = vpop.eup %4556  ;;  %v2857_v23 = vmul.f32 1.6732632, %v4555_v61  ;;  %v2606_v50 = vmax.f32 %v6370_v17, 0.0 }
 0x2bb   : > { %v2745_v42 = vmul.f32 1.442695, %v2669_v14  ;;  %v6376_v48 = vadd.f32 %v2444_v34, %v6330_v63  ;;  %v2446_v55 = vpop.f32.mrb[47].mxu1  ;;  %3135 = vmatprep.mubr.f32.mxu0 %v2920_v43  ;;  %v2858_v46 = vmul.f32 1.6732632, %v4557_v44 }
 0x2bc   : > { %v2747_v1 = vmul.f32 1.442695, %v2670_v40  ;;  %v6380_v16 = vadd.f32 %v2446_v55, %v6333_v7  ;;  %3136 = vmatmul.mubr.f32.gmra.mrb[38].mxu0 %v2919_v51  ;;  %v2921_v52 = vadd.f32 %v2857_v23, %v2601_v0 }
 0x2bd   : > { %4562 = vpow2.f32 %v2745_v42  ;;  %v2671_v8 = vmin.f32 %v6376_v48, 0.0  ;;  %v2922_v45 = vadd.f32 %v2858_v46, %v2602_v59  ;;  %v2607_v42 = vmax.f32 %v6376_v48, 0.0 }
 0x2be   : > { %4564 = vpow2.f32 %v2747_v1  ;;  %v2672_v26 = vmin.f32 %v6380_v16, 0.0  ;;  %v2450_v10 = vpop.f32.mrb[48].mxu1  ;;  %v2608_v34 = vmax.f32 %v6380_v16, 0.0 }
 0x2bf   : > { %v2749_v19 = vmul.f32 1.442695, %v2671_v8  ;;  %v6386_v60 = vadd.f32 %v2450_v10, %v6330_v63  ;;  %v2452_v21 = vpop.f32.mrb[49].mxu1  ;;  %3141 = vmatprep.mubr.f32.mxu0 %v2922_v45 }
 0x2c0   : > { %v2751_v57 = vmul.f32 1.442695, %v2672_v26  ;;  %v6389_v12 = vadd.f32 %v2452_v21, %v6333_v7  ;;  %3142 = vmatmul.mubr.f32.gmra.mrb[40].mxu0 %v2921_v52 }
 0x2c1   : > { %v4559_v33 = vpop.eup %4558  ;;  %4566 = vpow2.f32 %v2749_v19  ;;  %v2673_v20 = vmin.f32 %v6386_v60, 0.0  ;;  %v2609_v21 = vmax.f32 %v6386_v60, 0.0 }
 0x2c2   : > { %v4561_v32 = vpop.eup %4560  ;;  %4568 = vpow2.f32 %v2751_v57  ;;  %v2674_v39 = vmin.f32 %v6389_v12, 0.0  ;;  %v2859_v29 = vmul.f32 1.6732632, %v4559_v33  ;;  %v2610_v48 = vmax.f32 %v6389_v12, 0.0 }
 0x2c3   : > { %v2753_v49 = vmul.f32 1.442695, %v2673_v20  ;;  %v2860_v2 = vmul.f32 1.6732632, %v4561_v32 }
 0x2c4   : > { %v2755_v3 = vmul.f32 1.442695, %v2674_v39  ;;  %v2456_v4 = vpop.f32.mrb[50].mxu1  ;;  %v2923_v30 = vadd.f32 %v2859_v29, %v2603_v22 }
 0x2c5   : > { %4570 = vpow2.f32 %v2753_v49  ;;  %v6396_v31 = vadd.f32 %v2456_v4, %v6330_v63  ;;  %v2458_v25 = vpop.f32.mrb[51].mxu1  ;;  %v2924_v24 = vadd.f32 %v2860_v2, %v2604_v41 }
 0x2c6   : > { %4572 = vpow2.f32 %v2755_v3  ;;  %v6399_v54 = vadd.f32 %v2458_v25, %v6333_v7 }
 0x2c7   : > { %v4563_v5 = vpop.eup %4562  ;;  %v2675_v53 = vmin.f32 %v6396_v31, 0.0  ;;  %3147 = vmatprep.mubr.f32.mxu0 %v2924_v24 }
 0x2c8   : > { %v4565_v9 = vpop.eup %4564  ;;  %v2676_v27 = vmin.f32 %v6399_v54, 0.0  ;;  %3148 = vmatmul.mubr.f32.gmra.mrb[42].mxu0 %v2923_v30  ;;  %v2861_v35 = vmul.f32 1.6732632, %v4563_v5  ;;  %v2612_v3 = vmax.f32 %v6399_v54, 0.0  ;;  %v2611_v30 = vmax.f32 %v6396_v31, 0.0 }
 0x2c9   : > { %v2757_v38 = vmul.f32 1.442695, %v2675_v53  ;;  %v2462_v56 = vpop.f32.mrb[52].mxu1  ;;  %v2862_v47 = vmul.f32 1.6732632, %v4565_v9 }
 0x2ca   : > { %v2759_v13 = vmul.f32 1.442695, %v2676_v27  ;;  %v6406_v18 = vadd.f32 %v2462_v56, %v6330_v63  ;;  %v2464_v15 = vpop.f32.mrb[53].mxu1  ;;  %v2925_v61 = vadd.f32 %v2861_v35, %v2605_v28 }
 0x2cb   : > { %v4567_v58 = vpop.eup %4566  ;;  %4574 = vpow2.f32 %v2757_v38  ;;  %v6409_v6 = vadd.f32 %v2464_v15, %v6333_v7  ;;  %v2926_v62 = vadd.f32 %v2862_v47, %v2606_v50 }
 0x2cc   : > { %v4569_v14 = vpop.eup %4568  ;;  %4576 = vpow2.f32 %v2759_v13  ;;  %v2677_v17 = vmin.f32 %v6406_v18, 0.0  ;;  %v2863_v40 = vmul.f32 1.6732632, %v4567_v58 }
 0x2cd   : > { %v2678_v11 = vmin.f32 %v6409_v6, 0.0  ;;  %v2468_v43 = vpop.f32.mrb[54].mxu1  ;;  %3153 = vmatprep.mubr.f32.mxu0 %v2926_v62  ;;  %v2864_v44 = vmul.f32 1.6732632, %v4569_v14  ;;  %v2614_v28 = vmax.f32 %v6409_v6, 0.0  ;;  %v2613_v62 = vmax.f32 %v6406_v18, 0.0 }
 0x2ce   : > { %v2761_v55 = vmul.f32 1.442695, %v2677_v17  ;;  %v6416_v51 = vadd.f32 %v2468_v43, %v6330_v63  ;;  %v2470_v23 = vpop.f32.mrb[55].mxu1  ;;  %3154 = vmatmul.mubr.f32.gmra.mrb[44].mxu0 %v2925_v61  ;;  %v2927_v26 = vadd.f32 %v2863_v40, %v2607_v42 }
 0x2cf   : > { %v4571_v59 = vpop.eup %4570  ;;  %v2763_v1 = vmul.f32 1.442695, %v2678_v11  ;;  %v6419_v46 = vadd.f32 %v2470_v23, %v6333_v7  ;;  %v2928_v0 = vadd.f32 %v2864_v44, %v2608_v34 }
 0x2d0   : > { %v4573_v16 = vpop.eup %4572  ;;  %4578 = vpow2.f32 %v2761_v55  ;;  %v2679_v8 = vmin.f32 %v6416_v51, 0.0  ;;  %v2865_v10 = vmul.f32 1.6732632, %v4571_v59  ;;  %v2615_v59 = vmax.f32 %v6416_v51, 0.0 }
 0x2d1   : > { %4580 = vpow2.f32 %v2763_v1  ;;  %v2680_v45 = vmin.f32 %v6419_v46, 0.0  ;;  %3159 = vmatprep.mubr.f32.mxu0 %v2928_v0  ;;  %v2866_v19 = vmul.f32 1.6732632, %v4573_v16  ;;  %v2616_v55 = vmax.f32 %v6419_v46, 0.0 }
 0x2d2   : > { %v2765_v52 = vmul.f32 1.442695, %v2679_v8  ;;  %v2474_v57 = vpop.f32.mrb[56].mxu1  ;;  %3160 = vmatmul.mubr.f32.gmra.mrb[46].mxu0 %v2927_v26  ;;  %v2929_v12 = vadd.f32 %v2865_v10, %v2609_v21 }
 0x2d3   : > { %v2767_v33 = vmul.f32 1.442695, %v2680_v45  ;;  %v6426_v20 = vadd.f32 %v2474_v57, %v6330_v63  ;;  %v2476_v32 = vpop.f32.mrb[57].mxu1  ;;  %v2930_v39 = vadd.f32 %v2866_v19, %v2610_v48 }
 0x2d4   : > { %4582 = vpow2.f32 %v2765_v52  ;;  %v6429_v29 = vadd.f32 %v2476_v32, %v6333_v7 }
 0x2d5   : > { %v4575_v41 = vpop.eup %4574  ;;  %4584 = vpow2.f32 %v2767_v33  ;;  %v2681_v49 = vmin.f32 %v6426_v20, 0.0  ;;  %3165 = vmatprep.mubr.f32.mxu0 %v2930_v39  ;;  %v2617_v52 = vmax.f32 %v6426_v20, 0.0 }
 0x2d6   : > { %v4577_v60 = vpop.eup %4576  ;;  %v2682_v2 = vmin.f32 %v6429_v29, 0.0  ;;  %3166 = vmatmul.mubr.f32.gmra.mrb[48].mxu0 %v2929_v12  ;;  %v2867_v22 = vmul.f32 1.6732632, %v4575_v41  ;;  %v2618_v46 = vmax.f32 %v6429_v29, 0.0 }
 0x2d7   : > { %v2769_v4 = vmul.f32 1.442695, %v2681_v49  ;;  %v2480_v25 = vpop.f32.mrb[58].mxu1  ;;  %v2868_v24 = vmul.f32 1.6732632, %v4577_v60 }
 0x2d8   : > { %v2771_v5 = vmul.f32 1.442695, %v2682_v2  ;;  %v6436_v53 = vadd.f32 %v2480_v25, %v6330_v63  ;;  %v2482_v9 = vpop.f32.mrb[59].mxu1  ;;  %v2931_v54 = vadd.f32 %v2867_v22, %v2611_v30 }
 0x2d9   : > { %4586 = vpow2.f32 %v2769_v4  ;;  %v6439_v27 = vadd.f32 %v2482_v9, %v6333_v7  ;;  %v2932_v35 = vadd.f32 %v2868_v24, %v2612_v3 }
 0x2da   : > { %v4579_v50 = vpop.eup %4578  ;;  %4588 = vpow2.f32 %v2771_v5  ;;  %v2683_v38 = vmin.f32 %v6436_v53, 0.0  ;;  %v2619_v30 = vmax.f32 %v6436_v53, 0.0 }
 0x2db   : > { %v4581_v56 = vpop.eup %4580  ;;  %v2684_v47 = vmin.f32 %v6439_v27, 0.0  ;;  %3171 = vmatprep.mubr.f32.mxu0 %v2932_v35  ;;  %v2869_v31 = vmul.f32 1.6732632, %v4579_v50  ;;  %v2620_v20 = vmax.f32 %v6439_v27, 0.0 }
 0x2dc   : > { %v2773_v13 = vmul.f32 1.442695, %v2683_v38  ;;  %v2486_v15 = vpop.f32.mrb[60].mxu1  ;;  %3172 = vmatmul.mubr.f32.gmra.mrb[50].mxu0 %v2931_v54  ;;  %v2870_v58 = vmul.f32 1.6732632, %v4581_v56 }
 0x2dd   : > { %v2775_v14 = vmul.f32 1.442695, %v2684_v47  ;;  %v6446_v17 = vadd.f32 %v2486_v15, %v6330_v63  ;;  %v2488_v61 = vpop.f32.mrb[61].mxu1  ;;  %v2933_v44 = vadd.f32 %v2869_v31, %v2613_v62 }
 0x2de   : > { %v4583_v40 = vpop.eup %4582  ;;  %4590 = vpow2.f32 %v2773_v13  ;;  %v6449_v34 = vadd.f32 %v2488_v61, %v6333_v7  ;;  %v2934_v11 = vadd.f32 %v2870_v58, %v2614_v28 }
 0x2df   : > { %v4585_v43 = vpop.eup %4584  ;;  %4592 = vpow2.f32 %v2775_v14  ;;  %v2685_v6 = vmin.f32 %v6446_v17, 0.0  ;;  %v2871_v42 = vmul.f32 1.6732632, %v4583_v40  ;;  %v2621_v14 = vmax.f32 %v6446_v17, 0.0 }
 0x2e0   : > { %v2686_v18 = vmin.f32 %v6449_v34, 0.0  ;;  %3177 = vmatprep.mubr.f32.mxu0 %v2934_v11  ;;  %v2872_v23 = vmul.f32 1.6732632, %v4585_v43  ;;  %v2622_v15 = vmax.f32 %v6449_v34, 0.0 }
 0x2e1   : > { %v2777_v1 = vmul.f32 1.442695, %v2685_v6  ;;  %3178 = vmatmul.mubr.f32.gmra.mrb[52].mxu0 %v2933_v44  ;;  %v2935_v26 = vadd.f32 %v2871_v42, %v2615_v59 }
 0x2e2   : > { %v2779_v0 = vmul.f32 1.442695, %v2686_v18  ;;  %v2936_v16 = vadd.f32 %v2872_v23, %v2616_v55 }
 0x2e3   : > { %v4587_v8 = vpop.eup %4586  ;;  %4594 = vpow2.f32 %v2777_v1 }
 0x2e4   : > { %v4589_v10 = vpop.eup %4588  ;;  %4596 = vpow2.f32 %v2779_v0  ;;  %v2492_v48 = vpop.f32.mrb[62].mxu1  ;;  %3183 = vmatprep.mubr.f32.mxu0 %v2936_v16  ;;  %v2873_v45 = vmul.f32 1.6732632, %v4587_v8 }
 0x2e5   : > { %v6457_v19 = vadd.f32 %v2492_v48, %v6330_v63  ;;  %v2494_v21 = vpop.f32.mrb[63].mxu1  ;;  %3184 = vmatmul.mubr.f32.gmra.mrb[54].mxu0 %v2935_v26  ;;  %v2874_v51 = vmul.f32 1.6732632, %v4589_v10 }
 0x2e6   : > { %v6461_v57 = vadd.f32 %v2494_v21, %v6333_v7  ;;  %v2937_v49 = vadd.f32 %v2873_v45, %v2617_v52 }
 0x2e7   : > { %v2687_v33 = vmin.f32 %v6457_v19, 0.0  ;;  %v2938_v32 = vadd.f32 %v2874_v51, %v2618_v46  ;;  %v2623_v51 = vmax.f32 %v6457_v19, 0.0 }
 0x2e8   : > { %v4591_v39 = vpop.eup %4590  ;;  %v2688_v12 = vmin.f32 %v6461_v57, 0.0  ;;  %v2498_v41 = vpop.f32.mrb[64].mxu1  ;;  %v2624_v45 = vmax.f32 %v6461_v57, 0.0 }
 0x2e9   : > { %v4593_v29 = vpop.eup %4592  ;;  %v2781_v60 = vmul.f32 1.442695, %v2687_v33  ;;  %v6466_v2 = vadd.f32 %v2498_v41, %v6330_v63  ;;  %v2500_v22 = vpop.f32.mrb[65].mxu1  ;;  %3189 = vmatprep.mubr.f32.mxu0 %v2938_v32  ;;  %v2875_v3 = vmul.f32 1.6732632, %v4591_v39 }
 0x2ea   : > { %v2783_v4 = vmul.f32 1.442695, %v2688_v12  ;;  %v6470_v25 = vadd.f32 %v2500_v22, %v6333_v7  ;;  %3190 = vmatmul.mubr.f32.gmra.mrb[56].mxu0 %v2937_v49  ;;  %v2876_v24 = vmul.f32 1.6732632, %v4593_v29 }
 0x2eb   : > { %4598 = vpow2.f32 %v2781_v60  ;;  %v2689_v5 = vmin.f32 %v6466_v2, 0.0  ;;  %v2939_v47 = vadd.f32 %v2875_v3, %v2619_v30 }
 0x2ec   : > { %4600 = vpow2.f32 %v2783_v4  ;;  %v2690_v9 = vmin.f32 %v6470_v25, 0.0  ;;  %v2504_v35 = vpop.f32.mrb[66].mxu1  ;;  %v2940_v50 = vadd.f32 %v2876_v24, %v2620_v20  ;;  %v2626_v22 = vmax.f32 %v6470_v25, 0.0 }
 0x2ed   : > { %v4595_v38 = vpop.eup %4594  ;;  %v2785_v54 = vmul.f32 1.442695, %v2689_v5  ;;  %v6476_v27 = vadd.f32 %v2504_v35, %v6330_v63  ;;  %v2506_v56 = vpop.f32.mrb[67].mxu1  ;;  %v2625_v20 = vmax.f32 %v6466_v2, 0.0 }
 0x2ee   : > { %v4597_v31 = vpop.eup %4596  ;;  %v2787_v28 = vmul.f32 1.442695, %v2690_v9  ;;  %v6479_v13 = vadd.f32 %v2506_v56, %v6333_v7  ;;  %3195 = vmatprep.mubr.f32.mxu0 %v2940_v50  ;;  %v2877_v53 = vmul.f32 1.6732632, %v4595_v38 }
 0x2ef   : > { %4602 = vpow2.f32 %v2785_v54  ;;  %v2691_v58 = vmin.f32 %v6476_v27, 0.0  ;;  %3196 = vmatmul.mubr.f32.gmra.mrb[58].mxu0 %v2939_v47  ;;  %v2878_v62 = vmul.f32 1.6732632, %v4597_v31  ;;  %v2627_v47 = vmax.f32 %v6476_v27, 0.0 }
 0x2f0   : > { %4604 = vpow2.f32 %v2787_v28  ;;  %v2692_v61 = vmin.f32 %v6479_v13, 0.0  ;;  %v2510_v40 = vpop.f32.mrb[68].mxu1  ;;  %v2941_v55 = vadd.f32 %v2877_v53, %v2621_v14  ;;  %v2628_v38 = vmax.f32 %v6479_v13, 0.0 }
 0x2f1   : > { %v2789_v11 = vmul.f32 1.442695, %v2691_v58  ;;  %v6486_v43 = vadd.f32 %v2510_v40, %v6330_v63  ;;  %v2512_v6 = vpop.f32.mrb[69].mxu1  ;;  %v2942_v44 = vadd.f32 %v2878_v62, %v2622_v15 }
 0x2f2   : > { %v2791_v42 = vmul.f32 1.442695, %v2692_v61  ;;  %v6489_v34 = vadd.f32 %v2512_v6, %v6333_v7 }
 0x2f3   : > { %4606 = vpow2.f32 %v2789_v11  ;;  %v2693_v18 = vmin.f32 %v6486_v43, 0.0  ;;  %3201 = vmatprep.mubr.f32.mxu0 %v2942_v44 }
 0x2f4   : > { %4608 = vpow2.f32 %v2791_v42  ;;  %v2694_v17 = vmin.f32 %v6489_v34, 0.0  ;;  %v2516_v23 = vpop.f32.mrb[70].mxu1  ;;  %3202 = vmatmul.mubr.f32.gmra.mrb[60].mxu0 %v2941_v55  ;;  %v2630_v27 = vmax.f32 %v6489_v34, 0.0  ;;  %v2629_v42 = vmax.f32 %v6486_v43, 0.0 }
 0x2f5   : > { %v4599_v59 = vpop.eup %4598  ;;  %v2793_v1 = vmul.f32 1.442695, %v2693_v18  ;;  %v6494_v0 = vadd.f32 %v2516_v23, %v6330_v63  ;;  %v2518_v16 = vpop.f32.mrb[71].mxu1 }
 0x2f6   : > { %v4601_v8 = vpop.eup %4600  ;;  %v2795_v26 = vmul.f32 1.442695, %v2694_v17  ;;  %v6497_v10 = vadd.f32 %v2518_v16, %v6333_v7  ;;  %v2879_v48 = vmul.f32 1.6732632, %v4599_v59 }
 0x2f7   : > { %4610 = vpow2.f32 %v2793_v1  ;;  %v2695_v46 = vmin.f32 %v6494_v0, 0.0  ;;  %v2880_v21 = vmul.f32 1.6732632, %v4601_v8 }
 0x2f8   : > { %4612 = vpow2.f32 %v2795_v26  ;;  %v2696_v52 = vmin.f32 %v6497_v10, 0.0  ;;  %v2943_v29 = vadd.f32 %v2879_v48, %v2623_v51  ;;  %v2632_v43 = vmax.f32 %v6497_v10, 0.0 }
 0x2f9   : > { %v4603_v33 = vpop.eup %4602  ;;  %v2797_v32 = vmul.f32 1.442695, %v2695_v46  ;;  %v2944_v39 = vadd.f32 %v2880_v21, %v2624_v45  ;;  %v2631_v51 = vmax.f32 %v6494_v0, 0.0 }
 0x2fa   : > { %v4605_v12 = vpop.eup %4604  ;;  %v2799_v41 = vmul.f32 1.442695, %v2696_v52  ;;  %v2522_v49 = vpop.f32.mrb[72].mxu1  ;;  %v2881_v60 = vmul.f32 1.6732632, %v4603_v33 }
 0x2fb   : > { %4614 = vpow2.f32 %v2797_v32  ;;  %v6505_v57 = vadd.f32 %v2522_v49, %v6330_v63  ;;  %v2524_v3 = vpop.f32.mrb[73].mxu1  ;;  %3207 = vmatprep.mubr.f32.mxu0 %v2944_v39  ;;  %v2882_v19 = vmul.f32 1.6732632, %v4605_v12 }
 0x2fc   : > { %4616 = vpow2.f32 %v2799_v41  ;;  %v6509_v4 = vadd.f32 %v2524_v3, %v6333_v7  ;;  %3208 = vmatmul.mubr.f32.gmra.mrb[62].mxu0 %v2943_v29  ;;  %v2945_v35 = vadd.f32 %v2881_v60, %v2625_v20 }
 0x2fd   : > { %v4607_v24 = vpop.eup %4606  ;;  %v2697_v30 = vmin.f32 %v6505_v57, 0.0  ;;  %v2946_v5 = vadd.f32 %v2882_v19, %v2626_v22 }
 0x2fe   : > { %v4609_v9 = vpop.eup %4608  ;;  %v2698_v25 = vmin.f32 %v6509_v4, 0.0  ;;  %v2883_v50 = vmul.f32 1.6732632, %v4607_v24  ;;  %v2634_v19 = vmax.f32 %v6509_v4, 0.0 }
 0x2ff   : > { %v2801_v54 = vmul.f32 1.442695, %v2697_v30  ;;  %v2528_v56 = vpop.f32.mrb[74].mxu1  ;;  %3213 = vmatprep.mubr.f32.mxu0 %v2946_v5  ;;  %v2884_v2 = vmul.f32 1.6732632, %v4609_v9  ;;  %v2633_v30 = vmax.f32 %v6505_v57, 0.0 }
 0x300   : > { %v2803_v31 = vmul.f32 1.442695, %v2698_v25  ;;  %v6516_v28 = vadd.f32 %v2528_v56, %v6330_v63  ;;  %v2530_v53 = vpop.f32.mrb[75].mxu1  ;;  %3214 = vmatmul.mubr.f32.gmra.mrb[64].mxu0 %v2945_v35  ;;  %v2947_v61 = vadd.f32 %v2883_v50, %v2627_v47 }
 0x301   : > { %v4611_v15 = vpop.eup %4610  ;;  %4618 = vpow2.f32 %v2801_v54  ;;  %v6519_v58 = vadd.f32 %v2530_v53, %v6333_v7  ;;  %v2948_v62 = vadd.f32 %v2884_v2, %v2628_v38 }
 0x302   : > { %v4613_v14 = vpop.eup %4612  ;;  %4620 = vpow2.f32 %v2803_v31  ;;  %v2699_v13 = vmin.f32 %v6516_v28, 0.0  ;;  %v2885_v40 = vmul.f32 1.6732632, %v4611_v15  ;;  %v2635_v15 = vmax.f32 %v6516_v28, 0.0 }
 0x303   : > { %v2700_v11 = vmin.f32 %v6519_v58, 0.0  ;;  %v2534_v6 = vpop.f32.mrb[76].mxu1  ;;  %3219 = vmatprep.mubr.f32.mxu0 %v2948_v62  ;;  %v2886_v44 = vmul.f32 1.6732632, %v4613_v14  ;;  %v2636_v57 = vmax.f32 %v6519_v58, 0.0 }
 0x304   : > { %v2805_v55 = vmul.f32 1.442695, %v2699_v13  ;;  %v6526_v18 = vadd.f32 %v2534_v6, %v6330_v63  ;;  %v2536_v17 = vpop.f32.mrb[77].mxu1  ;;  %3220 = vmatmul.mubr.f32.gmra.mrb[66].mxu0 %v2947_v61  ;;  %v2949_v26 = vadd.f32 %v2885_v40, %v2629_v42 }
 0x305   : > { %v4615_v23 = vpop.eup %4614  ;;  %v2807_v59 = vmul.f32 1.442695, %v2700_v11  ;;  %v6529_v1 = vadd.f32 %v2536_v17, %v6333_v7  ;;  %v2950_v16 = vadd.f32 %v2886_v44, %v2630_v27 }
 0x306   : > { %v4617_v34 = vpop.eup %4616  ;;  %4622 = vpow2.f32 %v2805_v55  ;;  %v2701_v8 = vmin.f32 %v6526_v18, 0.0  ;;  %v2887_v48 = vmul.f32 1.6732632, %v4615_v23 }
 0x307   : > { %4624 = vpow2.f32 %v2807_v59  ;;  %v2702_v45 = vmin.f32 %v6529_v1, 0.0  ;;  %v2540_v46 = vpop.f32.mrb[78].mxu1  ;;  %3225 = vmatprep.mubr.f32.mxu0 %v2950_v16  ;;  %v2888_v21 = vmul.f32 1.6732632, %v4617_v34  ;;  %v2638_v55 = vmax.f32 %v6529_v1, 0.0 }
 0x308   : > { %v2809_v52 = vmul.f32 1.442695, %v2701_v8  ;;  %v6536_v33 = vadd.f32 %v2540_v46, %v6330_v63  ;;  %v2542_v32 = vpop.f32.mrb[79].mxu1  ;;  %3226 = vmatmul.mubr.f32.gmra.mrb[68].mxu0 %v2949_v26  ;;  %v2951_v49 = vadd.f32 %v2887_v48, %v2631_v51  ;;  %v2637_v59 = vmax.f32 %v6526_v18, 0.0 }
 0x309   : > { %v2811_v39 = vmul.f32 1.442695, %v2702_v45  ;;  %v6539_v12 = vadd.f32 %v2542_v32, %v6333_v7  ;;  %v2952_v41 = vadd.f32 %v2888_v21, %v2632_v43 }
 0x30a   : > { %4626 = vpow2.f32 %v2809_v52  ;;  %v2703_v10 = vmin.f32 %v6536_v33, 0.0 }
 0x30b   : > { %v4619_v29 = vpop.eup %4618  ;;  %4628 = vpow2.f32 %v2811_v39  ;;  %v2704_v60 = vmin.f32 %v6539_v12, 0.0  ;;  %3231 = vmatprep.mubr.f32.mxu0 %v2952_v41  ;;  %v2640_v18 = vmax.f32 %v6539_v12, 0.0  ;;  %v2639_v41 = vmax.f32 %v6536_v33, 0.0 }
 0x30c   : > { %v4621_v0 = vpop.eup %4620  ;;  %v2813_v22 = vmul.f32 1.442695, %v2703_v10  ;;  %3232 = vmatmul.mubr.f32.gmra.mrb[70].mxu0 %v2951_v49  ;;  %v2889_v3 = vmul.f32 1.6732632, %v4619_v29 }
 0x30d   : > { %v2815_v20 = vmul.f32 1.442695, %v2704_v60  ;;  %v2890_v24 = vmul.f32 1.6732632, %v4621_v0 }
 0x30e   : > { %4630 = vpow2.f32 %v2813_v22  ;;  %v2546_v5 = vpop.f32.mrb[80].mxu1  ;;  %v2953_v54 = vadd.f32 %v2889_v3, %v2633_v30 }
 0x30f   : > { %4632 = vpow2.f32 %v2815_v20  ;;  %v6546_v9 = vadd.f32 %v2546_v5, %v6330_v63  ;;  %v2548_v25 = vpop.f32.mrb[81].mxu1  ;;  %v2954_v35 = vadd.f32 %v2890_v24, %v2634_v19 }
 0x310   : > { %v4623_v50 = vpop.eup %4622  ;;  %v6549_v38 = vadd.f32 %v2548_v25, %v6333_v7 }
 0x311   : > { %v4625_v56 = vpop.eup %4624  ;;  %v2705_v4 = vmin.f32 %v6546_v9, 0.0  ;;  %3237 = vmatprep.mubr.f32.mxu0 %v2954_v35  ;;  %v2891_v2 = vmul.f32 1.6732632, %v4623_v50 }
 0x312   : > { %v2706_v47 = vmin.f32 %v6549_v38, 0.0  ;;  %v2552_v31 = vpop.f32.mrb[82].mxu1  ;;  %3238 = vmatmul.mubr.f32.gmra.mrb[72].mxu0 %v2953_v54  ;;  %v2892_v53 = vmul.f32 1.6732632, %v4625_v56  ;;  %v2642_v56 = vmax.f32 %v6549_v38, 0.0 }
 0x313   : > { %v2817_v62 = vmul.f32 1.442695, %v2705_v4  ;;  %v6556_v14 = vadd.f32 %v2552_v31, %v6330_v63  ;;  %v2554_v13 = vpop.f32.mrb[83].mxu1  ;;  %v2955_v44 = vadd.f32 %v2891_v2, %v2635_v15 }
 0x314   : > { %v4627_v61 = vpop.eup %4626  ;;  %v2819_v40 = vmul.f32 1.442695, %v2706_v47  ;;  %v6559_v27 = vadd.f32 %v2554_v13, %v6333_v7  ;;  %v2956_v11 = vadd.f32 %v2892_v53, %v2636_v57  ;;  %v2641_v57 = vmax.f32 %v6546_v9, 0.0 }
 0x315   : > { %v4629_v6 = vpop.eup %4628  ;;  %4634 = vpow2.f32 %v2817_v62  ;;  %v2707_v58 = vmin.f32 %v6556_v14, 0.0  ;;  %v2893_v42 = vmul.f32 1.6732632, %v4627_v61 }
 0x316   : > { %4636 = vpow2.f32 %v2819_v40  ;;  %v2708_v28 = vmin.f32 %v6559_v27, 0.0  ;;  %v2558_v17 = vpop.f32.mrb[84].mxu1  ;;  %3243 = vmatprep.mubr.f32.mxu0 %v2956_v11  ;;  %v2894_v23 = vmul.f32 1.6732632, %v4629_v6  ;;  %v2644_v9 = vmax.f32 %v6559_v27, 0.0 }
 0x317   : > { %v2821_v16 = vmul.f32 1.442695, %v2707_v58  ;;  %v6566_v34 = vadd.f32 %v2558_v17, %v6330_v63  ;;  %v2560_v8 = vpop.f32.mrb[85].mxu1  ;;  %3244 = vmatmul.mubr.f32.gmra.mrb[74].mxu0 %v2955_v44  ;;  %v2957_v21 = vadd.f32 %v2893_v42, %v2637_v59 }
 0x318   : > { %v4631_v26 = vpop.eup %4630  ;;  %v2823_v48 = vmul.f32 1.442695, %v2708_v28  ;;  %v6569_v43 = vadd.f32 %v2560_v8, %v6333_v7  ;;  %v2958_v1 = vadd.f32 %v2894_v23, %v2638_v55  ;;  %v2643_v55 = vmax.f32 %v6556_v14, 0.0 }
 0x319   : > { %v4633_v45 = vpop.eup %4632  ;;  %4638 = vpow2.f32 %v2821_v16  ;;  %v2709_v46 = vmin.f32 %v6566_v34, 0.0  ;;  %v2895_v51 = vmul.f32 1.6732632, %v4631_v26 }
 0x31a   : > { %4640 = vpow2.f32 %v2823_v48  ;;  %v2710_v52 = vmin.f32 %v6569_v43, 0.0  ;;  %v2564_v32 = vpop.f32.mrb[86].mxu1  ;;  %3249 = vmatprep.mubr.f32.mxu0 %v2958_v1  ;;  %v2896_v39 = vmul.f32 1.6732632, %v4633_v45  ;;  %v2646_v14 = vmax.f32 %v6569_v43, 0.0 }
 0x31b   : > { %v2825_v10 = vmul.f32 1.442695, %v2709_v46  ;;  %v6576_v49 = vadd.f32 %v2564_v32, %v6330_v63  ;;  %v2566_v29 = vpop.f32.mrb[87].mxu1  ;;  %3250 = vmatmul.mubr.f32.gmra.mrb[76].mxu0 %v2957_v21  ;;  %v2959_v3 = vadd.f32 %v2895_v51, %v2639_v41 }
 0x31c   : > { %v2827_v60 = vmul.f32 1.442695, %v2710_v52  ;;  %v6579_v0 = vadd.f32 %v2566_v29, %v6333_v7  ;;  %v2960_v22 = vadd.f32 %v2896_v39, %v2640_v18  ;;  %v2645_v18 = vmax.f32 %v6566_v34, 0.0 }
 0x31d   : > { %4642 = vpow2.f32 %v2825_v10  ;;  %v2711_v12 = vmin.f32 %v6576_v49, 0.0 }
 0x31e   : > { %4644 = vpow2.f32 %v2827_v60  ;;  %v2712_v19 = vmin.f32 %v6579_v0, 0.0  ;;  %v2570_v20 = vpop.f32.mrb[88].mxu1  ;;  %3255 = vmatprep.mubr.f32.mxu0 %v2960_v22  ;;  %v2648_v34 = vmax.f32 %v6579_v0, 0.0 }
 0x31f   : > { %v4635_v33 = vpop.eup %4634  ;;  %v2829_v24 = vmul.f32 1.442695, %v2711_v12  ;;  %v6584_v30 = vadd.f32 %v2570_v20, %v6330_v63  ;;  %v2572_v5 = vpop.f32.mrb[89].mxu1  ;;  %3256 = vmatmul.mubr.f32.gmra.mrb[78].mxu0 %v2959_v3 }
 0x320   : > { %v4637_v25 = vpop.eup %4636  ;;  %v2831_v35 = vmul.f32 1.442695, %v2712_v19  ;;  %v6587_v50 = vadd.f32 %v2572_v5, %v6333_v7  ;;  %v2897_v54 = vmul.f32 1.6732632, %v4635_v33 }
 0x321   : > { %4646 = vpow2.f32 %v2829_v24  ;;  %v2713_v4 = vmin.f32 %v6584_v30, 0.0  ;;  %v2898_v2 = vmul.f32 1.6732632, %v4637_v25  ;;  %v2647_v24 = vmax.f32 %v6576_v49, 0.0 }
 0x322   : > { %4648 = vpow2.f32 %v2831_v35  ;;  %v2714_v47 = vmin.f32 %v6587_v50, 0.0  ;;  %v2576_v31 = vpop.f32.mrb[90].mxu1  ;;  %v2961_v6 = vadd.f32 %v2897_v54, %v2641_v57  ;;  %v2649_v57 = vmax.f32 %v6584_v30, 0.0 }
 0x323   : > { %v4639_v53 = vpop.eup %4638  ;;  %v2833_v15 = vmul.f32 1.442695, %v2713_v4  ;;  %v6594_v62 = vadd.f32 %v2576_v31, %v6330_v63  ;;  %v2578_v13 = vpop.f32.mrb[91].mxu1  ;;  %v2962_v61 = vadd.f32 %v2898_v2, %v2642_v56  ;;  %v2650_v2 = vmax.f32 %v6587_v50, 0.0 }
 0x324   : > { %v4641_v40 = vpop.eup %4640  ;;  %v2835_v11 = vmul.f32 1.442695, %v2714_v47  ;;  %v6597_v38 = vadd.f32 %v2578_v13, %v6333_v7  ;;  %v2899_v58 = vmul.f32 1.6732632, %v4639_v53 }
 0x325   : > { %4650 = vpow2.f32 %v2833_v15  ;;  %v2715_v44 = vmin.f32 %v6594_v62, 0.0  ;;  %3261 = vmatprep.mubr.f32.mxu0 %v2962_v61  ;;  %v2900_v42 = vmul.f32 1.6732632, %v4641_v40  ;;  %v2651_v40 = vmax.f32 %v6594_v62, 0.0 }
 0x326   : > { %4652 = vpow2.f32 %v2835_v11  ;;  %v2716_v28 = vmin.f32 %v6597_v38, 0.0  ;;  %v2582_v17 = vpop.f32.mrb[92].mxu1  ;;  %3262 = vmatmul.mubr.f32.gmra.mrb[80].mxu0 %v2961_v6  ;;  %v2963_v45 = vadd.f32 %v2899_v58, %v2643_v55  ;;  %v2652_v13 = vmax.f32 %v6597_v38, 0.0 }
 0x327   : > { %v4643_v23 = vpop.eup %4642  ;;  %v2837_v59 = vmul.f32 1.442695, %v2715_v44  ;;  %v6604_v16 = vadd.f32 %v2582_v17, %v6330_v63  ;;  %v2584_v8 = vpop.f32.mrb[93].mxu1  ;;  %v2964_v26 = vadd.f32 %v2900_v42, %v2644_v9 }
 0x328   : > { %v4645_v27 = vpop.eup %4644  ;;  %v2839_v48 = vmul.f32 1.442695, %v2716_v28  ;;  %v6607_v1 = vadd.f32 %v2584_v8, %v6333_v7  ;;  %v2901_v46 = vmul.f32 1.6732632, %v4643_v23 }
 0x329   : > { %4654 = vpow2.f32 %v2837_v59  ;;  %v2717_v21 = vmin.f32 %v6604_v16, 0.0  ;;  %3267 = vmatprep.mubr.f32.mxu0 %v2964_v26  ;;  %v2902_v51 = vmul.f32 1.6732632, %v4645_v27  ;;  %v2653_v42 = vmax.f32 %v6604_v16, 0.0  ;;  %v3041_v16 = vld [vmem:[%s7122_s10] sm:$0x3] }
 0x32a   : > { %4656 = vpow2.f32 %v2839_v48  ;;  %v2718_v52 = vmin.f32 %v6607_v1, 0.0  ;;  %v2588_v32 = vpop.f32.mrb[94].mxu1  ;;  %3268 = vmatmul.mubr.f32.gmra.mrb[82].mxu0 %v2963_v45  ;;  %v2965_v3 = vadd.f32 %v2901_v46, %v2645_v18  ;;  %v2654_v30 = vmax.f32 %v6607_v1, 0.0 }
 0x32b   : > { %v4647_v39 = vpop.eup %4646  ;;  %v2841_v41 = vmul.f32 1.442695, %v2717_v21  ;;  %v6614_v10 = vadd.f32 %v2588_v32, %v6330_v63  ;;  %v2590_v29 = vpop.f32.mrb[95].mxu1  ;;  %v2966_v60 = vadd.f32 %v2902_v51, %v2646_v14  ;;  %v6631_v48 = vrot.slane %v3041_v16, %v5231_v36 }
 0x32c   : > { %v4649_v43 = vpop.eup %4648  ;;  %v2843_v22 = vmul.f32 1.442695, %v2718_v52  ;;  %v2591_v12 = vadd.f32 %v2590_v29, %v6333_v7  ;;  %v2903_v19 = vmul.f32 1.6732632, %v4647_v39  ;;  %v6634_v1 = vrot.slane %v3041_v16, %v5233_v37 }
 0x32d   : > { %4658 = vpow2.f32 %v2841_v41  ;;  %v2719_v20 = vmin.f32 %v6614_v10, 0.0  ;;  %3273 = vmatprep.mubr.f32.mxu0 %v2966_v60  ;;  %v2904_v33 = vmul.f32 1.6732632, %v4649_v43  ;;  %v2655_v8 = vmax.f32 %v6614_v10, 0.0 }
 0x32e   : > { %4660 = vpow2.f32 %v2843_v22  ;;  %v2720_v63 = vmin.f32 %v2591_v12, 0.0  ;;  %3274 = vmatmul.mubr.f32.gmra.mrb[84].mxu0 %v2965_v3  ;;  %v2967_v7 = vadd.f32 %v2903_v19, %v2647_v24  ;;  %v2656_v59 = vmax.f32 %v2591_v12, 0.0 }
 0x32f   : > { %v4651_v5 = vpop.eup %4650  ;;  %v2845_v25 = vmul.f32 1.442695, %v2719_v20  ;;  %v2968_v35 = vadd.f32 %v2904_v33, %v2648_v34 }
 0x330   : > { %v4653_v54 = vpop.eup %4652  ;;  %v2847_v56 = vmul.f32 1.442695, %v2720_v63  ;;  %v2905_v4 = vmul.f32 1.6732632, %v4651_v5 }
 0x331   : > { %4662 = vpow2.f32 %v2845_v25  ;;  %3279 = vmatprep.mubr.f32.mxu0 %v2968_v35  ;;  %v2906_v0 = vmul.f32 1.6732632, %v4653_v54  ;;  %v3694_v25 = vld [vmem:[%s7123_s11] sm:$0x3] }
 0x332   : > { %4664 = vpow2.f32 %v2847_v56  ;;  %3280 = vmatmul.mubr.f32.gmra.mrb[86].mxu0 %v2967_v7  ;;  %v2969_v53 = vadd.f32 %v2905_v4, %v2649_v57  ;;  %v6646_v4 = vrot.slane %v3694_v25, %v5231_v36 }
 0x333   : > { %v4655_v49 = vpop.eup %4654  ;;  %v2970_v47 = vadd.f32 %v2906_v0, %v2650_v2 }
 0x334   : > { %v4657_v31 = vpop.eup %4656  ;;  %v2907_v15 = vmul.f32 1.6732632, %v4655_v49  ;;  %v6649_v49 = vrot.slane %v3694_v25, %v5233_v37 }
 0x335   : > { %3285 = vmatprep.mubr.f32.mxu0 %v2970_v47  ;;  %v2908_v61 = vmul.f32 1.6732632, %v4657_v31 }
 0x336   : > { %3286 = vmatmul.mubr.f32.gmra.mrb[88].mxu0 %v2969_v53  ;;  %v2971_v58 = vadd.f32 %v2907_v15, %v2651_v40 }
 0x337   : > { %v4659_v50 = vpop.eup %4658  ;;  %v2972_v11 = vadd.f32 %v2908_v61, %v2652_v13 }
 0x338   : > { %v4661_v6 = vpop.eup %4660  ;;  %v2909_v9 = vmul.f32 1.6732632, %v4659_v50 }
 0x339   : > { %3291 = vmatprep.mubr.f32.mxu0 %v2972_v11  ;;  %v2910_v44 = vmul.f32 1.6732632, %v4661_v6 }
 0x33a   : > { %3292 = vmatmul.mubr.f32.gmra.mrb[90].mxu0 %v2971_v58  ;;  %v2973_v17 = vadd.f32 %v2909_v9, %v2653_v42 }
 0x33b   : > { %v4663_v55 = vpop.eup %4662  ;;  %v2974_v28 = vadd.f32 %v2910_v44, %v2654_v30 }
 0x33c   : > { %v4665_v38 = vpop.eup %4664  ;;  %v2911_v23 = vmul.f32 1.6732632, %v4663_v55 }
 0x33d   : > { %3297 = vmatprep.mubr.f32.mxu0 %v2974_v28  ;;  %v2912_v62 = vmul.f32 1.6732632, %v4665_v38 }
 0x33e   : > { %3298 = vmatmul.mubr.f32.gmra.mrb[92].mxu0 %v2973_v17  ;;  %v2975_v27 = vadd.f32 %v2911_v23, %v2655_v8 }
 0x33f   : > { %v2976_v26 = vadd.f32 %v2912_v62, %v2656_v59 }
 0x341   : > { %3303 = vmatprep.mubr.f32.mxu0 %v2976_v26 }
 0x342   : > { %3304 = vmatmul.mubr.f32.gmra.mrb[94].mxu0 %v2975_v27 }
 0x37f   : > { %v3119_v45 = vpop.f32.mrb[32].mxu0 }
 0x380   : > { %v3120_v46 = vadd.f32 %v3119_v45, %v6631_v48  ;;  %v3121_v14 = vpop.f32.mrb[33].mxu0 }
 0x381   : > { %v3122_v21 = vadd.f32 %v3121_v14, %v6634_v1 }
 0x382   : > { %v3374_v51 = vmin.f32 %v3120_v46, 0.0  ;;  %v3310_v56 = vmax.f32 %v3120_v46, 0.0 }
 0x383   : > { %v3375_v18 = vmin.f32 %v3122_v21, 0.0  ;;  %v3125_v52 = vpop.f32.mrb[34].mxu0  ;;  %v3311_v2 = vmax.f32 %v3122_v21, 0.0 }
 0x384   : > { %v3438_v32 = vmul.f32 1.442695, %v3374_v51  ;;  %v3126_v39 = vadd.f32 %v3125_v52, %v6631_v48  ;;  %v3127_v41 = vpop.f32.mrb[35].mxu0 }
 0x385   : > { %v3440_v10 = vmul.f32 1.442695, %v3375_v18  ;;  %v3128_v29 = vadd.f32 %v3127_v41, %v6634_v1 }
 0x386   : > { %4666 = vpow2.f32 %v3438_v32  ;;  %v3376_v60 = vmin.f32 %v3126_v39, 0.0  ;;  %v3312_v50 = vmax.f32 %v3126_v39, 0.0 }
 0x387   : > { %4668 = vpow2.f32 %v3440_v10  ;;  %v3377_v43 = vmin.f32 %v3128_v29, 0.0  ;;  %v3131_v22 = vpop.f32.mrb[36].mxu0  ;;  %v3313_v58 = vmax.f32 %v3128_v29, 0.0 }
 0x388   : > { %v3442_v12 = vmul.f32 1.442695, %v3376_v60  ;;  %v3132_v3 = vadd.f32 %v3131_v22, %v6631_v48  ;;  %v3133_v19 = vpop.f32.mrb[37].mxu0 }
 0x389   : > { %v3444_v34 = vmul.f32 1.442695, %v3377_v43  ;;  %v3134_v20 = vadd.f32 %v3133_v19, %v6634_v1 }
 0x38a   : > { %4670 = vpow2.f32 %v3442_v12  ;;  %v3378_v33 = vmin.f32 %v3132_v3, 0.0  ;;  %v3314_v27 = vmax.f32 %v3132_v3, 0.0 }
 0x38b   : > { %4672 = vpow2.f32 %v3444_v34  ;;  %v3379_v24 = vmin.f32 %v3134_v20, 0.0  ;;  %v3315_v46 = vmax.f32 %v3134_v20, 0.0 }
 0x38c   : > { %v3446_v63 = vmul.f32 1.442695, %v3378_v33 }
 0x38d   : > { %v3448_v5 = vmul.f32 1.442695, %v3379_v24 }
 0x38e   : > { %4674 = vpow2.f32 %v3446_v63 }
 0x38f   : > { %4676 = vpow2.f32 %v3448_v5  ;;  %v3137_v57 = vpop.f32.mrb[38].mxu0 }
 0x390   : > { %v4667_v35 = vpop.eup %4666  ;;  %v6652_v31 = vadd.f32 %v3137_v57, %v6631_v48  ;;  %v3139_v53 = vpop.f32.mrb[39].mxu0 }
 0x391   : > { %v4669_v54 = vpop.eup %4668  ;;  %v3566_v7 = vmul.f32 1.6732632, %v4667_v35  ;;  %v6655_v61 = vadd.f32 %v3139_v53, %v6634_v1 }
 0x392   : > { %v3567_v0 = vmul.f32 1.6732632, %v4669_v54  ;;  %v3380_v11 = vmin.f32 %v6652_v31, 0.0  ;;  %v3316_v35 = vmax.f32 %v6652_v31, 0.0 }
 0x393   : > { %v3630_v47 = vadd.f32 %v3566_v7, %v3310_v56  ;;  %v3381_v9 = vmin.f32 %v6655_v61, 0.0  ;;  %v3143_v30 = vpop.f32.mrb[40].mxu0 }
 0x394   : > { %v4671_v15 = vpop.eup %4670  ;;  %v3631_v13 = vadd.f32 %v3567_v0, %v3311_v2  ;;  %v3450_v55 = vmul.f32 1.442695, %v3380_v11  ;;  %v6662_v28 = vadd.f32 %v3143_v30, %v6631_v48  ;;  %v3145_v38 = vpop.f32.mrb[41].mxu0  ;;  %v3317_v2 = vmax.f32 %v6655_v61, 0.0 }
 0x395   : > { %v4673_v40 = vpop.eup %4672  ;;  %v3568_v36 = vmul.f32 1.6732632, %v4671_v15  ;;  %v3706_v6 = vmul.f32 %v6646_v4, %v3630_v47  ;;  %v3452_v59 = vmul.f32 1.442695, %v3381_v9  ;;  %v6665_v62 = vadd.f32 %v3145_v38, %v6634_v1 }
 0x396   : > { %v3569_v37 = vmul.f32 1.6732632, %v4673_v40  ;;  %v3707_v44 = vmul.f32 %v6649_v49, %v3631_v13  ;;  %4678 = vpow2.f32 %v3450_v55  ;;  %v3382_v45 = vmin.f32 %v6662_v28, 0.0 }
 0x397   : > { %v3632_v42 = vadd.f32 %v3568_v36, %v3312_v50  ;;  %4680 = vpow2.f32 %v3452_v59  ;;  %v3383_v21 = vmin.f32 %v6665_v62, 0.0  ;;  %v3318_v31 = vmax.f32 %v6662_v28, 0.0 }
 0x398   : > { %v4675_v17 = vpop.eup %4674  ;;  %v3633_v23 = vadd.f32 %v3569_v37, %v3313_v58  ;;  %v3770_v8 = vadd.f32 %v3707_v44, %v3706_v6  ;;  %v3454_v18 = vmul.f32 1.442695, %v3382_v45  ;;  %v3319_v40 = vmax.f32 %v6665_v62, 0.0 }
 0x399   : > { %v4677_v26 = vpop.eup %4676  ;;  %v3570_v16 = vmul.f32 1.6732632, %v4675_v17  ;;  %v3708_v52 = vmul.f32 %v6646_v4, %v3632_v42  ;;  %v3456_v41 = vmul.f32 1.442695, %v3383_v21 }
 0x39a   : > { %v3571_v14 = vmul.f32 1.6732632, %v4677_v26  ;;  %3771 = vadd.xlane.f32.xlu0 %v3770_v8  ;;  %v3709_v32 = vmul.f32 %v6649_v49, %v3633_v23  ;;  %4682 = vpow2.f32 %v3454_v18 }
 0x39b   : > { %v3634_v51 = vadd.f32 %v3570_v16, %v3314_v27  ;;  %v3149_v10 = vpop.f32.mrb[42].mxu0  ;;  %4684 = vpow2.f32 %v3456_v41 }
 0x39c   : > { %v3635_v39 = vadd.f32 %v3571_v14, %v3315_v46  ;;  %v3773_v29 = vadd.f32 %v3709_v32, %v3708_v52  ;;  %v6673_v43 = vadd.f32 %v3149_v10, %v6631_v48  ;;  %v3151_v22 = vpop.f32.mrb[43].mxu0 }
 0x39d   : > { %v3710_v60 = vmul.f32 %v6646_v4, %v3634_v51  ;;  %v6677_v3 = vadd.f32 %v3151_v22, %v6634_v1 }
 0x39e   : > { %v3711_v12 = vmul.f32 %v6649_v49, %v3635_v39  ;;  %3774 = vadd.xlane.f32.xlu1 %v3773_v29  ;;  %v3384_v19 = vmin.f32 %v6673_v43, 0.0  ;;  %v3320_v52 = vmax.f32 %v6673_v43, 0.0 }
 0x39f   : > { %v3385_v20 = vmin.f32 %v6677_v3, 0.0  ;;  %v3321_v41 = vmax.f32 %v6677_v3, 0.0 }
 0x3a0   : > { %v3776_v34 = vadd.f32 %v3711_v12, %v3710_v60  ;;  %v3458_v33 = vmul.f32 1.442695, %v3384_v19  ;;  %v4679_v24 = vpop.eup %4678 }
 0x3a1   : > { %v3460_v63 = vmul.f32 1.442695, %v3385_v20  ;;  %v3155_v5 = vpop.f32.mrb[44].mxu0  ;;  %v4681_v25 = vpop.eup %4680  ;;  %v3572_v54 = vmul.f32 1.6732632, %v4679_v24 }
 0x3a2   : > { %3777 = vadd.xlane.f32.xlu0 %v3776_v34  ;;  %4686 = vpow2.f32 %v3458_v33  ;;  %v6683_v56 = vadd.f32 %v3155_v5, %v6631_v48  ;;  %v3157_v7 = vpop.f32.mrb[45].mxu0  ;;  %v3573_v0 = vmul.f32 1.6732632, %v4681_v25 }
 0x3a3   : > { %4688 = vpow2.f32 %v3460_v63  ;;  %v6687_v57 = vadd.f32 %v3157_v7, %v6634_v1  ;;  %v3636_v47 = vadd.f32 %v3572_v54, %v3316_v35 }
 0x3a4   : > { %v3386_v53 = vmin.f32 %v6683_v56, 0.0  ;;  %v4683_v15 = vpop.eup %4682  ;;  %v3637_v13 = vadd.f32 %v3573_v0, %v3317_v2  ;;  %v3322_v35 = vmax.f32 %v6683_v56, 0.0 }
 0x3a5   : > { %v3387_v50 = vmin.f32 %v6687_v57, 0.0  ;;  %v3161_v36 = vpop.f32.mrb[46].mxu0  ;;  %v4685_v11 = vpop.eup %4684  ;;  %v3574_v6 = vmul.f32 1.6732632, %v4683_v15  ;;  %v3712_v9 = vmul.f32 %v6646_v4, %v3636_v47  ;;  %v3323_v2 = vmax.f32 %v6687_v57, 0.0 }
 0x3a6   : > { %v3462_v61 = vmul.f32 1.442695, %v3386_v53  ;;  %v6694_v58 = vadd.f32 %v3161_v36, %v6631_v48  ;;  %v3163_v37 = vpop.f32.mrb[47].mxu0  ;;  %v3575_v30 = vmul.f32 1.6732632, %v4685_v11  ;;  %v3713_v55 = vmul.f32 %v6649_v49, %v3637_v13 }
 0x3a7   : > { %v3464_v44 = vmul.f32 1.442695, %v3387_v50  ;;  %v6698_v42 = vadd.f32 %v3163_v37, %v6634_v1  ;;  %v3638_v28 = vadd.f32 %v3574_v6, %v3318_v31 }
 0x3a8   : > { %4690 = vpow2.f32 %v3462_v61  ;;  %v3388_v38 = vmin.f32 %v6694_v58, 0.0  ;;  %v3639_v17 = vadd.f32 %v3575_v30, %v3319_v40  ;;  %v3779_v27 = vadd.f32 %v3713_v55, %v3712_v9 }
 0x3a9   : > { %4692 = vpow2.f32 %v3464_v44  ;;  %v3389_v23 = vmin.f32 %v6698_v42, 0.0  ;;  %v3167_v59 = vpop.f32.mrb[48].mxu0  ;;  %v3714_v16 = vmul.f32 %v6646_v4, %v3638_v28  ;;  %v3324_v57 = vmax.f32 %v6694_v58, 0.0 }
 0x3aa   : > { %v3466_v62 = vmul.f32 1.442695, %v3388_v38  ;;  %v6704_v8 = vadd.f32 %v3167_v59, %v6631_v48  ;;  %v3169_v26 = vpop.f32.mrb[49].mxu0  ;;  %v3715_v14 = vmul.f32 %v6649_v49, %v3639_v17  ;;  %3780 = vadd.xlane.f32.xlu0 %v3779_v27  ;;  %v3325_v9 = vmax.f32 %v6698_v42, 0.0 }
 0x3ab   : > { %v3468_v45 = vmul.f32 1.442695, %v3389_v23  ;;  %v6708_v46 = vadd.f32 %v3169_v26, %v6634_v1 }
 0x3ac   : > { %v4687_v21 = vpop.eup %4686  ;;  %4694 = vpow2.f32 %v3466_v62  ;;  %v3390_v51 = vmin.f32 %v6704_v8, 0.0  ;;  %v3782_v60 = vadd.f32 %v3715_v14, %v3714_v16 }
 0x3ad   : > { %v4689_v18 = vpop.eup %4688  ;;  %v3576_v32 = vmul.f32 1.6732632, %v4687_v21  ;;  %4696 = vpow2.f32 %v3468_v45  ;;  %v3391_v39 = vmin.f32 %v6708_v46, 0.0  ;;  %v3326_v45 = vmax.f32 %v6704_v8, 0.0 }
 0x3ae   : > { %v3577_v10 = vmul.f32 1.6732632, %v4689_v18  ;;  %v3470_v29 = vmul.f32 1.442695, %v3390_v51  ;;  %3783 = vadd.xlane.f32.xlu1 %v3782_v60  ;;  %v3327_v51 = vmax.f32 %v6708_v46, 0.0 }
 0x3af   : > { %v3640_v22 = vadd.f32 %v3576_v32, %v3320_v52  ;;  %v3472_v12 = vmul.f32 1.442695, %v3391_v39  ;;  %v3173_v19 = vpop.f32.mrb[50].mxu0 }
 0x3b0   : > { %v3641_v34 = vadd.f32 %v3577_v10, %v3321_v41  ;;  %4698 = vpow2.f32 %v3470_v29  ;;  %v6716_v20 = vadd.f32 %v3173_v19, %v6631_v48  ;;  %v3175_v33 = vpop.f32.mrb[51].mxu0 }
 0x3b1   : > { %4700 = vpow2.f32 %v3472_v12  ;;  %v6719_v43 = vadd.f32 %v3175_v33, %v6634_v1  ;;  %v3716_v24 = vmul.f32 %v6646_v4, %v3640_v22 }
 0x3b2   : > { %v4691_v3 = vpop.eup %4690  ;;  %v3392_v63 = vmin.f32 %v6716_v20, 0.0  ;;  %v3717_v5 = vmul.f32 %v6649_v49, %v3641_v34 }
 0x3b3   : > { %v4693_v25 = vpop.eup %4692  ;;  %v3578_v54 = vmul.f32 1.6732632, %v4691_v3  ;;  %v3393_v7 = vmin.f32 %v6719_v43, 0.0 }
 0x3b4   : > { %v3579_v0 = vmul.f32 1.6732632, %v4693_v25  ;;  %v3474_v47 = vmul.f32 1.442695, %v3392_v63  ;;  %v3179_v53 = vpop.f32.mrb[52].mxu0  ;;  %v3785_v15 = vadd.f32 %v3717_v5, %v3716_v24  ;;  %v3328_v5 = vmax.f32 %v6716_v20, 0.0 }
 0x3b5   : > { %v3642_v13 = vadd.f32 %v3578_v54, %v3322_v35  ;;  %v3476_v31 = vmul.f32 1.442695, %v3393_v7  ;;  %v6728_v40 = vadd.f32 %v3179_v53, %v6631_v48  ;;  %v3181_v50 = vpop.f32.mrb[53].mxu0  ;;  %v3329_v7 = vmax.f32 %v6719_v43, 0.0 }
 0x3b6   : > { %v4695_v36 = vpop.eup %4694  ;;  %v3643_v11 = vadd.f32 %v3579_v0, %v3323_v2  ;;  %4702 = vpow2.f32 %v3474_v47  ;;  %v6731_v56 = vadd.f32 %v3181_v50, %v6634_v1  ;;  %3786 = vadd.xlane.f32.xlu0 %v3785_v15 }
 0x3b7   : > { %v4697_v6 = vpop.eup %4696  ;;  %v3580_v61 = vmul.f32 1.6732632, %v4695_v36  ;;  %4704 = vpow2.f32 %v3476_v31  ;;  %v3394_v37 = vmin.f32 %v6728_v40, 0.0  ;;  %v3718_v28 = vmul.f32 %v6646_v4, %v3642_v13 }
 0x3b8   : > { %v3581_v30 = vmul.f32 1.6732632, %v4697_v6  ;;  %v3395_v44 = vmin.f32 %v6731_v56, 0.0  ;;  %v3185_v55 = vpop.f32.mrb[54].mxu0  ;;  %v3719_v58 = vmul.f32 %v6649_v49, %v3643_v11 }
 0x3b9   : > { %v3644_v38 = vadd.f32 %v3580_v61, %v3324_v57  ;;  %v3478_v17 = vmul.f32 1.442695, %v3394_v37  ;;  %v6739_v23 = vadd.f32 %v3185_v55, %v6631_v48  ;;  %v3187_v59 = vpop.f32.mrb[55].mxu0  ;;  %v3330_v61 = vmax.f32 %v6728_v40, 0.0 }
 0x3ba   : > { %v4699_v62 = vpop.eup %4698  ;;  %v3645_v26 = vadd.f32 %v3581_v30, %v3325_v9  ;;  %v3480_v27 = vmul.f32 1.442695, %v3395_v44  ;;  %v6743_v16 = vadd.f32 %v3187_v59, %v6634_v1  ;;  %v3788_v10 = vadd.f32 %v3719_v58, %v3718_v28 }
 0x3bb   : > { %v4701_v42 = vpop.eup %4700  ;;  %v3582_v14 = vmul.f32 1.6732632, %v4699_v62  ;;  %4706 = vpow2.f32 %v3478_v17  ;;  %v3396_v21 = vmin.f32 %v6739_v23, 0.0  ;;  %v3720_v29 = vmul.f32 %v6646_v4, %v3644_v38 }
 0x3bc   : > { %v3583_v18 = vmul.f32 1.6732632, %v4701_v42  ;;  %4708 = vpow2.f32 %v3480_v27  ;;  %v3397_v52 = vmin.f32 %v6743_v16, 0.0  ;;  %v3721_v19 = vmul.f32 %v6649_v49, %v3645_v26  ;;  %3789 = vadd.xlane.f32.xlu1 %v3788_v10 }
 0x3bd   : > { %v3646_v32 = vadd.f32 %v3582_v14, %v3326_v45  ;;  %v3482_v39 = vmul.f32 1.442695, %v3396_v21  ;;  %v3191_v41 = vpop.f32.mrb[56].mxu0  ;;  %v3331_v44 = vmax.f32 %v6731_v56, 0.0  ;;  %v3332_v14 = vmax.f32 %v6739_v23, 0.0 }
 0x3be   : > { %v3647_v60 = vadd.f32 %v3583_v18, %v3327_v51  ;;  %v3484_v22 = vmul.f32 1.442695, %v3397_v52  ;;  %v6751_v8 = vadd.f32 %v3191_v41, %v6631_v48  ;;  %v3193_v12 = vpop.f32.mrb[57].mxu0  ;;  %v3791_v3 = vadd.f32 %v3721_v19, %v3720_v29 }
 0x3bf   : > { %4710 = vpow2.f32 %v3482_v39  ;;  %v6755_v46 = vadd.f32 %v3193_v12, %v6634_v1  ;;  %v3722_v34 = vmul.f32 %v6646_v4, %v3646_v32  ;;  %v3333_v51 = vmax.f32 %v6743_v16, 0.0 }
 0x3c0   : > { %v4703_v33 = vpop.eup %4702  ;;  %4712 = vpow2.f32 %v3484_v22  ;;  %v3398_v24 = vmin.f32 %v6751_v8, 0.0  ;;  %v3723_v54 = vmul.f32 %v6649_v49, %v3647_v60  ;;  %3792 = vadd.xlane.f32.xlu0 %v3791_v3 }
 0x3c1   : > { %v4705_v63 = vpop.eup %4704  ;;  %v3584_v25 = vmul.f32 1.6732632, %v4703_v33  ;;  %v3399_v35 = vmin.f32 %v6755_v46, 0.0  ;;  %v3335_v3 = vmax.f32 %v6755_v46, 0.0 }
 0x3c2   : > { %v3585_v2 = vmul.f32 1.6732632, %v4705_v63  ;;  %v3486_v0 = vmul.f32 1.442695, %v3398_v24  ;;  %v3197_v47 = vpop.f32.mrb[58].mxu0  ;;  %v3794_v50 = vadd.f32 %v3723_v54, %v3722_v34  ;;  %v3334_v34 = vmax.f32 %v6751_v8, 0.0 }
 0x3c3   : > { %v3648_v53 = vadd.f32 %v3584_v25, %v3328_v5  ;;  %v3488_v15 = vmul.f32 1.442695, %v3399_v35  ;;  %v6764_v13 = vadd.f32 %v3197_v47, %v6631_v48  ;;  %v3199_v31 = vpop.f32.mrb[59].mxu0 }
 0x3c4   : > { %v3649_v36 = vadd.f32 %v3585_v2, %v3329_v7  ;;  %4714 = vpow2.f32 %v3486_v0  ;;  %v6767_v20 = vadd.f32 %v3199_v31, %v6634_v1  ;;  %3795 = vadd.xlane.f32.xlu1 %v3794_v50 }
 0x3c5   : > { %v4707_v11 = vpop.eup %4706  ;;  %4716 = vpow2.f32 %v3488_v15  ;;  %v3400_v43 = vmin.f32 %v6764_v13, 0.0  ;;  %v3724_v6 = vmul.f32 %v6646_v4, %v3648_v53  ;;  %v3336_v47 = vmax.f32 %v6764_v13, 0.0 }
 0x3c6   : > { %v4709_v57 = vpop.eup %4708  ;;  %v3586_v37 = vmul.f32 1.6732632, %v4707_v11  ;;  %v3401_v9 = vmin.f32 %v6767_v20, 0.0  ;;  %v3725_v30 = vmul.f32 %v6649_v49, %v3649_v36 }
 0x3c7   : > { %v3587_v55 = vmul.f32 1.6732632, %v4709_v57  ;;  %v3490_v28 = vmul.f32 1.442695, %v3400_v43  ;;  %v3203_v38 = vpop.f32.mrb[60].mxu0  ;;  %v3337_v57 = vmax.f32 %v6767_v20, 0.0 }
 0x3c8   : > { %v3650_v17 = vadd.f32 %v3586_v37, %v3330_v61  ;;  %v3492_v59 = vmul.f32 1.442695, %v3401_v9  ;;  %v6776_v58 = vadd.f32 %v3203_v38, %v6631_v48  ;;  %v3205_v62 = vpop.f32.mrb[61].mxu0  ;;  %v3797_v26 = vadd.f32 %v3725_v30, %v3724_v6 }
 0x3c9   : > { %v4711_v27 = vpop.eup %4710  ;;  %v3651_v42 = vadd.f32 %v3587_v55, %v3331_v44  ;;  %4718 = vpow2.f32 %v3490_v28  ;;  %v6779_v40 = vadd.f32 %v3205_v62, %v6634_v1 }
 0x3ca   : > { %v4713_v45 = vpop.eup %4712  ;;  %v3588_v56 = vmul.f32 1.6732632, %v4711_v27  ;;  %4720 = vpow2.f32 %v3492_v59  ;;  %v3402_v21 = vmin.f32 %v6776_v58, 0.0  ;;  %3798 = vadd.xlane.f32.xlu0 %v3797_v26  ;;  %v3726_v32 = vmul.f32 %v6646_v4, %v3650_v17 }
 0x3cb   : > { %v3589_v18 = vmul.f32 1.6732632, %v4713_v45  ;;  %v3403_v52 = vmin.f32 %v6779_v40, 0.0  ;;  %v3727_v10 = vmul.f32 %v6649_v49, %v3651_v42  ;;  %v3338_v55 = vmax.f32 %v6776_v58, 0.0 }
 0x3cc   : > { %v3652_v39 = vadd.f32 %v3588_v56, %v3332_v14  ;;  %v3494_v41 = vmul.f32 1.442695, %v3402_v21  ;;  %v3339_v21 = vmax.f32 %v6779_v40, 0.0 }
 0x3cd   : > { %v3653_v29 = vadd.f32 %v3589_v18, %v3333_v51  ;;  %v3496_v60 = vmul.f32 1.442695, %v3403_v52  ;;  %v3800_v23 = vadd.f32 %v3727_v10, %v3726_v32 }
 0x3ce   : > { %v4715_v22 = vpop.eup %4714  ;;  %4722 = vpow2.f32 %v3494_v41  ;;  %v3728_v12 = vmul.f32 %v6646_v4, %v3652_v39 }
 0x3cf   : > { %v4717_v19 = vpop.eup %4716  ;;  %v3590_v16 = vmul.f32 1.6732632, %v4715_v22  ;;  %4724 = vpow2.f32 %v3496_v60  ;;  %v3209_v33 = vpop.f32.mrb[62].mxu0  ;;  %v3729_v24 = vmul.f32 %v6649_v49, %v3653_v29  ;;  %3801 = vadd.xlane.f32.xlu1 %v3800_v23 }
 0x3d0   : > { %v3591_v63 = vmul.f32 1.6732632, %v4717_v19  ;;  %v6792_v5 = vadd.f32 %v3209_v33, %v6631_v48  ;;  %v3211_v25 = vpop.f32.mrb[63].mxu0 }
 0x3d1   : > { %v3654_v35 = vadd.f32 %v3590_v16, %v3334_v34  ;;  %v6795_v54 = vadd.f32 %v3211_v25, %v6634_v1  ;;  %v3803_v7 = vadd.f32 %v3729_v24, %v3728_v12 }
 0x3d2   : > { %v3655_v2 = vadd.f32 %v3591_v63, %v3335_v3  ;;  %v3404_v8 = vmin.f32 %v6792_v5, 0.0 }
 0x3d3   : > { %v4719_v0 = vpop.eup %4718  ;;  %v3405_v53 = vmin.f32 %v6795_v54, 0.0  ;;  %v3215_v46 = vpop.f32.mrb[64].mxu0  ;;  %3804 = vadd.xlane.f32.xlu0 %v3803_v7  ;;  %v3730_v15 = vmul.f32 %v6646_v4, %v3654_v35 }
 0x3d4   : > { %v4721_v31 = vpop.eup %4720  ;;  %v3592_v50 = vmul.f32 1.6732632, %v4719_v0  ;;  %v3498_v36 = vmul.f32 1.442695, %v3404_v8  ;;  %v6802_v11 = vadd.f32 %v3215_v46, %v6631_v48  ;;  %v3217_v43 = vpop.f32.mrb[65].mxu0  ;;  %v3731_v6 = vmul.f32 %v6649_v49, %v3655_v2 }
 0x3d5   : > { %v3593_v61 = vmul.f32 1.6732632, %v4721_v31  ;;  %v3500_v37 = vmul.f32 1.442695, %v3405_v53  ;;  %v6807_v13 = vadd.f32 %v3217_v43, %v6634_v1  ;;  %v3340_v2 = vmax.f32 %v6792_v5, 0.0 }
 0x3d6   : > { %v3656_v9 = vadd.f32 %v3592_v50, %v3336_v47  ;;  %4726 = vpow2.f32 %v3498_v36  ;;  %v3406_v30 = vmin.f32 %v6802_v11, 0.0  ;;  %v3806_v26 = vadd.f32 %v3731_v6, %v3730_v15 }
 0x3d7   : > { %v3657_v44 = vadd.f32 %v3593_v61, %v3337_v57  ;;  %4728 = vpow2.f32 %v3500_v37  ;;  %v3407_v28 = vmin.f32 %v6807_v13, 0.0  ;;  %v3221_v38 = vpop.f32.mrb[66].mxu0  ;;  %v3341_v53 = vmax.f32 %v6795_v54, 0.0 }
 0x3d8   : > { %v4723_v17 = vpop.eup %4722  ;;  %v3502_v59 = vmul.f32 1.442695, %v3406_v30  ;;  %v6813_v20 = vadd.f32 %v3221_v38, %v6631_v48  ;;  %v3223_v62 = vpop.f32.mrb[67].mxu0  ;;  %v3732_v27 = vmul.f32 %v6646_v4, %v3656_v9  ;;  %3807 = vadd.xlane.f32.xlu1 %v3806_v26  ;;  %v3342_v5 = vmax.f32 %v6802_v11, 0.0 }
 0x3d9   : > { %v4725_v42 = vpop.eup %4724  ;;  %v3594_v45 = vmul.f32 1.6732632, %v4723_v17  ;;  %v3504_v14 = vmul.f32 1.442695, %v3407_v28  ;;  %v6817_v56 = vadd.f32 %v3223_v62, %v6634_v1  ;;  %v3733_v58 = vmul.f32 %v6649_v49, %v3657_v44 }
 0x3da   : > { %v3595_v51 = vmul.f32 1.6732632, %v4725_v42  ;;  %4730 = vpow2.f32 %v3502_v59  ;;  %v3408_v18 = vmin.f32 %v6813_v20, 0.0  ;;  %v3343_v37 = vmax.f32 %v6807_v13, 0.0 }
 0x3db   : > { %v3658_v52 = vadd.f32 %v3594_v45, %v3338_v55  ;;  %4732 = vpow2.f32 %v3504_v14  ;;  %v3409_v32 = vmin.f32 %v6817_v56, 0.0  ;;  %v3227_v39 = vpop.f32.mrb[68].mxu0  ;;  %v3809_v22 = vadd.f32 %v3733_v58, %v3732_v27 }
 0x3dc   : > { %v3659_v41 = vadd.f32 %v3595_v51, %v3339_v21  ;;  %v3506_v10 = vmul.f32 1.442695, %v3408_v18  ;;  %v6824_v29 = vadd.f32 %v3227_v39, %v6631_v48  ;;  %v3229_v60 = vpop.f32.mrb[69].mxu0  ;;  %v3344_v42 = vmax.f32 %v6813_v20, 0.0 }
 0x3dd   : > { %v3508_v23 = vmul.f32 1.442695, %v3409_v32  ;;  %v6827_v40 = vadd.f32 %v3229_v60, %v6634_v1  ;;  %v3734_v12 = vmul.f32 %v6646_v4, %v3658_v52  ;;  %3810 = vadd.xlane.f32.xlu0 %v3809_v22  ;;  %v3345_v21 = vmax.f32 %v6817_v56, 0.0 }
 0x3de   : > { %4734 = vpow2.f32 %v3506_v10  ;;  %v3410_v19 = vmin.f32 %v6824_v29, 0.0  ;;  %v3735_v34 = vmul.f32 %v6649_v49, %v3659_v41 }
 0x3df   : > { %4736 = vpow2.f32 %v3508_v23  ;;  %v3411_v16 = vmin.f32 %v6827_v40, 0.0  ;;  %v3233_v33 = vpop.f32.mrb[70].mxu0 }
 0x3e0   : > { %v4727_v24 = vpop.eup %4726  ;;  %v3510_v3 = vmul.f32 1.442695, %v3410_v19  ;;  %v6834_v63 = vadd.f32 %v3233_v33, %v6631_v48  ;;  %v3235_v25 = vpop.f32.mrb[71].mxu0  ;;  %v3812_v35 = vadd.f32 %v3735_v34, %v3734_v12  ;;  %v3347_v33 = vmax.f32 %v6827_v40, 0.0 }
 0x3e1   : > { %v4729_v7 = vpop.eup %4728  ;;  %v3596_v8 = vmul.f32 1.6732632, %v4727_v24  ;;  %v3512_v0 = vmul.f32 1.442695, %v3411_v16  ;;  %v6838_v47 = vadd.f32 %v3235_v25, %v6634_v1  ;;  %v3346_v16 = vmax.f32 %v6824_v29, 0.0 }
 0x3e2   : > { %v3597_v46 = vmul.f32 1.6732632, %v4729_v7  ;;  %4738 = vpow2.f32 %v3510_v3  ;;  %v3412_v15 = vmin.f32 %v6834_v63, 0.0  ;;  %3813 = vadd.xlane.f32.xlu1 %v3812_v35  ;;  %v3348_v29 = vmax.f32 %v6834_v63, 0.0 }
 0x3e3   : > { %v3660_v31 = vadd.f32 %v3596_v8, %v3340_v2  ;;  %4740 = vpow2.f32 %v3512_v0  ;;  %v3413_v50 = vmin.f32 %v6838_v47, 0.0 }
 0x3e4   : > { %v4731_v36 = vpop.eup %4730  ;;  %v3661_v43 = vadd.f32 %v3597_v46, %v3341_v53  ;;  %v3514_v6 = vmul.f32 1.442695, %v3412_v15 }
 0x3e5   : > { %v4733_v57 = vpop.eup %4732  ;;  %v3598_v61 = vmul.f32 1.6732632, %v4731_v36  ;;  %v3516_v9 = vmul.f32 1.442695, %v3413_v50  ;;  %v3239_v54 = vpop.f32.mrb[72].mxu0  ;;  %v3736_v30 = vmul.f32 %v6646_v4, %v3660_v31 }
 0x3e6   : > { %v3599_v44 = vmul.f32 1.6732632, %v4733_v57  ;;  %4742 = vpow2.f32 %v3514_v6  ;;  %v6847_v55 = vadd.f32 %v3239_v54, %v6631_v48  ;;  %v3241_v28 = vpop.f32.mrb[73].mxu0  ;;  %v3737_v38 = vmul.f32 %v6649_v49, %v3661_v43 }
 0x3e7   : > { %v3662_v17 = vadd.f32 %v3598_v61, %v3342_v5  ;;  %4744 = vpow2.f32 %v3516_v9  ;;  %v6851_v11 = vadd.f32 %v3241_v28, %v6634_v1  ;;  %v3349_v5 = vmax.f32 %v6838_v47, 0.0 }
 0x3e8   : > { %v4735_v59 = vpop.eup %4734  ;;  %v3663_v62 = vadd.f32 %v3599_v44, %v3343_v37  ;;  %v3414_v13 = vmin.f32 %v6847_v55, 0.0  ;;  %v3815_v26 = vadd.f32 %v3737_v38, %v3736_v30 }
 0x3e9   : > { %v4737_v27 = vpop.eup %4736  ;;  %v3600_v45 = vmul.f32 1.6732632, %v4735_v59  ;;  %v3415_v14 = vmin.f32 %v6851_v11, 0.0  ;;  %v3738_v58 = vmul.f32 %v6646_v4, %v3662_v17 }
 0x3ea   : > { %v3601_v51 = vmul.f32 1.6732632, %v4737_v27  ;;  %v3518_v18 = vmul.f32 1.442695, %v3414_v13  ;;  %v3245_v52 = vpop.f32.mrb[74].mxu0  ;;  %3816 = vadd.xlane.f32.xlu0 %v3815_v26  ;;  %v3739_v32 = vmul.f32 %v6649_v49, %v3663_v62  ;;  %v3350_v13 = vmax.f32 %v6847_v55, 0.0 }
 0x3eb   : > { %v3664_v39 = vadd.f32 %v3600_v45, %v3344_v42  ;;  %v3520_v41 = vmul.f32 1.442695, %v3415_v14  ;;  %v6860_v10 = vadd.f32 %v3245_v52, %v6631_v48  ;;  %v3247_v60 = vpop.f32.mrb[75].mxu0 }
 0x3ec   : > { %v4739_v20 = vpop.eup %4738  ;;  %v3665_v22 = vadd.f32 %v3601_v51, %v3345_v21  ;;  %4746 = vpow2.f32 %v3518_v18  ;;  %v6863_v23 = vadd.f32 %v3247_v60, %v6634_v1  ;;  %v3818_v12 = vadd.f32 %v3739_v32, %v3738_v58 }
 0x3ed   : > { %v4741_v56 = vpop.eup %4740  ;;  %v3602_v19 = vmul.f32 1.6732632, %v4739_v20  ;;  %4748 = vpow2.f32 %v3520_v41  ;;  %v3416_v34 = vmin.f32 %v6860_v10, 0.0  ;;  %v3740_v8 = vmul.f32 %v6646_v4, %v3664_v39 }
 0x3ee   : > { %v3603_v24 = vmul.f32 1.6732632, %v4741_v56  ;;  %v3417_v3 = vmin.f32 %v6863_v23, 0.0  ;;  %v3251_v25 = vpop.f32.mrb[76].mxu0  ;;  %3819 = vadd.xlane.f32.xlu1 %v3818_v12  ;;  %v3741_v0 = vmul.f32 %v6649_v49, %v3665_v22  ;;  %v3351_v51 = vmax.f32 %v6851_v11, 0.0 }
 0x3ef   : > { %v3522_v35 = vmul.f32 1.442695, %v3416_v34  ;;  %v6870_v7 = vadd.f32 %v3251_v25, %v6631_v48  ;;  %v3253_v2 = vpop.f32.mrb[77].mxu0  ;;  %v3666_v46 = vadd.f32 %v3602_v19, %v3346_v16  ;;  %v3352_v19 = vmax.f32 %v6860_v10, 0.0 }
 0x3f0   : > { %v4743_v53 = vpop.eup %4742  ;;  %v3524_v15 = vmul.f32 1.442695, %v3417_v3  ;;  %v6876_v40 = vadd.f32 %v3253_v2, %v6634_v1  ;;  %v3667_v50 = vadd.f32 %v3603_v24, %v3347_v33  ;;  %v3821_v30 = vadd.f32 %v3741_v0, %v3740_v8 }
 0x3f1   : > { %v4745_v31 = vpop.eup %4744  ;;  %v3604_v36 = vmul.f32 1.6732632, %v4743_v53  ;;  %4750 = vpow2.f32 %v3522_v35  ;;  %v3418_v43 = vmin.f32 %v6870_v7, 0.0  ;;  %v3742_v17 = vmul.f32 %v6646_v4, %v3666_v46 }
 0x3f2   : > { %v3605_v6 = vmul.f32 1.6732632, %v4745_v31  ;;  %4752 = vpow2.f32 %v3524_v15  ;;  %v3419_v57 = vmin.f32 %v6876_v40, 0.0  ;;  %v3257_v61 = vpop.f32.mrb[78].mxu0  ;;  %3822 = vadd.xlane.f32.xlu0 %v3821_v30  ;;  %v3743_v59 = vmul.f32 %v6649_v49, %v3667_v50 }
 0x3f3   : > { %v3668_v37 = vadd.f32 %v3604_v36, %v3348_v29  ;;  %v3526_v9 = vmul.f32 1.442695, %v3418_v43  ;;  %v6882_v63 = vadd.f32 %v3257_v61, %v6631_v48  ;;  %v3259_v54 = vpop.f32.mrb[79].mxu0  ;;  %v3353_v24 = vmax.f32 %v6863_v23, 0.0 }
 0x3f4   : > { %v3669_v44 = vadd.f32 %v3605_v6, %v3349_v5  ;;  %v3528_v28 = vmul.f32 1.442695, %v3419_v57  ;;  %v6885_v38 = vadd.f32 %v3259_v54, %v6634_v1  ;;  %v3824_v58 = vadd.f32 %v3743_v59, %v3742_v17 }
 0x3f5   : > { %4754 = vpow2.f32 %v3526_v9  ;;  %v3420_v47 = vmin.f32 %v6882_v63, 0.0  ;;  %v3744_v27 = vmul.f32 %v6646_v4, %v3668_v37  ;;  %v3354_v23 = vmax.f32 %v6870_v7, 0.0 }
 0x3f6   : > { %v4747_v62 = vpop.eup %4746  ;;  %4756 = vpow2.f32 %v3528_v28  ;;  %v3421_v26 = vmin.f32 %v6885_v38, 0.0  ;;  %v3745_v21 = vmul.f32 %v6649_v49, %v3669_v44  ;;  %3825 = vadd.xlane.f32.xlu1 %v3824_v58  ;;  %v3355_v5 = vmax.f32 %v6876_v40, 0.0 }
 0x3f7   : > { %v4749_v42 = vpop.eup %4748  ;;  %v3606_v45 = vmul.f32 1.6732632, %v4747_v62  ;;  %v3530_v14 = vmul.f32 1.442695, %v3420_v47  ;;  %v3356_v37 = vmax.f32 %v6882_v63, 0.0 }
 0x3f8   : > { %v3607_v18 = vmul.f32 1.6732632, %v4749_v42  ;;  %v3532_v52 = vmul.f32 1.442695, %v3421_v26  ;;  %v3827_v55 = vadd.f32 %v3745_v21, %v3744_v27  ;;  %v3357_v26 = vmax.f32 %v6885_v38, 0.0 }
 0x3f9   : > { %v3670_v32 = vadd.f32 %v3606_v45, %v3350_v13  ;;  %4758 = vpow2.f32 %v3530_v14  ;;  %v3263_v39 = vpop.f32.mrb[80].mxu0 }
 0x3fa   : > { %v3671_v41 = vadd.f32 %v3607_v18, %v3351_v51  ;;  %4760 = vpow2.f32 %v3532_v52  ;;  %v6896_v60 = vadd.f32 %v3263_v39, %v6631_v48  ;;  %v3265_v20 = vpop.f32.mrb[81].mxu0  ;;  %3828 = vadd.xlane.f32.xlu0 %v3827_v55 }
 0x3fb   : > { %v4751_v22 = vpop.eup %4750  ;;  %v6899_v12 = vadd.f32 %v3265_v20, %v6634_v1  ;;  %v3746_v11 = vmul.f32 %v6646_v4, %v3670_v32 }
 0x3fc   : > { %v4753_v56 = vpop.eup %4752  ;;  %v3608_v34 = vmul.f32 1.6732632, %v4751_v22  ;;  %v3422_v16 = vmin.f32 %v6896_v60, 0.0  ;;  %v3747_v33 = vmul.f32 %v6649_v49, %v3671_v41 }
 0x3fd   : > { %v3609_v3 = vmul.f32 1.6732632, %v4753_v56  ;;  %v3423_v25 = vmin.f32 %v6899_v12, 0.0  ;;  %v3269_v35 = vpop.f32.mrb[82].mxu0 }
 0x3fe   : > { %v3672_v2 = vadd.f32 %v3608_v34, %v3352_v19  ;;  %v3534_v8 = vmul.f32 1.442695, %v3422_v16  ;;  %v6908_v0 = vadd.f32 %v3269_v35, %v6631_v48  ;;  %v3271_v53 = vpop.f32.mrb[83].mxu0  ;;  %v3830_v46 = vadd.f32 %v3747_v33, %v3746_v11 }
 0x3ff   : > { %v4755_v29 = vpop.eup %4754  ;;  %v3673_v10 = vadd.f32 %v3609_v3, %v3353_v24  ;;  %v3536_v15 = vmul.f32 1.442695, %v3423_v25  ;;  %v6911_v31 = vadd.f32 %v3271_v53, %v6634_v1  ;;  %v3358_v25 = vmax.f32 %v6896_v60, 0.0 }
 0x400   : > { %v4757_v50 = vpop.eup %4756  ;;  %v3610_v36 = vmul.f32 1.6732632, %v4755_v29  ;;  %4762 = vpow2.f32 %v3534_v8  ;;  %v3424_v43 = vmin.f32 %v6908_v0, 0.0  ;;  %3831 = vadd.xlane.f32.xlu1 %v3830_v46  ;;  %v3748_v7 = vmul.f32 %v6646_v4, %v3672_v2 }
 0x401   : > { %v3611_v6 = vmul.f32 1.6732632, %v4757_v50  ;;  %4764 = vpow2.f32 %v3536_v15  ;;  %v3425_v57 = vmin.f32 %v6911_v31, 0.0  ;;  %v3275_v61 = vpop.f32.mrb[84].mxu0  ;;  %v3749_v40 = vmul.f32 %v6649_v49, %v3673_v10 }
 0x402   : > { %v3538_v9 = vmul.f32 1.442695, %v3424_v43  ;;  %v6919_v54 = vadd.f32 %v3275_v61, %v6631_v48  ;;  %v3277_v30 = vpop.f32.mrb[85].mxu0  ;;  %v3674_v28 = vadd.f32 %v3610_v36, %v3354_v23  ;;  %v3359_v53 = vmax.f32 %v6899_v12, 0.0 }
 0x403   : > { %v4759_v44 = vpop.eup %4758  ;;  %v3540_v17 = vmul.f32 1.442695, %v3425_v57  ;;  %v6923_v47 = vadd.f32 %v3277_v30, %v6634_v1  ;;  %v3675_v62 = vadd.f32 %v3611_v6, %v3355_v5  ;;  %v3833_v18 = vadd.f32 %v3749_v40, %v3748_v7 }
 0x404   : > { %v4761_v59 = vpop.eup %4760  ;;  %v3612_v13 = vmul.f32 1.6732632, %v4759_v44  ;;  %4766 = vpow2.f32 %v3538_v9  ;;  %v3426_v63 = vmin.f32 %v6919_v54, 0.0  ;;  %v3750_v55 = vmul.f32 %v6646_v4, %v3674_v28 }
 0x405   : > { %v3613_v27 = vmul.f32 1.6732632, %v4761_v59  ;;  %4768 = vpow2.f32 %v3540_v17  ;;  %v3427_v42 = vmin.f32 %v6923_v47, 0.0  ;;  %v3281_v45 = vpop.f32.mrb[86].mxu0  ;;  %3834 = vadd.xlane.f32.xlu0 %v3833_v18  ;;  %v3751_v41 = vmul.f32 %v6649_v49, %v3675_v62 }
 0x406   : > { %v3676_v14 = vadd.f32 %v3612_v13, %v3356_v37  ;;  %v3542_v58 = vmul.f32 1.442695, %v3426_v63  ;;  %v6930_v21 = vadd.f32 %v3281_v45, %v6631_v48  ;;  %v3283_v51 = vpop.f32.mrb[87].mxu0  ;;  %v3360_v15 = vmax.f32 %v6908_v0, 0.0 }
 0x407   : > { %v3677_v52 = vadd.f32 %v3613_v27, %v3357_v26  ;;  %v3544_v32 = vmul.f32 1.442695, %v3427_v42  ;;  %v6933_v39 = vadd.f32 %v3283_v51, %v6634_v1  ;;  %v3836_v33 = vadd.f32 %v3751_v41, %v3750_v55 }
 0x408   : > { %4770 = vpow2.f32 %v3542_v58  ;;  %v3428_v38 = vmin.f32 %v6930_v21, 0.0  ;;  %v3752_v11 = vmul.f32 %v6646_v4, %v3676_v14  ;;  %v3361_v37 = vmax.f32 %v6911_v31, 0.0 }
 0x409   : > { %4772 = vpow2.f32 %v3544_v32  ;;  %v3429_v20 = vmin.f32 %v6933_v39, 0.0  ;;  %v3287_v22 = vpop.f32.mrb[88].mxu0  ;;  %v3753_v24 = vmul.f32 %v6649_v49, %v3677_v52  ;;  %3837 = vadd.xlane.f32.xlu1 %v3836_v33  ;;  %v3362_v7 = vmax.f32 %v6919_v54, 0.0 }
 0x40a   : > { %v4763_v56 = vpop.eup %4762  ;;  %v3546_v19 = vmul.f32 1.442695, %v3428_v38  ;;  %v6941_v34 = vadd.f32 %v3287_v22, %v6631_v48  ;;  %v3289_v16 = vpop.f32.mrb[89].mxu0  ;;  %v3363_v17 = vmax.f32 %v6923_v47, 0.0  ;;  %v3364_v51 = vmax.f32 %v6930_v21, 0.0 }
 0x40b   : > { %v4765_v3 = vpop.eup %4764  ;;  %v3614_v35 = vmul.f32 1.6732632, %v4763_v56  ;;  %v3548_v2 = vmul.f32 1.442695, %v3429_v20  ;;  %v6946_v8 = vadd.f32 %v3289_v16, %v6634_v1  ;;  %v3839_v12 = vadd.f32 %v3753_v24, %v3752_v11 }
 0x40c   : > { %v3615_v46 = vmul.f32 1.6732632, %v4765_v3  ;;  %4774 = vpow2.f32 %v3546_v19  ;;  %v3430_v29 = vmin.f32 %v6941_v34, 0.0 }
 0x40d   : > { %v3678_v10 = vadd.f32 %v3614_v35, %v3358_v25  ;;  %4776 = vpow2.f32 %v3548_v2  ;;  %v3431_v50 = vmin.f32 %v6946_v8, 0.0  ;;  %v3293_v23 = vpop.f32.mrb[90].mxu0  ;;  %3840 = vadd.xlane.f32.xlu0 %v3839_v12  ;;  %v3365_v25 = vmax.f32 %v6933_v39, 0.0 }
 0x40e   : > { %v4767_v60 = vpop.eup %4766  ;;  %v3679_v36 = vadd.f32 %v3615_v46, %v3359_v53  ;;  %v3550_v43 = vmul.f32 1.442695, %v3430_v29  ;;  %v6953_v5 = vadd.f32 %v3293_v23, %v6631_v48  ;;  %v3295_v6 = vpop.f32.mrb[91].mxu0 }
 0x40f   : > { %v4769_v57 = vpop.eup %4768  ;;  %v3616_v61 = vmul.f32 1.6732632, %v4767_v60  ;;  %v3552_v9 = vmul.f32 1.442695, %v3431_v50  ;;  %v6957_v30 = vadd.f32 %v3295_v6, %v6634_v1  ;;  %v3754_v26 = vmul.f32 %v6646_v4, %v3678_v10 }
 0x410   : > { %v3617_v0 = vmul.f32 1.6732632, %v4769_v57  ;;  %4778 = vpow2.f32 %v3550_v43  ;;  %v3432_v44 = vmin.f32 %v6953_v5, 0.0  ;;  %v3755_v54 = vmul.f32 %v6649_v49, %v3679_v36 }
 0x411   : > { %v3680_v28 = vadd.f32 %v3616_v61, %v3360_v15  ;;  %4780 = vpow2.f32 %v3552_v9  ;;  %v3433_v40 = vmin.f32 %v6957_v30, 0.0  ;;  %v3299_v59 = vpop.f32.mrb[92].mxu0  ;;  %v3367_v6 = vmax.f32 %v6946_v8, 0.0 }
 0x412   : > { %v4771_v62 = vpop.eup %4770  ;;  %v3554_v31 = vmul.f32 1.442695, %v3432_v44  ;;  %v6964_v13 = vadd.f32 %v3299_v59, %v6631_v48  ;;  %v3301_v63 = vpop.f32.mrb[93].mxu0  ;;  %v3681_v42 = vadd.f32 %v3617_v0, %v3361_v37  ;;  %v3842_v11 = vadd.f32 %v3755_v54, %v3754_v26 }
 0x413   : > { %v4773_v27 = vpop.eup %4772  ;;  %v3618_v45 = vmul.f32 1.6732632, %v4771_v62  ;;  %v3556_v14 = vmul.f32 1.442695, %v3433_v40  ;;  %v6969_v47 = vadd.f32 %v3301_v63, %v6634_v1  ;;  %v3756_v38 = vmul.f32 %v6646_v4, %v3680_v28 }
 0x414   : > { %v3619_v58 = vmul.f32 1.6732632, %v4773_v27  ;;  %4782 = vpow2.f32 %v3554_v31  ;;  %v3434_v18 = vmin.f32 %v6964_v13, 0.0  ;;  %v3757_v3 = vmul.f32 %v6649_v49, %v3681_v42  ;;  %3843 = vadd.xlane.f32.xlu1 %v3842_v11 }
 0x415   : > { %v3682_v52 = vadd.f32 %v3618_v45, %v3362_v7  ;;  %4784 = vpow2.f32 %v3556_v14  ;;  %v3435_v32 = vmin.f32 %v6969_v47, 0.0  ;;  %v3305_v55 = vpop.f32.mrb[94].mxu0  ;;  %v3368_v44 = vmax.f32 %v6953_v5, 0.0  ;;  %v6997_v45 = vld [vmem:[#allocation2] ss:$0 sm:$0xff] }
 0x416   : > { %v4775_v41 = vpop.eup %4774  ;;  %v3683_v20 = vadd.f32 %v3619_v58, %v3363_v17  ;;  %v3558_v22 = vmul.f32 1.442695, %v3434_v18  ;;  %v6976_v56 = vadd.f32 %v3305_v55, %v6631_v48  ;;  %v3307_v19 = vpop.f32.mrb[95].mxu0  ;;  %v3366_v48 = vmax.f32 %v6941_v34, 0.0 }
 0x417   : > { %v4777_v16 = vpop.eup %4776  ;;  %v3620_v21 = vmul.f32 1.6732632, %v4775_v41  ;;  %v3560_v33 = vmul.f32 1.442695, %v3435_v32  ;;  %v6979_v24 = vadd.f32 %v3307_v19, %v6634_v1  ;;  %v3845_v1 = vadd.f32 %v3757_v3, %v3756_v38 }
 0x418   : > { %v3621_v35 = vmul.f32 1.6732632, %v4777_v16  ;;  %4786 = vpow2.f32 %v3558_v22  ;;  %v3436_v2 = vmin.f32 %v6976_v56, 0.0  ;;  %v3758_v50 = vmul.f32 %v6646_v4, %v3682_v52 }
 0x419   : > { %v3684_v53 = vadd.f32 %v3620_v21, %v3364_v51  ;;  %4788 = vpow2.f32 %v3560_v33  ;;  %v3437_v46 = vmin.f32 %v6979_v24, 0.0  ;;  %v3759_v36 = vmul.f32 %v6649_v49, %v3683_v20  ;;  %3846 = vadd.xlane.f32.xlu0 %v3845_v1 }
 0x41a   : > { %v4779_v29 = vpop.eup %4778  ;;  %v3685_v10 = vadd.f32 %v3621_v35, %v3365_v25  ;;  %v3562_v15 = vmul.f32 1.442695, %v3436_v2  ;;  %v3369_v8 = vmax.f32 %v6957_v30, 0.0  ;;  %v3370_v27 = vmax.f32 %v6964_v13, 0.0 }
 0x41b   : > { %v4781_v23 = vpop.eup %4780  ;;  %v3622_v60 = vmul.f32 1.6732632, %v4779_v29  ;;  %v3564_v39 = vmul.f32 1.442695, %v3437_v46  ;;  %v3760_v43 = vmul.f32 %v6646_v4, %v3684_v53  ;;  %v3848_v61 = vadd.f32 %v3759_v36, %v3758_v50 }
 0x41c   : > { %v3623_v12 = vmul.f32 1.6732632, %v4781_v23  ;;  %4790 = vpow2.f32 %v3562_v15  ;;  %v3761_v34 = vmul.f32 %v6649_v49, %v3685_v10  ;;  %v3371_v14 = vmax.f32 %v6969_v47, 0.0 }
 0x41d   : > { %v3686_v57 = vadd.f32 %v3622_v60, %v3366_v48  ;;  %4792 = vpow2.f32 %v3564_v39  ;;  %3849 = vadd.xlane.f32.xlu1 %v3848_v61  ;;  %v3372_v47 = vmax.f32 %v6976_v56, 0.0  ;;  %v3373_v22 = vmax.f32 %v6979_v24, 0.0 }
 0x41e   : > { %v4783_v37 = vpop.eup %4782  ;;  %v3687_v9 = vadd.f32 %v3623_v12, %v3367_v6  ;;  %v3851_v0 = vadd.f32 %v3761_v34, %v3760_v43 }
 0x41f   : > { %v4785_v7 = vpop.eup %4784  ;;  %v3624_v28 = vmul.f32 1.6732632, %v4783_v37  ;;  %v3762_v17 = vmul.f32 %v6646_v4, %v3686_v57 }
 0x420   : > { %v3625_v40 = vmul.f32 1.6732632, %v4785_v7  ;;  %3852 = vadd.xlane.f32.xlu0 %v3851_v0  ;;  %v3763_v59 = vmul.f32 %v6649_v49, %v3687_v9 }
 0x421   : > { %v3688_v62 = vadd.f32 %v3624_v28, %v3368_v44 }
 0x422   : > { %v4787_v31 = vpop.eup %4786  ;;  %v3689_v63 = vadd.f32 %v3625_v40, %v3369_v8  ;;  %v3854_v26 = vadd.f32 %v3763_v59, %v3762_v17 }
 0x423   : > { %v4789_v54 = vpop.eup %4788  ;;  %v3626_v42 = vmul.f32 1.6732632, %v4787_v31  ;;  %v3764_v5 = vmul.f32 %v6646_v4, %v3688_v62 }
 0x424   : > { %v3627_v30 = vmul.f32 1.6732632, %v4789_v54  ;;  %3855 = vadd.xlane.f32.xlu1 %v3854_v26  ;;  %v3765_v58 = vmul.f32 %v6649_v49, %v3689_v63 }
 0x425   : > { %v3690_v51 = vadd.f32 %v3626_v42, %v3370_v27 }
 0x426   : > { %v4791_v18 = vpop.eup %4790  ;;  %v3691_v52 = vadd.f32 %v3627_v30, %v3371_v14  ;;  %v3857_v32 = vadd.f32 %v3765_v58, %v3764_v5 }
 0x427   : > { %v3772_v13 = vpop.xlane.xlu0 %3771  ;;  %v4793_v38 = vpop.eup %4792  ;;  %v3628_v41 = vmul.f32 1.6732632, %v4791_v18  ;;  %v3766_v20 = vmul.f32 %v6646_v4, %v3690_v51 }
 0x428   : > { %v3873_v55 = vadd.f32 %v6997_v45, %v3772_v13  ;;  %v3629_v11 = vmul.f32 1.6732632, %v4793_v38  ;;  %3858 = vadd.xlane.f32.xlu0 %v3857_v32  ;;  %v3767_v19 = vmul.f32 %v6649_v49, %v3691_v52 }
 0x429   : > { %v3692_v16 = vadd.f32 %v3628_v41, %v3372_v47 }
 0x42a   : > { %3906 = vst.msk [vmem:[%s7005_s21] sm:$0xff] %vm3905_vm0, %v3873_v55  ;;  %v3693_v21 = vadd.f32 %v3629_v11, %v3373_v22  ;;  %v3860_v33 = vadd.f32 %v3767_v19, %v3766_v20 }
 0x42b   : > { %v3775_v3 = vpop.xlane.xlu1 %3774  ;;  %v3768_v56 = vmul.f32 %v6646_v4, %v3692_v16 }
 0x42c   : > { %v3874_v25 = vadd.f32 %v6997_v45, %v3775_v3  ;;  %3861 = vadd.xlane.f32.xlu1 %v3860_v33  ;;  %v3769_v24 = vmul.f32 %v6649_v49, %v3693_v21 }
 0x42e   : > { %3907 = vst.msk [vmem:[%s7005_s21 + $0x8] sm:$0xff] %vm3905_vm0, %v3874_v25  ;;  %v3863_v2 = vadd.f32 %v3769_v24, %v3768_v56 }
 0x42f   : > { %v3778_v35 = vpop.xlane.xlu0 %3777 }
 0x430   : > { %v3875_v53 = vadd.f32 %v6997_v45, %v3778_v35  ;;  %3864 = vadd.xlane.f32.xlu0 %v3863_v2 }
 0x432   : > { %3908 = vst.msk [vmem:[%s7005_s21 + $0x10] sm:$0xff] %vm3905_vm0, %v3875_v53 }
 0x437   : > { %v3781_v48 = vpop.xlane.xlu0 %3780 }
 0x438   : > { %v3876_v4 = vadd.f32 %v6997_v45, %v3781_v48 }
 0x43a   : > { %3909 = vst.msk [vmem:[%s7005_s21 + $0x18] sm:$0xff] %vm3905_vm0, %v3876_v4 }
 0x43b   : > { %v3784_v46 = vpop.xlane.xlu1 %3783 }
 0x43c   : > { %v3877_v49 = vadd.f32 %v6997_v45, %v3784_v46 }
 0x43e   : > { %3910 = vst.msk [vmem:[%s7005_s21 + $0x20] sm:$0xff] %vm3905_vm0, %v3877_v49 }
 0x443   : > { %v3787_v29 = vpop.xlane.xlu0 %3786 }
 0x444   : > { %v3878_v10 = vadd.f32 %v6997_v45, %v3787_v29 }
 0x446   : > { %3911 = vst.msk [vmem:[%s7005_s21 + $0x28] sm:$0xff] %vm3905_vm0, %v3878_v10 }
 0x449   : > { %v3790_v15 = vpop.xlane.xlu1 %3789 }
 0x44a   : > { %v3879_v1 = vadd.f32 %v6997_v45, %v3790_v15 }
 0x44c   : > { %3912 = vst.msk [vmem:[%s7005_s21 + $0x30] sm:$0xff] %vm3905_vm0, %v3879_v1 }
 0x44d   : > { %v3793_v50 = vpop.xlane.xlu0 %3792 }
 0x44e   : > { %v3880_v23 = vadd.f32 %v6997_v45, %v3793_v50 }
 0x450   : > { %3913 = vst.msk [vmem:[%s7005_s21 + $0x38] sm:$0xff] %vm3905_vm0, %v3880_v23 }
 0x451   : > { %v3796_v60 = vpop.xlane.xlu1 %3795 }
 0x452   : > { %v3881_v39 = vadd.f32 %v6997_v45, %v3796_v60 }
 0x454   : > { %3914 = vst.msk [vmem:[%s7005_s21 + $0x40] sm:$0xff] %vm3905_vm0, %v3881_v39 }
 0x457   : > { %v3799_v36 = vpop.xlane.xlu0 %3798 }
 0x458   : > { %v3882_v43 = vadd.f32 %v6997_v45, %v3799_v36 }
 0x45a   : > { %3915 = vst.msk [vmem:[%s7005_s21 + $0x48] sm:$0xff] %vm3905_vm0, %v3882_v43 }
 0x45c   : > { %v3802_v6 = vpop.xlane.xlu1 %3801 }
 0x45d   : > { %v3883_v12 = vadd.f32 %v6997_v45, %v3802_v6 }
 0x45f   : > { %3916 = vst.msk [vmem:[%s7005_s21 + $0x50] sm:$0xff] %vm3905_vm0, %v3883_v12 }
 0x460   : > { %v3805_v34 = vpop.xlane.xlu0 %3804 }
 0x461   : > { %v3884_v57 = vadd.f32 %v6997_v45, %v3805_v34 }
 0x463   : > { %3917 = vst.msk [vmem:[%s7005_s21 + $0x58] sm:$0xff] %vm3905_vm0, %v3884_v57 }
 0x465   : > { %v3808_v61 = vpop.xlane.xlu1 %3807 }
 0x466   : > { %v3885_v37 = vadd.f32 %v6997_v45, %v3808_v61 }
 0x468   : > { %3918 = vst.msk [vmem:[%s7005_s21 + $0x60] sm:$0xff] %vm3905_vm0, %v3885_v37 }
 0x46a   : > { %v3811_v9 = vpop.xlane.xlu0 %3810 }
 0x46b   : > { %v3886_v0 = vadd.f32 %v6997_v45, %v3811_v9 }
 0x46d   : > { %3919 = vst.msk [vmem:[%s7005_s21 + $0x68] sm:$0xff] %vm3905_vm0, %v3886_v0 }
 0x46f   : > { %v3814_v7 = vpop.xlane.xlu1 %3813 }
 0x470   : > { %v3887_v44 = vadd.f32 %v6997_v45, %v3814_v7 }
 0x472   : > { %3920 = vst.msk [vmem:[%s7005_s21 + $0x70] sm:$0xff] %vm3905_vm0, %v3887_v44 }
 0x477   : > { %v3817_v28 = vpop.xlane.xlu0 %3816 }
 0x478   : > { %v3888_v17 = vadd.f32 %v6997_v45, %v3817_v28 }
 0x47a   : > { %3921 = vst.msk [vmem:[%s7005_s21 + $0x78] sm:$0xff] %vm3905_vm0, %v3888_v17 }
 0x47b   : > { %v3820_v8 = vpop.xlane.xlu1 %3819 }
 0x47c   : > { %v3889_v40 = vadd.f32 %v6997_v45, %v3820_v8 }
 0x47e   : > { %3922 = vst.msk [vmem:[%s7005_s21 + $0x80] sm:$0xff] %vm3905_vm0, %v3889_v40 }
 0x47f   : > { %v3823_v59 = vpop.xlane.xlu0 %3822 }
 0x480   : > { %v3890_v62 = vadd.f32 %v6997_v45, %v3823_v59 }
 0x482   : > { %3923 = vst.msk [vmem:[%s7005_s21 + $0x88] sm:$0xff] %vm3905_vm0, %v3890_v62 }
 0x483   : > { %v3826_v31 = vpop.xlane.xlu1 %3825 }
 0x484   : > { %v3891_v63 = vadd.f32 %v6997_v45, %v3826_v31 }
 0x486   : > { %3924 = vst.msk [vmem:[%s7005_s21 + $0x90] sm:$0xff] %vm3905_vm0, %v3891_v63 }
 0x487   : > { %v3829_v26 = vpop.xlane.xlu0 %3828 }
 0x488   : > { %v3892_v54 = vadd.f32 %v6997_v45, %v3829_v26 }
 0x48a   : > { %3925 = vst.msk [vmem:[%s7005_s21 + $0x98] sm:$0xff] %vm3905_vm0, %v3892_v54 }
 0x48d   : > { %v3832_v27 = vpop.xlane.xlu1 %3831 }
 0x48e   : > { %v3893_v42 = vadd.f32 %v6997_v45, %v3832_v27 }
 0x490   : > { %3926 = vst.msk [vmem:[%s7005_s21 + $0xa0] sm:$0xff] %vm3905_vm0, %v3893_v42 }
 0x492   : > { %v3835_v5 = vpop.xlane.xlu0 %3834 }
 0x493   : > { %v3894_v14 = vadd.f32 %v6997_v45, %v3835_v5 }
 0x495   : > { %3927 = vst.msk [vmem:[%s7005_s21 + $0xa8] sm:$0xff] %vm3905_vm0, %v3894_v14 }
 0x496   : > { %v3838_v30 = vpop.xlane.xlu1 %3837 }
 0x497   : > { %v3895_v58 = vadd.f32 %v6997_v45, %v3838_v30 }
 0x499   : > { %3928 = vst.msk [vmem:[%s7005_s21 + $0xb0] sm:$0xff] %vm3905_vm0, %v3895_v58 }
 0x49a   : > { %v3841_v51 = vpop.xlane.xlu0 %3840 }
 0x49b   : > { %v3896_v13 = vadd.f32 %v6997_v45, %v3841_v51 }
 0x49d   : > { %3929 = vst.msk [vmem:[%s7005_s21 + $0xb8] sm:$0xff] %vm3905_vm0, %v3896_v13 }
 0x4a1   : > { %v3844_v18 = vpop.xlane.xlu1 %3843 }
 0x4a2   : > { %v3897_v52 = vadd.f32 %v6997_v45, %v3844_v18 }
 0x4a4   : > { %3930 = vst.msk [vmem:[%s7005_s21 + $0xc0] sm:$0xff] %vm3905_vm0, %v3897_v52 }
 0x4a6   : > { %v3847_v32 = vpop.xlane.xlu0 %3846 }
 0x4a7   : > { %v3898_v55 = vadd.f32 %v6997_v45, %v3847_v32 }
 0x4a9   : > { %3931 = vst.msk [vmem:[%s7005_s21 + $0xc8] sm:$0xff] %vm3905_vm0, %v3898_v55 }
 0x4aa   : > { %v3850_v38 = vpop.xlane.xlu1 %3849 }
 0x4ab   : > { %v3899_v47 = vadd.f32 %v6997_v45, %v3850_v38 }
 0x4ad   : > { %v3853_v41 = vpop.xlane.xlu0 %3852  ;;  %3932 = vst.msk [vmem:[%s7005_s21 + $0xd0] sm:$0xff] %vm3905_vm0, %v3899_v47 }
 0x4ae   : > { %v3900_v20 = vadd.f32 %v6997_v45, %v3853_v41 }
 0x4b0   : > { %3933 = vst.msk [vmem:[%s7005_s21 + $0xd8] sm:$0xff] %vm3905_vm0, %v3900_v20 }
 0x4b1   : > { %v3856_v22 = vpop.xlane.xlu1 %3855 }
 0x4b2   : > { %v3901_v11 = vadd.f32 %v6997_v45, %v3856_v22 }
 0x4b4   : > { %3934 = vst.msk [vmem:[%s7005_s21 + $0xe0] sm:$0xff] %vm3905_vm0, %v3901_v11 }
 0x4b5   : > { %v3859_v19 = vpop.xlane.xlu0 %3858 }
 0x4b6   : > { %v3902_v16 = vadd.f32 %v6997_v45, %v3859_v19 }
 0x4b8   : > { %3935 = vst.msk [vmem:[%s7005_s21 + $0xe8] sm:$0xff] %vm3905_vm0, %v3902_v16 }
 0x4b9   : > { %v3862_v21 = vpop.xlane.xlu1 %3861 }
 0x4ba   : > { %v3903_v33 = vadd.f32 %v6997_v45, %v3862_v21 }
 0x4bc   : > { %3936 = vst.msk [vmem:[%s7005_s21 + $0xf0] sm:$0xff] %vm3905_vm0, %v3903_v33 }
 0x4bd   : > { %v3865_v3 = vpop.xlane.xlu0 %3864 }
 0x4be   : > { %v3904_v56 = vadd.f32 %v6997_v45, %v3865_v3 }
 0x4c0   : > { %3937 = vst.msk [vmem:[%s7005_s21 + $0xf8] sm:$0xff] %vm3905_vm0, %v3904_v56 }
 0x4c1 PF: > { %s26_s27 = sadd.s32 1, %s4832_s27  }
 0x4c2   : > { %p23_p3 = scmp.ge.s32.totalorder %s26_s27, 4  }
 0x4c4   :  { %25 = sbr.rel (!%p23_p3) target bundleno = 4 (0x4), region = 110 }
 0x4cb   :  { %3960 = vsyncpa [#allocation4], 1 }
 0x4cc   :  { %3962 = vsyncpa [#allocation4 + $0x1], 1 }

</bundles_post_ra>
